<compile_context>
chip_gen: v6e
topology: v6e:2x2x1
jax: 0.10.0
libtpu: 0.0.40
codegen_flags: <defaults>
</compile_context>

<pallas_src>
import functools

import jax
import jax.numpy as jnp
from jax.experimental import pallas as pl
from jax.experimental.pallas import tpu as pltpu

BN_EPS = 1e-5
LANE = 128


def _round_up(x, m):
    return (x + m - 1) // m * m


def _vmem_limit_bytes():
    # Generation-aware scoped-VMEM budget: ~75% of physical, capped at 100 MiB.
    #   v5e/v6e (128 MiB physical) -> 96 MiB, v7x (64 MiB physical) -> 48 MiB.
    cap = 64 * 1024 * 1024  # conservative fallback, safe on every generation
    try:
        cap = int(pltpu.get_tpu_info().vmem_capacity_bytes)
    except Exception:
        pass
    return min(100 * 1024 * 1024, max(32 * 1024 * 1024, (cap * 3) // 4))


def _conv_step_vmem_bytes(tile_h, W, cin_p, cout_p):
    """Rough per-grid-step VMEM footprint of the fused-tap conv kernels (padded layouts)."""
    rows = tile_h * W
    x_blk = (tile_h + 2) * _round_up(W + 2, 16) * _round_up(cin_p, LANE) * 2
    lhs = tile_h * _round_up(W, 16) * _round_up(9 * cin_p, LANE) * 2
    w_blk = _round_up(9 * cin_p, 16) * cout_p * 2
    acc = _round_up(rows, 8) * cout_p * 4
    out_blk = _round_up(rows, 8) * cout_p * 4
    return 2 * x_blk + lhs + w_blk + acc + 2 * out_blk  # 2x = double-buffered streams


def _pick_tile_h(H, W, cin_p, cout_p, budget):
    """Largest row tile (prefer the whole image) whose working set fits `budget`."""
    cands = [th for th in range(1, H + 1)
             if H % th == 0 and (th == H or (th * W) % 16 == 0)]
    fitting = [th for th in cands
               if _conv_step_vmem_bytes(th, W, cin_p, cout_p) <= budget]
    return max(fitting) if fitting else min(cands)


def _pick_fma_rows(M, cout_p, budget):
    """Pass-2 (pure FMA) row block: biggest divisor of M within the VMEM budget."""
    per_row = cout_p * (2 + 4) * 2  # bf16 in + f32 out, double-buffered
    cap_rows = max(16, budget // per_row)
    if M <= cap_rows:
        return M
    for d in range((cap_rows // 16) * 16, 0, -16):
        if M % d == 0:
            return d
    return M


# ---------------------------------------------------------------------------
# In-kernel fused-tap conv: build the im2col LHS once in VMEM, one MXU matmul
# ---------------------------------------------------------------------------
def _im2col_conv(x_ref, w_ref, lhs_ref, *, tile_h, out_w):
    # x_ref  : (tile_h+2, W+2, Cin_p)  bf16   row tile incl. 1-pixel halo
    # w_ref  : (9*Cin_p, Cout_p)       bf16   taps flattened along K as (dy, dx, cin)
    # lhs_ref: (tile_h, W, 9*Cin_p)    bf16   VMEM scratch holding the im2col LHS
    # returns (tile_h*W, Cout_p) f32
    cin_p = x_ref.shape[-1]
    for dy in range(3):
        for dx in range(3):
            t = dy * 3 + dx
            lhs_ref[:, :, t * cin_p:(t + 1) * cin_p] = (
                x_ref[dy:dy + tile_h, dx:dx + out_w, :])
    lhs = lhs_ref[...].reshape(tile_h * out_w, 9 * cin_p)
    return jnp.dot(lhs, w_ref[...], preferred_element_type=jnp.float32)


# ---------------------------------------------------------------------------
# Pass 1 kernels: per-channel stats (optionally also materialize y in bf16)
# Grid = (core, tile) with semantics ("parallel", "arbitrary"); each core owns
# its own stats block, so the += accumulator never races across cores.
# ---------------------------------------------------------------------------
def conv_stats_kernel(x_ref, w_ref, sum_ref, sq_ref, lhs_ref, *, tile_h, out_w):
    acc = _im2col_conv(x_ref, w_ref, lhs_ref, tile_h=tile_h, out_w=out_w)

    @pl.when(pl.program_id(1) == 0)
    def _init():
        sum_ref[...] = jnp.zeros_like(sum_ref)
        sq_ref[...] = jnp.zeros_like(sq_ref)

    sum_ref[0:1, :] += jnp.sum(acc, axis=0, keepdims=True)
    sq_ref[0:1, :] += jnp.sum(acc * acc, axis=0, keepdims=True)


def conv_stats_y_kernel(x_ref, w_ref, y_ref, sum_ref, sq_ref, lhs_ref, *,
                        tile_h, out_w):
    acc = _im2col_conv(x_ref, w_ref, lhs_ref, tile_h=tile_h, out_w=out_w)
    y_ref[...] = acc.astype(y_ref.dtype)  # bf16 intermediate (halves HBM traffic)

    @pl.when(pl.program_id(1) == 0)
    def _init():
        sum_ref[...] = jnp.zeros_like(sum_ref)
        sq_ref[...] = jnp.zeros_like(sq_ref)

    sum_ref[0:1, :] += jnp.sum(acc, axis=0, keepdims=True)
    sq_ref[0:1, :] += jnp.sum(acc * acc, axis=0, keepdims=True)


# ---------------------------------------------------------------------------
# Pass 2 kernels
# ---------------------------------------------------------------------------
def conv_bn_fused_kernel(x_ref, w_ref, scale_ref, offset_ref, out_ref, lhs_ref, *,
                         tile_h, out_w, relu):
    # Recompute the conv (cheap for small Cin) and apply the folded BN + ReLU.
    acc = _im2col_conv(x_ref, w_ref, lhs_ref, tile_h=tile_h, out_w=out_w)
    out = acc * scale_ref[...] + offset_ref[...]
    if relu:
        out = jnp.maximum(out, 0.0)
    out_ref[...] = out.astype(out_ref.dtype)


def bn_apply_kernel(y_ref, scale_ref, offset_ref, out_ref, *, relu):
    out = y_ref[...].astype(jnp.float32) * scale_ref[...] + offset_ref[...]
    if relu:
        out = jnp.maximum(out, 0.0)
    out_ref[...] = out.astype(out_ref.dtype)


# ---------------------------------------------------------------------------
# Wrapper
# ---------------------------------------------------------------------------
def conv_bn_forward(x_nchw, weight_oihw, bias, gamma, beta, *, relu=True,
                    materialize_y=None):
    """ConvBn forward (training-mode BN). x: (N,Cin,H,W) f32 -> (N,Cout,H,W) f32.

    `bias` is accepted for interface parity but intentionally not applied: a
    per-channel conv bias is cancelled exactly by the BN mean subtraction
    (training-mode batch statistics; do NOT reuse for inference-mode BN).
    """
    del bias
    N, Cin, H, W = x_nchw.shape
    Cout, Cin_w, KH, KW = weight_oihw.shape
    assert Cin == Cin_w and KH == 3 and KW == 3

    Cin_p = _round_up(Cin, 16)                                   # bf16 sublane packing
    Cout_p = _round_up(Cout, LANE if Cout <= LANE else 2 * LANE)  # lane-dense output
    if materialize_y is None:
        materialize_y = Cin >= 128   # small Cin: recompute conv in pass 2 instead

    vmem_limit = _vmem_limit_bytes()
    tile_h = _pick_tile_h(H, W, Cin_p, Cout_p, budget=vmem_limit // 3)
    n_h_tiles = H // tile_h
    n_tiles = N * n_h_tiles
    rows_per_tile = tile_h * W
    M = N * H * W
    if n_tiles > 1 and rows_per_tile % 16 != 0:
        raise NotImplementedError("TODO(synk): pad rows for odd H*W row tilings")

    # Split the pass-1 stats reduction into two per-core partials so both v7x
    # TensorCores can run the conv ("parallel" leading axis); reduced below in JAX.
    n_cores = 2 if (n_tiles >= 2 and n_tiles % 2 == 0) else 1
    tiles_per_core = n_tiles // n_cores

    # ---- glue: NCHW f32 -> padded NHWC bf16 (cast first: halves glue traffic) ----
    x_bf = jnp.transpose(x_nchw.astype(jnp.bfloat16), (0, 2, 3, 1))
    x_pad = jnp.pad(x_bf, ((0, 0), (1, 1), (1, 1), (0, Cin_p - Cin)))
    if n_h_tiles == 1:
        # Whole padded image per tile: pure reshape, no overlapping-halo copy.
        x_tiles = x_pad.reshape(N * (H + 2), W + 2, Cin_p)
    else:
        # TODO(synk): replace with element-offset index_map / manual halo DMA so the
        # overlapping 1-row halo windows are not materialized in HBM.
        x_tiles = jnp.stack(
            [x_pad[:, t * tile_h: t * tile_h + tile_h + 2] for t in range(n_h_tiles)],
            axis=1).reshape(n_tiles * (tile_h + 2), W + 2, Cin_p)

    # weights: (Cout,Cin,3,3) -> (9*Cin_p, Cout_p), K ordered as (dy, dx, cin)
    w = jnp.transpose(weight_oihw, (2, 3, 1, 0))                       # (3,3,Cin,Cout)
    w = jnp.pad(w, ((0, 0), (0, 0), (0, Cin_p - Cin), (0, Cout_p - Cout)))
    w = w.reshape(KH * KW * Cin_p, Cout_p).astype(jnp.bfloat16)

    gamma_p = jnp.pad(gamma.astype(jnp.float32), (0, Cout_p - Cout)).reshape(1, Cout_p)
    beta_p = jnp.pad(beta.astype(jnp.float32), (0, Cout_p - Cout)).reshape(1, Cout_p)

    # ---- pass 1: fused-tap conv -> per-channel sum / sumsq (per-core partials) ----
    x_spec_p1 = pl.BlockSpec((tile_h + 2, W + 2, Cin_p),
                             lambda c, i: (c * tiles_per_core + i, 0, 0))
    w_spec_p1 = pl.BlockSpec((KH * KW * Cin_p, Cout_p), lambda c, i: (0, 0))
    stat_spec = pl.BlockSpec((8, Cout_p), lambda c, i: (c, 0))
    stat_shape = jax.ShapeDtypeStruct((8 * n_cores, Cout_p), jnp.float32)
    lhs_scratch = pltpu.VMEM((tile_h, W, KH * KW * Cin_p), jnp.bfloat16)

    if materialize_y:
        kern1 = functools.partial(conv_stats_y_kernel, tile_h=tile_h, out_w=W)
        out_specs1 = (pl.BlockSpec((rows_per_tile, Cout_p),
                                   lambda c, i: (c * tiles_per_core + i, 0)),
                      stat_spec, stat_spec)
        out_shapes1 = (jax.ShapeDtypeStruct((M, Cout_p), jnp.bfloat16),
                       stat_shape, stat_shape)
    else:
        kern1 = functools.partial(conv_stats_kernel, tile_h=tile_h, out_w=W)
        out_specs1 = (stat_spec, stat_spec)
        out_shapes1 = (stat_shape, stat_shape)

    pass1 = pl.pallas_call(
        kern1,
        grid=(n_cores, tiles_per_core),
        in_specs=[x_spec_p1, w_spec_p1],
        out_specs=out_specs1,
        out_shape=out_shapes1,
        scratch_shapes=[lhs_scratch],
        compiler_params=pltpu.CompilerParams(
            dimension_semantics=("parallel", "arbitrary"),
            vmem_limit_bytes=vmem_limit),
    )(x_tiles, w)

    if materialize_y:
        y2d, s_sum, s_sq = pass1
    else:
        s_sum, s_sq = pass1

    # ---- fold BN into one per-channel FMA (tiny (1, Cout_p) math in JAX) ----------
    # NOTE: var = E[y^2] - mean^2 in f32 is fine at conv-activation scales.
    # TODO(synk): centered second stats pass for extreme activation dynamic ranges.
    inv_m = 1.0 / float(M)
    mean = jnp.sum(s_sum, axis=0, keepdims=True) * inv_m
    ex2 = jnp.sum(s_sq, axis=0, keepdims=True) * inv_m
    var = jnp.maximum(ex2 - mean * mean, 0.0)      # biased variance (PyTorch BN)
    scale = gamma_p * jax.lax.rsqrt(var + BN_EPS)
    offset = beta_p - mean * scale

    # ---- pass 2: fused conv+BN(+ReLU) recompute, or pure FMA on bf16 y ------------
    vec_spec = pl.BlockSpec((1, Cout_p), lambda i: (0, 0))
    if materialize_y:
        fma_rows = _pick_fma_rows(M, Cout_p, budget=vmem_limit // 3)
        out2d = pl.pallas_call(
            functools.partial(bn_apply_kernel, relu=relu),
            grid=(M // fma_rows,),
            in_specs=[pl.BlockSpec((fma_rows, Cout_p), lambda i: (i, 0)),
                      vec_spec, vec_spec],
            out_specs=pl.BlockSpec((fma_rows, Cout_p), lambda i: (i, 0)),
            out_shape=jax.ShapeDtypeStruct((M, Cout_p), jnp.float32),
            compiler_params=pltpu.CompilerParams(
                dimension_semantics=("parallel",),
                vmem_limit_bytes=vmem_limit),
        )(y2d, scale, offset)
    else:
        out2d = pl.pallas_call(
            functools.partial(conv_bn_fused_kernel, tile_h=tile_h, out_w=W, relu=relu),
            grid=(n_tiles,),
            in_specs=[pl.BlockSpec((tile_h + 2, W + 2, Cin_p), lambda i: (i, 0, 0)),
                      pl.BlockSpec((KH * KW * Cin_p, Cout_p), lambda i: (0, 0)),
                      vec_spec, vec_spec],
            out_specs=pl.BlockSpec((rows_per_tile, Cout_p), lambda i: (i, 0)),
            out_shape=jax.ShapeDtypeStruct((M, Cout_p), jnp.float32),
            scratch_shapes=[lhs_scratch],
            compiler_params=pltpu.CompilerParams(
                dimension_semantics=("parallel",),
                vmem_limit_bytes=vmem_limit),
        )(x_tiles, w, scale, offset)

    # TODO(synk): keep activations NHWC/bf16 end-to-end to drop this transpose+de-pad.
    out_nhwc = out2d[:, :Cout].reshape(N, H, W, Cout)
    return jnp.transpose(out_nhwc, (0, 3, 1, 2))


def conv_bn_reference(x_nchw, weight_oihw, bias, gamma, beta, *, relu=True):
    """Plain-JAX reference (same math as PyTorch ConvBn forward in training mode)."""
    y = jax.lax.conv_general_dilated(
        x_nchw.astype(jnp.float32), weight_oihw.astype(jnp.float32),
        window_strides=(1, 1), padding=((1, 1), (1, 1)),
        dimension_numbers=("NCHW", "OIHW", "NCHW"),
        precision=jax.lax.Precision.HIGHEST)
    y = y + bias[None, :, None, None]
    mean = jnp.mean(y, axis=(0, 2, 3), keepdims=True)
    var = jnp.mean((y - mean) ** 2, axis=(0, 2, 3), keepdims=True)
    out = (y - mean) * jax.lax.rsqrt(var + BN_EPS)
    out = out * gamma[None, :, None, None] + beta[None, :, None, None]
    if relu:
        out = jnp.maximum(out, 0.0)
    return out


if __name__ == "__main__":
    key = jax.random.PRNGKey(0)
    k_x, k_w, k_b, k_g, k_beta = jax.random.split(key, 5)

    N, Cin, H, W = 2, 4, 16, 16
    Cout, K = 8, 3
    relu = True

    x = jax.random.normal(k_x, (N, Cin, H, W), dtype=jnp.float32)
    weight = jax.random.normal(k_w, (Cout, Cin, K, K), dtype=jnp.float32) * 0.1
    bias = jax.random.normal(k_b, (Cout,), dtype=jnp.float32) * 0.1
    gamma = 1.0 + 0.1 * jax.random.normal(k_g, (Cout,), dtype=jnp.float32)
    beta = 0.1 * jax.random.normal(k_beta, (Cout,), dtype=jnp.float32)

    ref = conv_bn_reference(x, weight, bias, gamma, beta, relu=relu)

    # Path 1 (default for small Cin): stats-only pass 1 + fused conv+BN+ReLU pass 2.
    out = jax.block_until_ready(
        conv_bn_forward(x, weight, bias, gamma, beta, relu=relu))
    assert out.shape == (N, Cout, H, W)
    err = float(jnp.max(jnp.abs(out - ref)))
    assert jnp.allclose(out, ref, atol=2e-2, rtol=2e-2), (
        f"recompute path mismatch vs reference (max abs err {err})")

    # Path 2 (large-Cin configuration, forced here): bf16 y intermediate + pure-FMA pass 2.
    # Slightly looser tolerance: the intermediate is stored in bf16.
    out2 = jax.block_until_ready(
        conv_bn_forward(x, weight, bias, gamma, beta, relu=relu, materialize_y=True))
    err2 = float(jnp.max(jnp.abs(out2 - ref)))
    assert jnp.allclose(out2, ref, atol=4e-2, rtol=4e-2), (
        f"bf16-y path mismatch vs reference (max abs err {err2})")

    print("KERNEL_OK")
</pallas_src>

<mosaic_0001>
module attributes {stable_mosaic.version = 11 : i64} {
  func.func @conv_stats_kernel(%arg0: i32, %arg1: i32, %arg2: memref<18x18x16xbf16, #tpu.memory_space<vmem>>, %arg3: memref<144x128xbf16, #tpu.memory_space<vmem>>, %arg4: memref<8x128xf32, #tpu.memory_space<vmem>>, %arg5: memref<8x128xf32, #tpu.memory_space<vmem>>, %arg6: memref<16x16x144xbf16, #tpu.memory_space<vmem>>) attributes {dimension_semantics = [#tpu.dimension_semantics<parallel>, #tpu.dimension_semantics<arbitrary>], iteration_bounds = array<i64: 2, 1>, scalar_prefetch = 0 : i64, scratch_operands = 1 : i64, tpu.core_type = #tpu.core_type<tc>, window_params = [{transform_indices = @transform_0, window_bounds = array<i64: 18, 18, 16>}, {pipeline_mode = #tpu.pipeline_mode<synchronous>, transform_indices = @transform_1, window_bounds = array<i64: 144, 128>}, {transform_indices = @transform_2, window_bounds = array<i64: 8, 128>}, {transform_indices = @transform_3, window_bounds = array<i64: 8, 128>}]} {
    %c0 = arith.constant 0 : index
    %c0_0 = arith.constant 0 : index
    %c0_1 = arith.constant 0 : index
    %0 = vector.load %arg2[%c0, %c0_0, %c0_1] : memref<18x18x16xbf16, #tpu.memory_space<vmem>>, vector<16x16x16xbf16>
    %c0_2 = arith.constant 0 : index
    %c0_3 = arith.constant 0 : index
    %c0_4 = arith.constant 0 : index
    %1 = vector.load %arg6[%c0_2, %c0_3, %c0_4] : memref<16x16x144xbf16, #tpu.memory_space<vmem>>, vector<16x16x16xbf16>
    tpu.vector_store %arg6[%c0_2, %c0_3, %c0_4], %0 {strides = array<i32>} : memref<16x16x144xbf16, #tpu.memory_space<vmem>>, vector<16x16x16xbf16>,
    %c0_5 = arith.constant 0 : index
    %c1 = arith.constant 1 : index
    %c0_6 = arith.constant 0 : index
    %2 = vector.load %arg2[%c0_5, %c1, %c0_6] : memref<18x18x16xbf16, #tpu.memory_space<vmem>>, vector<16x16x16xbf16>
    %c0_7 = arith.constant 0 : index
    %c0_8 = arith.constant 0 : index
    %c16 = arith.constant 16 : index
    %3 = vector.load %arg6[%c0_7, %c0_8, %c16] : memref<16x16x144xbf16, #tpu.memory_space<vmem>>, vector<16x16x16xbf16>
    tpu.vector_store %arg6[%c0_7, %c0_8, %c16], %2 {strides = array<i32>} : memref<16x16x144xbf16, #tpu.memory_space<vmem>>, vector<16x16x16xbf16>,
    %c0_9 = arith.constant 0 : index
    %c2 = arith.constant 2 : index
    %c0_10 = arith.constant 0 : index
    %4 = vector.load %arg2[%c0_9, %c2, %c0_10] : memref<18x18x16xbf16, #tpu.memory_space<vmem>>, vector<16x16x16xbf16>
    %c0_11 = arith.constant 0 : index
    %c0_12 = arith.constant 0 : index
    %c32 = arith.constant 32 : index
    %5 = vector.load %arg6[%c0_11, %c0_12, %c32] : memref<16x16x144xbf16, #tpu.memory_space<vmem>>, vector<16x16x16xbf16>
    tpu.vector_store %arg6[%c0_11, %c0_12, %c32], %4 {strides = array<i32>} : memref<16x16x144xbf16, #tpu.memory_space<vmem>>, vector<16x16x16xbf16>,
    %c1_13 = arith.constant 1 : index
    %c0_14 = arith.constant 0 : index
    %c0_15 = arith.constant 0 : index
    %6 = vector.load %arg2[%c1_13, %c0_14, %c0_15] : memref<18x18x16xbf16, #tpu.memory_space<vmem>>, vector<16x16x16xbf16>
    %c0_16 = arith.constant 0 : index
    %c0_17 = arith.constant 0 : index
    %c48 = arith.constant 48 : index
    %7 = vector.load %arg6[%c0_16, %c0_17, %c48] : memref<16x16x144xbf16, #tpu.memory_space<vmem>>, vector<16x16x16xbf16>
    tpu.vector_store %arg6[%c0_16, %c0_17, %c48], %6 {strides = array<i32>} : memref<16x16x144xbf16, #tpu.memory_space<vmem>>, vector<16x16x16xbf16>,
    %c1_18 = arith.constant 1 : index
    %c1_19 = arith.constant 1 : index
    %c0_20 = arith.constant 0 : index
    %8 = vector.load %arg2[%c1_18, %c1_19, %c0_20] : memref<18x18x16xbf16, #tpu.memory_space<vmem>>, vector<16x16x16xbf16>
    %c0_21 = arith.constant 0 : index
    %c0_22 = arith.constant 0 : index
    %c64 = arith.constant 64 : index
    %9 = vector.load %arg6[%c0_21, %c0_22, %c64] : memref<16x16x144xbf16, #tpu.memory_space<vmem>>, vector<16x16x16xbf16>
    tpu.vector_store %arg6[%c0_21, %c0_22, %c64], %8 {strides = array<i32>} : memref<16x16x144xbf16, #tpu.memory_space<vmem>>, vector<16x16x16xbf16>,
    %c1_23 = arith.constant 1 : index
    %c2_24 = arith.constant 2 : index
    %c0_25 = arith.constant 0 : index
    %10 = vector.load %arg2[%c1_23, %c2_24, %c0_25] : memref<18x18x16xbf16, #tpu.memory_space<vmem>>, vector<16x16x16xbf16>
    %c0_26 = arith.constant 0 : index
    %c0_27 = arith.constant 0 : index
    %c80 = arith.constant 80 : index
    %11 = vector.load %arg6[%c0_26, %c0_27, %c80] : memref<16x16x144xbf16, #tpu.memory_space<vmem>>, vector<16x16x16xbf16>
    tpu.vector_store %arg6[%c0_26, %c0_27, %c80], %10 {strides = array<i32>} : memref<16x16x144xbf16, #tpu.memory_space<vmem>>, vector<16x16x16xbf16>,
    %c2_28 = arith.constant 2 : index
    %c0_29 = arith.constant 0 : index
    %c0_30 = arith.constant 0 : index
    %12 = vector.load %arg2[%c2_28, %c0_29, %c0_30] : memref<18x18x16xbf16, #tpu.memory_space<vmem>>, vector<16x16x16xbf16>
    %c0_31 = arith.constant 0 : index
    %c0_32 = arith.constant 0 : index
    %c96 = arith.constant 96 : index
    %13 = vector.load %arg6[%c0_31, %c0_32, %c96] : memref<16x16x144xbf16, #tpu.memory_space<vmem>>, vector<16x16x16xbf16>
    tpu.vector_store %arg6[%c0_31, %c0_32, %c96], %12 {strides = array<i32>} : memref<16x16x144xbf16, #tpu.memory_space<vmem>>, vector<16x16x16xbf16>,
    %c2_33 = arith.constant 2 : index
    %c1_34 = arith.constant 1 : index
    %c0_35 = arith.constant 0 : index
    %14 = vector.load %arg2[%c2_33, %c1_34, %c0_35] : memref<18x18x16xbf16, #tpu.memory_space<vmem>>, vector<16x16x16xbf16>
    %c0_36 = arith.constant 0 : index
    %c0_37 = arith.constant 0 : index
    %c112 = arith.constant 112 : index
    %15 = vector.load %arg6[%c0_36, %c0_37, %c112] : memref<16x16x144xbf16, #tpu.memory_space<vmem>>, vector<16x16x16xbf16>
    tpu.vector_store %arg6[%c0_36, %c0_37, %c112], %14 {strides = array<i32>} : memref<16x16x144xbf16, #tpu.memory_space<vmem>>, vector<16x16x16xbf16>,
    %c2_38 = arith.constant 2 : index
    %c2_39 = arith.constant 2 : index
    %c0_40 = arith.constant 0 : index
    %16 = vector.load %arg2[%c2_38, %c2_39, %c0_40] : memref<18x18x16xbf16, #tpu.memory_space<vmem>>, vector<16x16x16xbf16>
    %c0_41 = arith.constant 0 : index
    %c0_42 = arith.constant 0 : index
    %c128 = arith.constant 128 : index
    %17 = vector.load %arg6[%c0_41, %c0_42, %c128] : memref<16x16x144xbf16, #tpu.memory_space<vmem>>, vector<16x16x16xbf16>
    tpu.vector_store %arg6[%c0_41, %c0_42, %c128], %16 {strides = array<i32>} : memref<16x16x144xbf16, #tpu.memory_space<vmem>>, vector<16x16x16xbf16>,
    %c0_43 = arith.constant 0 : index
    %c0_44 = arith.constant 0 : index
    %c0_45 = arith.constant 0 : index
    %18 = vector.load %arg6[%c0_43, %c0_44, %c0_45] : memref<16x16x144xbf16, #tpu.memory_space<vmem>>, vector<16x16x144xbf16>
    %19 = vector.shape_cast %18 : vector<16x16x144xbf16> to vector<256x144xbf16>
    %c0_46 = arith.constant 0 : index
    %c0_47 = arith.constant 0 : index
    %20 = vector.load %arg3[%c0_46, %c0_47] : memref<144x128xbf16, #tpu.memory_space<vmem>>, vector<144x128xbf16>
    %cst = arith.constant dense<0.000000e+00> : vector<256x128xf32>
    %21 = tpu.matmul %19, %20, %cst {dimension_numbers = #tpu.dot_dimension_numbers<[1], [0], [0], [1], [0, 0, 1, 1], [], []>} : vector<256x144xbf16>, vector<144x128xbf16>, vector<256x128xf32> -> vector<256x128xf32>
    %c0_i32 = arith.constant 0 : i32
    %22 = arith.cmpi eq, %arg1, %c0_i32 : i32
    %23 = arith.extui %22 : i1 to i32
    %c0_i32_48 = arith.constant 0 : i32
    %24 = arith.cmpi ne, %23, %c0_i32_48 : i32
    scf.if %24 {
      %cst_59 = arith.constant 0.000000e+00 : f32
      %36 = vector.broadcast %cst_59 : f32 to vector<8x128xf32>
      %c0_60 = arith.constant 0 : index
      %c0_61 = arith.constant 0 : index
      %37 = vector.load %arg4[%c0_60, %c0_61] : memref<8x128xf32, #tpu.memory_space<vmem>>, vector<8x128xf32>
      tpu.vector_store %arg4[%c0_60, %c0_61], %36 {strides = array<i32>} : memref<8x128xf32, #tpu.memory_space<vmem>>, vector<8x128xf32>,
      %cst_62 = arith.constant 0.000000e+00 : f32
      %38 = vector.broadcast %cst_62 : f32 to vector<8x128xf32>
      %c0_63 = arith.constant 0 : index
      %c0_64 = arith.constant 0 : index
      %39 = vector.load %arg5[%c0_63, %c0_64] : memref<8x128xf32, #tpu.memory_space<vmem>>, vector<8x128xf32>
      tpu.vector_store %arg5[%c0_63, %c0_64], %38 {strides = array<i32>} : memref<8x128xf32, #tpu.memory_space<vmem>>, vector<8x128xf32>,
    } else {
    }
    %c0_49 = arith.constant 0 : index
    %c0_50 = arith.constant 0 : index
    %25 = vector.load %arg4[%c0_49, %c0_50] : memref<8x128xf32, #tpu.memory_space<vmem>>, vector<1x128xf32>
    %cst_51 = arith.constant dense<0.000000e+00> : vector<128xf32>
    %26 = vector.multi_reduction <add>, %21, %cst_51 [0] : vector<256x128xf32> to vector<128xf32>
    %27 = vector.shape_cast %26 : vector<128xf32> to vector<1x128xf32>
    %28 = arith.addf %25, %27 : vector<1x128xf32>
    %c0_52 = arith.constant 0 : index
    %c0_53 = arith.constant 0 : index
    %29 = vector.load %arg4[%c0_52, %c0_53] : memref<8x128xf32, #tpu.memory_space<vmem>>, vector<1x128xf32>
    tpu.vector_store %arg4[%c0_52, %c0_53], %28 {strides = array<i32>} : memref<8x128xf32, #tpu.memory_space<vmem>>, vector<1x128xf32>,
    %c0_54 = arith.constant 0 : index
    %c0_55 = arith.constant 0 : index
    %30 = vector.load %arg5[%c0_54, %c0_55] : memref<8x128xf32, #tpu.memory_space<vmem>>, vector<1x128xf32>
    %31 = arith.mulf %21, %21 : vector<256x128xf32>
    %cst_56 = arith.constant dense<0.000000e+00> : vector<128xf32>
    %32 = vector.multi_reduction <add>, %31, %cst_56 [0] : vector<256x128xf32> to vector<128xf32>
    %33 = vector.shape_cast %32 : vector<128xf32> to vector<1x128xf32>
    %34 = arith.addf %30, %33 : vector<1x128xf32>
    %c0_57 = arith.constant 0 : index
    %c0_58 = arith.constant 0 : index
    %35 = vector.load %arg5[%c0_57, %c0_58] : memref<8x128xf32, #tpu.memory_space<vmem>>, vector<1x128xf32>
    tpu.vector_store %arg5[%c0_57, %c0_58], %34 {strides = array<i32>} : memref<8x128xf32, #tpu.memory_space<vmem>>, vector<1x128xf32>,
    return
  }
  func.func @transform_0(%arg0: i32, %arg1: i32) -> (i32, i32, i32) {
    %c1_i32 = arith.constant 1 : i32
    %0 = arith.muli %arg0, %c1_i32 : i32
    %1 = arith.addi %0, %arg1 : i32
    %c0_i32 = arith.constant 0 : i32
    %c0_i32_0 = arith.constant 0 : i32
    %c0_i32_1 = arith.constant 0 : i32
    return %1, %c0_i32, %c0_i32_0 : i32, i32, i32
  }
  func.func @transform_1(%arg0: i32, %arg1: i32) -> (i32, i32) {
    %c0_i32 = arith.constant 0 : i32
    %c0_i32_0 = arith.constant 0 : i32
    %c0_i32_1 = arith.constant 0 : i32
    return %c0_i32, %c0_i32_0 : i32, i32
  }
  func.func @transform_2(%arg0: i32, %arg1: i32) -> (i32, i32) {
    %c0_i32 = arith.constant 0 : i32
    %c0_i32_0 = arith.constant 0 : i32
    return %arg0, %c0_i32 : i32, i32
  }
  func.func @transform_3(%arg0: i32, %arg1: i32) -> (i32, i32) {
    %c0_i32 = arith.constant 0 : i32
    %c0_i32_0 = arith.constant 0 : i32
    return %arg0, %c0_i32 : i32, i32
  }
}

</mosaic_0001>

<bundles_post_ra>
// kernel: tpu_custom_call.1
= control target key start
LH: loop header
LB: loop body
LE: loop exit
PB: predicated region body
PF: predicated region fallthrough
CT: control target
= control target key end

     0   :  { %9 = vsyncpa [#allocation4], 0  ;;  %s6333_s0 = inlined_call_operand.vmem [shape: bf16[36,18,16], index: 0, kind: input, shape index: {}]   ;;  %s6334_s1 = inlined_call_operand.vmem [shape: bf16[144,128], index: 1, kind: input, shape index: {}]   ;;  %s6335_s2 = inlined_call_operand.hbm [shape: f32[16,128], index: 2, kind: output, shape index: {0}]   ;;  %s6336_s3 = inlined_call_operand.hbm [shape: f32[16,128], index: 3, kind: output, shape index: {1}]  }
   0x1   :  { %11 = vsyncpa [#allocation4 + $0x1], 0 }
   0x2   :  { %12 = vsyncpa [#allocation6], 0 }
   0x3   :  { %14 = vsyncpa [#allocation6 + $0x1], 0  ;;  %s4646_s12 = smov 0   ;;  %s4648_s13 = smov 0  }
   0x4   :  { %s4650_s14 = smov 0   ;;  %s4652_s15 = smov 0  }
   0x5   :  { %s4654_s16 = smov 0   ;;  %s4656_s17 = smov 0  }
   0x6 LB: > { %s4000_s18 = sadd.s32 4294967295, %s4613_s17   ;;  %s4001_s19 = sadd.s32 4294967294, %s4613_s17   ;;  %s4613_s17 = sphi %s4656_s17, %s20_s17   ;;  %s4609_s16 = sphi %s4654_s16, %s6347_s16   ;;  %s4605_s15 = sphi %s4652_s15, %s6346_s15   ;;  %s4601_s14 = sphi %s4650_s14, %s6345_s14   ;;  %s4597_s13 = sphi %s4648_s13, %s6344_s13   ;;  %s4593_s12 = sphi %s4646_s12, %s6343_s12  }
   0x7   : > { %s32_s20 = sadd.s32 1, %s4609_s16  ;;  %s88_s21 = sadd.s32 1, %s4601_s14 }
   0x8   : > { %p34_p0 = scmp.ge.s32.totalorder %s32_s20, 2  ;;  %p98_p1 = scmp.ne.s32.totalorder %s4601_s14, %s4597_s13 }
   0x9   : > { %p99_p2 = scmp.eq.s32.totalorder %s4000_s18, 1  ;;  %p104_p3 = scmp.ne.s32.totalorder %s4597_s13, %s4593_s12 }
   0xa   : > { %s6349_s20 = smov (%p34_p0, %s32_s20), 0  ;;  %p105_p5 = scmp.eq.s32.totalorder %s4001_s19, 1 }
   0xb   : > { %p4686_p4 = por %p99_p2, %p98_p1  ;;  %s85_s23 = ssub.s32 %s4609_s16, %s6349_s20 }
   0xc   : > { %p4004_p6 = scmp.ge.s32.totalorder %s4613_s17, 1  ;;  %p86_p7 = scmp.eq.s32.totalorder %s85_s23, 0 }
   0xd   : > { %p4693_p8 = por %p105_p5, %p104_p3  ;;  %p164_p9 = scmp.lt.s32.totalorder %s4613_s17, 3 }
   0xe   : > { %s4699_s25 = scalar_select %p86_p7, %s4601_s14, %s88_s21  }
   0xf   : > { %p165_p10 = pnand %p4004_p6, %p164_p9 }
  0x10   : > { %s196_s26 = smul.u32 (!%p165_p10), 18, %s4605_s15  ;;  %s4615_s4 = smov (!%p165_p10), 16  }
  0x11   : > { %168 = sbr.rel (%p165_p10) target bundleno = 852 (0x354), region = 28  ;;  %s4616_s5 = smov (!%p165_p10), 32  }
  0x12   : > { %p197_p11 = scmp.lt.s32.totalorder (!%p165_p10), %s196_s26, 35  ;;  %s4617_s6 = smov (!%p165_p10), 48  }
  0x13   : > { %s4618_s7 = smov (!%p165_p10), 64   ;;  %s4619_s8 = smov (!%p165_p10), 80  }
  0x14   : > { %s4620_s9 = smov (!%p165_p10), 96   ;;  %s4621_s10 = smov (!%p165_p10), 112  }
  0x16   : > { %s6351_s26 = smov (!%p197_p11, %s196_s26), 35  ;;  %vm318_vm0 = vsmask.f32 3328  ;;  %vm319_vm1 = vsmask.f32 7440  ;;  %vm237_vm3 = vcmask 125952  }
  0x17   : > { %s4393_s27 = smul.u32 12, %s6351_s26  ;;  %vm4716_vm2 = vmor %vm318_vm0, %vm319_vm1  ;;  %vm930_vm4 = vcmask 1042432   ;;  %vm931_vm5 = vcmask 1046532   ;;  %vm801_vm7 = vcmask 257152   ;;  %vm1141_vm8 = vcmask 388352   ;;  %s4624_s26 = smov [#allocation3]  }
  0x18   : > { %vm4872_vm6 = vmor %vm930_vm4, %vm931_vm5  ;;  %vm1335_vm9 = vcmask 519552   ;;  %vm1896_vm10 = vcmask 650752   ;;  %vm2233_vm11 = vcmask 781952   ;;  %vm2427_vm12 = vcmask 913152  }
  0x19   : > { %s4705_s30 = scalar_lea.vmem %s6333_s0, %s4393_s27  ;;  %vm2988_vm13 = vcmask 1044352   ;;  %vm3541_vm14 = vcmask 130048   ;;  %s4511_s27 = sshll.u32 %s4624_s26, 4  ;;  %s4512_s27 = int_to_ptr.vmem [resolvable:$false] %s4511_s27 }
  0x1a   : > { %v273_v0 = vld [vmem:[%s4705_s30 + $0xc] sm:$0xf]  ;;  %v274_v1 = vld [vmem:[%s4705_s30 + $0x10] sm:$0xf]  ;;  %v270_v2 = vld [vmem:[%s4705_s30] sm:$0xf] }
  0x1b   : > { %v346_v3 = vshrl.u32 %v273_v0, 16  ;;  %v349_v4 = vshll.u32 %v273_v0, 16  ;;  %v355_v5 = vshll.u32 %v274_v1, 16  ;;  %v359_v6 = vshrl.u32 %v274_v1, 16  ;;  %v271_v7 = vld [vmem:[%s4705_s30 + $0x4] sm:$0xf] }
  0x1c   : > { %v322_v8 = vshrl.u32 %v270_v2, 16  ;;  %v325_v9 = vshll.u32 %v270_v2, 16  ;;  %v331_v10 = vshll.u32 %v271_v7, 16  ;;  %v335_v11 = vshrl.u32 %v271_v7, 16  ;;  %v275_v12 = vld [vmem:[%s4705_s30 + $0x14] sm:$0x1] }
  0x1d   : > { %v348_v13 = vrot.slane %v346_v3, 4  ;;  %v351_v14 = vrot.slane %v349_v4, 5  ;;  %v357_v15 = vrot.slane %v355_v5, 5  ;;  %v361_v16 = vrot.slane %v359_v6, 4  ;;  %v272_v17 = vld [vmem:[%s4705_s30 + $0x8] sm:$0x1] }
  0x1e   : > { %v324_v18 = vrot.slane %v322_v8, 4  ;;  %v327_v19 = vrot.slane %v325_v9, 5  ;;  %v333_v20 = vrot.slane %v331_v10, 5  ;;  %v337_v21 = vrot.slane %v335_v11, 4  ;;  %v277_v22 = vld [vmem:[%s4705_s30 + $0x1c] sm:$0xf] }
  0x1f   : > { %v352_v23 = vor.u32 %v351_v14, %v348_v13  ;;  %v362_v24 = vor.u32 %v361_v16, %v357_v15  ;;  %v365_v25 = vshll.u32 %v275_v12, 16  ;;  %v341_v26 = vshll.u32 %v272_v17, 16  ;;  %v278_v30 = vld [vmem:[%s4705_s30 + $0x20] sm:$0x1]  ;;  %v276_v33 = vld [vmem:[%s4705_s30 + $0x18] sm:$0xf] }
  0x20   : > { %v328_v28 = vor.u32 %v327_v19, %v324_v18  ;;  %v338_v29 = vor.u32 %v337_v21, %v333_v20  ;;  %v379_v31 = vshll.u32 %v277_v22, 16  ;;  %v383_v32 = vshrl.u32 %v277_v22, 16  ;;  %v280_v42 = vld [vmem:[%s4705_s30 + $0x28] sm:$0xf]  ;;  %v281_v47 = vld [vmem:[%s4705_s30 + $0x2c] sm:$0x1] }
  0x21   : > { %v353_v34 = vrot.slane %v352_v23, 4  ;;  %v363_v35 = vrot.slane %v362_v24, 4  ;;  %v367_v36 = vrot.slane %v365_v25, 5  ;;  %v343_v37 = vrot.slane %v341_v26, 5  ;;  %v279_v48 = vld [vmem:[%s4705_s30 + $0x24] sm:$0xf] }
  0x22   : > { %v329_v38 = vrot.slane %v328_v28, 4  ;;  %v339_v39 = vrot.slane %v338_v29, 4  ;;  %v381_v40 = vrot.slane %v379_v31, 5  ;;  %v385_v41 = vrot.slane %v383_v32, 4  ;;  %v283_v53 = vld [vmem:[%s4705_s30 + $0x34] sm:$0xf] }
  0x23   : > { %v358_v43 = vsel %vm4716_vm2, %v353_v34, %v357_v15  ;;  %v368_v44 = vsel %vm4716_vm2, %v363_v35, %v367_v36  ;;  %v389_v45 = vshll.u32 %v278_v30, 16  ;;  %v370_v46 = vshrl.u32 %v276_v33, 16  ;;  %v284_v62 = vld [vmem:[%s4705_s30 + $0x38] sm:$0x1]  ;;  %v282_v3 = vld [vmem:[%s4705_s30 + $0x30] sm:$0xf] }
  0x24   : > { %709 = vrot.lane.b32.xlu1 %v358_v43, %s4615_s4  ;;  %v334_v49 = vsel %vm4716_vm2, %v329_v38, %v333_v20  ;;  %v344_v50 = vsel %vm4716_vm2, %v339_v39, %v343_v37  ;;  %v386_v51 = vor.u32 %v385_v41, %v381_v40  ;;  %v373_v52 = vshll.u32 %v276_v33, 16  ;;  %v286_v8 = vld [vmem:[%s4705_s30 + $0x40] sm:$0xf]  ;;  %v287_v17 = vld [vmem:[%s4705_s30 + $0x44] sm:$0x1]  ;;  %s4513_s28 = scalar_lea.vmem %s4512_s27, 256 }
  0x25   : > { %705 = vrot.lane.b32.xlu0 %v334_v49, %s4615_s4  ;;  %v391_v54 = vrot.slane %v389_v45, 5  ;;  %v372_v55 = vrot.slane %v370_v46, 4  ;;  %v403_v56 = vshll.u32 %v280_v42, 16  ;;  %v407_v57 = vshrl.u32 %v280_v42, 16  ;;  %v285_v22 = vld [vmem:[%s4705_s30 + $0x3c] sm:$0xf] }
  0x26   : > { %v387_v58 = vrot.slane %v386_v51, 4  ;;  %v375_v59 = vrot.slane %v373_v52, 5  ;;  %v413_v60 = vshll.u32 %v281_v47, 16  ;;  %v394_v61 = vshrl.u32 %v279_v48, 16  ;;  %v289_v28 = vld [vmem:[%s4705_s30 + $0x4c] sm:$0xf] }
  0x27   : > { %v405_v63 = vrot.slane %v403_v56, 5  ;;  %v409_v0 = vrot.slane %v407_v57, 4  ;;  %v397_v1 = vshll.u32 %v279_v48, 16  ;;  %v427_v2 = vshll.u32 %v283_v53, 16  ;;  %v290_v37 = vld [vmem:[%s4705_s30 + $0x50] sm:$0x1] }
  0x28   : > { %711 = vrot.lane.b32.xlu1 %v368_v44, %s4615_s4  ;;  %v392_v4 = vsel %vm4716_vm2, %v387_v58, %v391_v54  ;;  %v376_v5 = vor.u32 %v375_v59, %v372_v55  ;;  %v415_v6 = vrot.slane %v413_v60, 5  ;;  %v396_v7 = vrot.slane %v394_v61, 4  ;;  %v288_v42 = vld [vmem:[%s4705_s30 + $0x48] sm:$0xf]  ;;  %v292_v47 = vld [vmem:[%s4705_s30 + $0x58] sm:$0xf] }
  0x29   : > { %707 = vrot.lane.b32.xlu0 %v344_v50, %s4615_s4  ;;  %v410_v9 = vor.u32 %v409_v0, %v405_v63  ;;  %v399_v10 = vrot.slane %v397_v1, 5  ;;  %v429_v11 = vrot.slane %v427_v2, 5  ;;  %v431_v12 = vshrl.u32 %v283_v53, 16  ;;  %v293_v56 = vld [vmem:[%s4705_s30 + $0x5c] sm:$0x1] }
  0x2a   : > { %v377_v13 = vrot.slane %v376_v5, 4  ;;  %v437_v14 = vshll.u32 %v284_v62, 16  ;;  %v418_v15 = vshrl.u32 %v282_v3, 16  ;;  %v421_v16 = vshll.u32 %v282_v3, 16  ;;  %v291_v61 = vld [vmem:[%s4705_s30 + $0x54] sm:$0xf] }
  0x2b   : > { %v411_v18 = vrot.slane %v410_v9, 4  ;;  %v400_v19 = vor.u32 %v399_v10, %v396_v7  ;;  %v433_v20 = vrot.slane %v431_v12, 4  ;;  %v451_v21 = vshll.u32 %v286_v8, 16 }
  0x2c   : > { %715 = vrot.lane.b32.xlu1 %v392_v4, %s4615_s4  ;;  %v382_v23 = vsel %vm4716_vm2, %v377_v13, %v381_v40  ;;  %v439_v24 = vrot.slane %v437_v14, 5  ;;  %v420_v25 = vrot.slane %v418_v15, 4  ;;  %v423_v26 = vrot.slane %v421_v16, 5  ;;  %v296_v15 = vld [vmem:[%s4705_s30 + $0x68] sm:$0x1] }
  0x2d   : > { %713 = vrot.lane.b32.xlu0 %v382_v23, %s4615_s4  ;;  %v416_v29 = vsel %vm4716_vm2, %v411_v18, %v415_v6  ;;  %v401_v30 = vrot.slane %v400_v19, 4  ;;  %v434_v31 = vor.u32 %v433_v20, %v429_v11  ;;  %v453_v32 = vrot.slane %v451_v21, 5  ;;  %v295_v6 = vld [vmem:[%s4705_s30 + $0x64] sm:$0xf]  ;;  %v294_v16 = vld [vmem:[%s4705_s30 + $0x60] sm:$0xf] }
  0x2e   : > { %v424_v33 = vor.u32 %v423_v26, %v420_v25  ;;  %v455_v34 = vshrl.u32 %v286_v8, 16  ;;  %v461_v35 = vshll.u32 %v287_v17, 16  ;;  %v442_v36 = vshrl.u32 %v285_v22, 16  ;;  %v298_v25 = vld [vmem:[%s4705_s30 + $0x70] sm:$0xf] }
  0x2f   : > { %v406_v38 = vsel %vm4716_vm2, %v401_v30, %v405_v63  ;;  %v435_v39 = vrot.slane %v434_v31, 4  ;;  %v445_v40 = vshll.u32 %v285_v22, 16  ;;  %v475_v41 = vshll.u32 %v289_v28, 16 }
  0x30   : > { %719 = vrot.lane.b32.xlu1 %v416_v29, %s4615_s4  ;;  %v425_v43 = vrot.slane %v424_v33, 4  ;;  %v457_v44 = vrot.slane %v455_v34, 4  ;;  %v463_v45 = vrot.slane %v461_v35, 5  ;;  %v444_v46 = vrot.slane %v442_v36, 4  ;;  %v299_v35 = vld [vmem:[%s4705_s30 + $0x74] sm:$0x1] }
  0x31   : > { %717 = vrot.lane.b32.xlu0 %v406_v38, %s4615_s4  ;;  %v440_v48 = vsel %vm4716_vm2, %v435_v39, %v439_v24  ;;  %v447_v49 = vrot.slane %v445_v40, 5  ;;  %v477_v50 = vrot.slane %v475_v41, 5  ;;  %v479_v51 = vshrl.u32 %v289_v28, 16  ;;  %v297_v36 = vld [vmem:[%s4705_s30 + $0x6c] sm:$0xf] }
  0x32   : > { %v430_v52 = vsel %vm4716_vm2, %v425_v43, %v429_v11  ;;  %v458_v53 = vor.u32 %v457_v44, %v453_v32  ;;  %v485_v54 = vshll.u32 %v290_v37, 16  ;;  %v466_v55 = vshrl.u32 %v288_v42, 16 }
  0x33   : > { %v448_v57 = vor.u32 %v447_v49, %v444_v46  ;;  %v481_v58 = vrot.slane %v479_v51, 4  ;;  %v469_v59 = vshll.u32 %v288_v42, 16  ;;  %v499_v60 = vshll.u32 %v292_v47, 16 }
  0x34   : > { %723 = vrot.lane.b32.xlu1 %v440_v48, %s4615_s4  ;;  %v459_v62 = vrot.slane %v458_v53, 4  ;;  %v487_v63 = vrot.slane %v485_v54, 5  ;;  %v468_v0 = vrot.slane %v466_v55, 4  ;;  %v503_v1 = vshrl.u32 %v292_v47, 16  ;;  %v302_v54 = vld [vmem:[%s4705_s30 + $0x80] sm:$0x1] }
  0x35   : > { %721 = vrot.lane.b32.xlu0 %v430_v52, %s4615_s4  ;;  %v449_v2 = vrot.slane %v448_v57, 4  ;;  %v482_v3 = vor.u32 %v481_v58, %v477_v50  ;;  %v471_v4 = vrot.slane %v469_v59, 5  ;;  %v501_v5 = vrot.slane %v499_v60, 5  ;;  %v300_v55 = vld [vmem:[%s4705_s30 + $0x78] sm:$0xf] }
  0x36   : > { %v464_v7 = vsel %vm4716_vm2, %v459_v62, %v463_v45  ;;  %v505_v8 = vrot.slane %v503_v1, 4  ;;  %v509_v9 = vshll.u32 %v293_v56, 16  ;;  %v490_v10 = vshrl.u32 %v291_v61, 16  ;;  %v301_v45 = vld [vmem:[%s4705_s30 + $0x7c] sm:$0xf] }
  0x37   : > { %v454_v11 = vsel %vm4716_vm2, %v449_v2, %v453_v32  ;;  %v483_v12 = vrot.slane %v482_v3, 4  ;;  %v472_v13 = vor.u32 %v471_v4, %v468_v0  ;;  %v493_v14 = vshll.u32 %v291_v61, 16  ;;  %v304_v0 = vld [vmem:[%s4705_s30 + $0x88] sm:$0xf] }
  0x38   : > { %727 = vrot.lane.b32.xlu1 %v464_v7, %s4615_s4  ;;  %v506_v17 = vor.u32 %v505_v8, %v501_v5  ;;  %v511_v18 = vrot.slane %v509_v9, 5  ;;  %v492_v19 = vrot.slane %v490_v10, 4  ;;  %v523_v20 = vshll.u32 %v295_v6, 16  ;;  %v303_v10 = vld [vmem:[%s4705_s30 + $0x84] sm:$0xf] }
  0x39   : > { %725 = vrot.lane.b32.xlu0 %v454_v11, %s4615_s4  ;;  %v488_v21 = vsel %vm4716_vm2, %v483_v12, %v487_v63  ;;  %v473_v22 = vrot.slane %v472_v13, 4  ;;  %v495_v23 = vrot.slane %v493_v14, 5  ;;  %v527_v24 = vshrl.u32 %v295_v6, 16 }
  0x3a   : > { %v507_v26 = vrot.slane %v506_v17, 4  ;;  %v525_v28 = vrot.slane %v523_v20, 5  ;;  %v533_v29 = vshll.u32 %v296_v15, 16  ;;  %v514_v30 = vshrl.u32 %v294_v16, 16 }
  0x3b   : > { %v478_v31 = vsel %vm4716_vm2, %v473_v22, %v477_v50  ;;  %v496_v32 = vor.u32 %v495_v23, %v492_v19  ;;  %v529_v33 = vrot.slane %v527_v24, 4  ;;  %v517_v34 = vshll.u32 %v294_v16, 16  ;;  %v307_v19 = vld [vmem:[%s4705_s30 + $0x94] sm:$0xf]  ;;  %v308_v24 = vld [vmem:[%s4705_s30 + $0x98] sm:$0x1] }
  0x3c   : > { %731 = vrot.lane.b32.xlu1 %v488_v21, %s4615_s4  ;;  %v512_v37 = vsel %vm4716_vm2, %v507_v26, %v511_v18  ;;  %v535_v38 = vrot.slane %v533_v29, 5  ;;  %v516_v39 = vrot.slane %v514_v30, 4  ;;  %v547_v40 = vshll.u32 %v298_v25, 16  ;;  %v306_v30 = vld [vmem:[%s4705_s30 + $0x90] sm:$0xf] }
  0x3d   : > { %729 = vrot.lane.b32.xlu0 %v478_v31, %s4615_s4  ;;  %v497_v41 = vrot.slane %v496_v32, 4  ;;  %v530_v42 = vor.u32 %v529_v33, %v525_v28  ;;  %v519_v43 = vrot.slane %v517_v34, 5  ;;  %v551_v44 = vshrl.u32 %v298_v25, 16 }
  0x3e   : > { %v549_v46 = vrot.slane %v547_v40, 5  ;;  %v557_v47 = vshll.u32 %v299_v35, 16  ;;  %v538_v48 = vshrl.u32 %v297_v36, 16  ;;  %v541_v49 = vshll.u32 %v297_v36, 16 }
  0x3f   : > { %v502_v50 = vsel %vm4716_vm2, %v497_v41, %v501_v5  ;;  %v531_v51 = vrot.slane %v530_v42, 4  ;;  %v520_v52 = vor.u32 %v519_v43, %v516_v39  ;;  %v553_v53 = vrot.slane %v551_v44, 4  ;;  %v305_v5 = vld [vmem:[%s4705_s30 + $0x8c] sm:$0x1]  ;;  %v310_v39 = vld [vmem:[%s4705_s30 + $0xa0] sm:$0xf] }
  0x40   : > { %735 = vrot.lane.b32.xlu1 %v512_v37, %s4615_s4  ;;  %v559_v56 = vrot.slane %v557_v47, 5  ;;  %v540_v57 = vrot.slane %v538_v48, 4  ;;  %v543_v58 = vrot.slane %v541_v49, 5  ;;  %v571_v59 = vshll.u32 %v301_v45, 16  ;;  %v311_v48 = vld [vmem:[%s4705_s30 + $0xa4] sm:$0x1] }
  0x41   : > { %733 = vrot.lane.b32.xlu0 %v502_v50, %s4615_s4  ;;  %v536_v60 = vsel %vm4716_vm2, %v531_v51, %v535_v38  ;;  %v521_v61 = vrot.slane %v520_v52, 4  ;;  %v554_v62 = vor.u32 %v553_v53, %v549_v46  ;;  %v575_v63 = vshrl.u32 %v301_v45, 16  ;;  %v309_v49 = vld [vmem:[%s4705_s30 + $0x9c] sm:$0xf] }
  0x42   : > { %v544_v1 = vor.u32 %v543_v58, %v540_v57  ;;  %v573_v2 = vrot.slane %v571_v59, 5  ;;  %v581_v3 = vshll.u32 %v302_v54, 16  ;;  %v562_v4 = vshrl.u32 %v300_v55, 16  ;;  %v313_v58 = vld [vmem:[%s4705_s30 + $0xac] sm:$0xf] }
  0x43   : > { %v526_v6 = vsel %vm4716_vm2, %v521_v61, %v525_v28  ;;  %v555_v7 = vrot.slane %v554_v62, 4  ;;  %v577_v8 = vrot.slane %v575_v63, 4  ;;  %v565_v9 = vshll.u32 %v300_v55, 16 }
  0x44   : > { %739 = vrot.lane.b32.xlu1 %v536_v60, %s4615_s4  ;;  %v545_v11 = vrot.slane %v544_v1, 4  ;;  %v583_v12 = vrot.slane %v581_v3, 5  ;;  %v564_v13 = vrot.slane %v562_v4, 4  ;;  %v595_v14 = vshll.u32 %v304_v0, 16  ;;  %v314_v3 = vld [vmem:[%s4705_s30 + $0xb0] sm:$0x1] }
  0x45   : > { %737 = vrot.lane.b32.xlu0 %v526_v6, %s4615_s4  ;;  %v560_v15 = vsel %vm4716_vm2, %v555_v7, %v559_v56  ;;  %v578_v16 = vor.u32 %v577_v8, %v573_v2  ;;  %v567_v17 = vrot.slane %v565_v9, 5  ;;  %v599_v18 = vshrl.u32 %v304_v0, 16  ;;  %v312_v4 = vld [vmem:[%s4705_s30 + $0xa8] sm:$0xf] }
  0x46   : > { %v550_v20 = vsel %vm4716_vm2, %v545_v11, %v549_v46  ;;  %v597_v21 = vrot.slane %v595_v14, 5  ;;  %v605_v22 = vshll.u32 %v305_v5, 16  ;;  %v586_v23 = vshrl.u32 %v303_v10, 16 }
  0x47   : > { %v579_v25 = vrot.slane %v578_v16, 4  ;;  %v568_v26 = vor.u32 %v567_v17, %v564_v13  ;;  %v601_v28 = vrot.slane %v599_v18, 4  ;;  %v589_v29 = vshll.u32 %v303_v10, 16  ;;  %v316_v13 = vld [vmem:[%s4705_s30 + $0xb8] sm:$0xf] }
  0x48   : > { %743 = vrot.lane.b32.xlu1 %v560_v15, %s4615_s4  ;;  %v607_v31 = vrot.slane %v605_v22, 5  ;;  %v588_v32 = vrot.slane %v586_v23, 4  ;;  %v619_v33 = vshll.u32 %v307_v19, 16  ;;  %v623_v34 = vshrl.u32 %v307_v19, 16  ;;  %v317_v22 = vld [vmem:[%s4705_s30 + $0xbc] sm:$0x1] }
  0x49   : > { %741 = vrot.lane.b32.xlu0 %v550_v20, %s4615_s4  ;;  %v584_v35 = vsel %vm4716_vm2, %v579_v25, %v583_v12  ;;  %v569_v36 = vrot.slane %v568_v26, 4  ;;  %v602_v37 = vor.u32 %v601_v28, %v597_v21  ;;  %v591_v38 = vrot.slane %v589_v29, 5  ;;  %v315_v23 = vld [vmem:[%s4705_s30 + $0xb4] sm:$0xf] }
  0x4a   : > { %v621_v40 = vrot.slane %v619_v33, 5  ;;  %v625_v41 = vrot.slane %v623_v34, 4  ;;  %v629_v42 = vshll.u32 %v308_v24, 16  ;;  %v610_v43 = vshrl.u32 %v306_v30, 16  ;;  %v4842_v33 = vld [vmem:[%s4705_s30 + $0x4] sm:$0xf] }
  0x4b   : > { %v574_v44 = vsel %vm4716_vm2, %v569_v36, %v573_v2  ;;  %v603_v45 = vrot.slane %v602_v37, 4  ;;  %v592_v46 = vor.u32 %v591_v38, %v588_v32  ;;  %v613_v47 = vshll.u32 %v306_v30, 16 }
  0x4c   : > { %747 = vrot.lane.b32.xlu1 %v584_v35, %s4615_s4  ;;  %v626_v50 = vor.u32 %v625_v41, %v621_v40  ;;  %v631_v51 = vrot.slane %v629_v42, 5  ;;  %v612_v52 = vrot.slane %v610_v43, 4  ;;  %v643_v53 = vshll.u32 %v310_v39, 16 }
  0x4d   : > { %745 = vrot.lane.b32.xlu0 %v574_v44, %s4615_s4  ;;  %v608_v54 = vsel %vm4716_vm2, %v603_v45, %v607_v31  ;;  %v593_v55 = vrot.slane %v592_v46, 4  ;;  %v615_v56 = vrot.slane %v613_v47, 5  ;;  %v647_v57 = vshrl.u32 %v310_v39, 16  ;;  %v836_v44 = vld [vmem:[%s4705_s30 + $0x8] sm:$0x1] }
  0x4e   : > { %v627_v59 = vrot.slane %v626_v50, 4  ;;  %v645_v60 = vrot.slane %v643_v53, 5  ;;  %v653_v61 = vshll.u32 %v311_v48, 16  ;;  %v634_v62 = vshrl.u32 %v309_v49, 16  ;;  %v838_v50 = vld [vmem:[%s4705_s30 + $0x10] sm:$0xf] }
  0x4f   : > { %v598_v63 = vsel %vm4716_vm2, %v593_v55, %v597_v21  ;;  %v616_v0 = vor.u32 %v615_v56, %v612_v52  ;;  %v649_v1 = vrot.slane %v647_v57, 4  ;;  %v637_v2 = vshll.u32 %v309_v49, 16  ;;  %v834_v53 = vld [vmem:[%s4705_s30] sm:$0xe] }
  0x50   : > { %751 = vrot.lane.b32.xlu1 %v608_v54, %s4615_s4  ;;  %v632_v5 = vsel %vm4716_vm2, %v627_v59, %v631_v51  ;;  %v655_v6 = vrot.slane %v653_v61, 5  ;;  %v636_v7 = vrot.slane %v634_v62, 4  ;;  %v667_v8 = vshll.u32 %v313_v58, 16  ;;  %v207_v51 = vld [vmem:[%s4705_s30 + $0xc] sm:$0xf] }
  0x51   : > { %749 = vrot.lane.b32.xlu0 %v598_v63, %s4615_s4  ;;  %v617_v9 = vrot.slane %v616_v0, 4  ;;  %v650_v10 = vor.u32 %v649_v1, %v645_v60  ;;  %v639_v11 = vrot.slane %v637_v2, 5  ;;  %v671_v12 = vshrl.u32 %v313_v58, 16  ;;  %v4057_v54 = vld [vmem:[%s4705_s30 + $0x10] sm:$0xf] }
  0x52   : > { %v669_v14 = vrot.slane %v667_v8, 5  ;;  %v677_v15 = vshll.u32 %v314_v3, 16  ;;  %v658_v16 = vshrl.u32 %v312_v4, 16  ;;  %v661_v17 = vshll.u32 %v312_v4, 16  ;;  %240 = vst.msk [vmem:[#allocation2 + $0x10] sm:$0xf] %vm237_vm3, %v207_v51 }
  0x53   : > { %v622_v18 = vsel %vm4716_vm2, %v617_v9, %v621_v40  ;;  %v651_v19 = vrot.slane %v650_v10, 4  ;;  %v640_v20 = vor.u32 %v639_v11, %v636_v7  ;;  %v673_v21 = vrot.slane %v671_v12, 4  ;;  %v205_v55 = vld [vmem:[%s4705_s30] sm:$0xf]  ;;  %v839_v58 = vld [vmem:[%s4705_s30 + $0x14] sm:$0x1] }
  0x54   : > { %755 = vrot.lane.b32.xlu1 %v632_v5, %s4615_s4  ;;  %v679_v24 = vrot.slane %v677_v15, 5  ;;  %v660_v25 = vrot.slane %v658_v16, 4  ;;  %v663_v26 = vrot.slane %v661_v17, 5  ;;  %v691_v28 = vshll.u32 %v316_v13, 16  ;;  %v4056_v59 = vld [vmem:[%s4705_s30 + $0xc] sm:$0xf] }
  0x55   : > { %753 = vrot.lane.b32.xlu0 %v622_v18, %s4615_s4  ;;  %v656_v29 = vsel %vm4716_vm2, %v651_v19, %v655_v6  ;;  %v641_v30 = vrot.slane %v640_v20, 4  ;;  %v674_v31 = vor.u32 %v673_v21, %v669_v14  ;;  %v695_v32 = vshrl.u32 %v316_v13, 16  ;;  %238 = vst.msk [vmem:[#allocation2] sm:$0xf] %vm237_vm3, %v205_v55  ;;  %v208_v63 = vld [vmem:[%s4705_s30 + $0x10] sm:$0xf] }
  0x56   : > { %v664_v34 = vor.u32 %v663_v26, %v660_v25  ;;  %v693_v35 = vrot.slane %v691_v28, 5  ;;  %v701_v36 = vshll.u32 %v317_v22, 16  ;;  %v682_v37 = vshrl.u32 %v315_v23, 16  ;;  %241 = vst.msk [vmem:[#allocation2 + $0x18] sm:$0xf] %vm237_vm3, %v208_v63 }
  0x57   : > { %v646_v38 = vsel %vm4716_vm2, %v641_v30, %v645_v60  ;;  %v675_v39 = vrot.slane %v674_v31, 4  ;;  %v697_v40 = vrot.slane %v695_v32, 4  ;;  %v685_v41 = vshll.u32 %v315_v23, 16  ;;  %v206_v4 = vld [vmem:[%s4705_s30 + $0x4] sm:$0xf] }
  0x58   : > { %759 = vrot.lane.b32.xlu1 %v656_v29, %s4615_s4  ;;  %v665_v42 = vrot.slane %v664_v34, 4  ;;  %v684_v43 = vrot.slane %v682_v37, 4  ;;  %v935_v45 = vrot.slane %v4842_v33, 5  ;;  %v703_v48 = vrot.slane %v701_v36, 5  ;;  %239 = vst.msk [vmem:[#allocation2 + $0x8] sm:$0xf] %vm237_vm3, %v206_v4 }
  0x59   : > { %757 = vrot.lane.b32.xlu0 %v646_v38, %s4615_s4  ;;  %v680_v46 = vsel %vm4716_vm2, %v675_v39, %v679_v24  ;;  %v698_v47 = vor.u32 %v697_v40, %v693_v35  ;;  %v687_v49 = vrot.slane %v685_v41, 5  ;;  %v938_v61 = vrot.slane %v836_v44, 5  ;;  %v837_v9 = vld [vmem:[%s4705_s30 + $0xc] sm:$0xe]  ;;  %v210_v12 = vld [vmem:[%s4705_s30 + $0x1c] sm:$0xf] }
  0x5a   : > { %v670_v52 = vsel %vm4716_vm2, %v665_v42, %v669_v14  ;;  %v937_v60 = vrot.slane %v935_v45, 4  ;;  %v942_v62 = vrot.slane %v838_v50, 5  ;;  %v1426_v2 = vshll.u32 %v4057_v54, 16  ;;  %243 = vst.msk [vmem:[#allocation2 + $0x28] sm:$0xf] %vm237_vm3, %v210_v12 }
  0x5b   : > { %v699_v56 = vrot.slane %v698_v47, 4  ;;  %v688_v57 = vor.u32 %v687_v49, %v684_v43  ;;  %v1430_v3 = vshrl.u32 %v4057_v54, 16  ;;  %v4008_v6 = vrot.slane %v834_v53, 9  ;;  %v209_v17 = vld [vmem:[%s4705_s30 + $0x18] sm:$0xf] }
  0x5c   : > { %763 = vrot.lane.b32.xlu1 %v680_v46, %s4615_s4  ;;  %v1417_v7 = vshrl.u32 %v4056_v59, 16  ;;  %v1420_v10 = vshll.u32 %v4056_v59, 16  ;;  %v945_v11 = vrot.slane %v839_v58, 5  ;;  %v939_v13 = vsel %vm4872_vm6, %v937_v60, %v938_v61  ;;  %v4058_v20 = vld [vmem:[%s4705_s30 + $0x14] sm:$0x1] }
  0x5d   : > { %761 = vrot.lane.b32.xlu0 %v670_v52, %s4615_s4  ;;  %v704_v0 = vsel %vm4716_vm2, %v699_v56, %v703_v48  ;;  %v689_v1 = vrot.slane %v688_v57, 4  ;;  %v944_v14 = vrot.slane %v942_v62, 4  ;;  %v4885_v15 = vrot.slane %v1426_v2, 5  ;;  %242 = vst.msk [vmem:[#allocation2 + $0x20] sm:$0xf] %vm237_vm3, %v209_v17 }
  0x5e   : > { %v1432_v16 = vrot.slane %v1430_v3, 4  ;;  %v936_v18 = vsel %vm4872_vm6, %v4008_v6, %v935_v45  ;;  %v4009_v19 = vrot.slane %v837_v9, 9  ;;  %v1419_v21 = vrot.slane %v1417_v7, 4  ;;  %v212_v23 = vld [vmem:[%s4705_s30 + $0x28] sm:$0xf] }
  0x5f   : > { %v694_v8 = vsel %vm4716_vm2, %v689_v1, %v693_v35  ;;  %v1422_v22 = vrot.slane %v1420_v10, 5  ;;  %v946_v24 = vsel %vm4872_vm6, %v944_v14, %v945_v11  ;;  %v1436_v26 = vshll.u32 %v4058_v20, 16  ;;  %v4105_v28 = vld [vmem:[%s4705_s30 + $0x10] sm:$0xf]  ;;  %245 = vst.msk [vmem:[#allocation2 + $0x38] sm:$0xf] %vm237_vm3, %v212_v23 }
  0x60   : > { %767 = vrot.lane.b32.xlu1 %v704_v0, %s4615_s4  ;;  %v1433_v25 = vor.u32 %v1432_v16, %v4885_v15  ;;  %v211_v29 = vld [vmem:[%s4705_s30 + $0x24] sm:$0xf]  ;;  %v943_v30 = vsel %vm4872_vm6, %v4009_v19, %v942_v62  ;;  %v4201_v32 = vld [vmem:[%s4705_s30 + $0x1c] sm:$0xf]  ;;  %v4025_v33 = vld [vmem:[%s4705_s30 + $0x10] sm:$0xf] }
  0x61   : > { %765 = vrot.lane.b32.xlu0 %v694_v8, %s4615_s4  ;;  %v1423_v31 = vor.u32 %v1422_v22, %v1419_v21  ;;  %244 = vst.msk [vmem:[#allocation2 + $0x30] sm:$0xf] %vm237_vm3, %v211_v29  ;;  %v4200_v34 = vld [vmem:[%s4705_s30 + $0x18] sm:$0xf]  ;;  %v4106_v35 = vld [vmem:[%s4705_s30 + $0x14] sm:$0x1] }
  0x62   : > { %v2027_v36 = vrot.slane %v4105_v28, 5  ;;  %v214_v37 = vld [vmem:[%s4705_s30 + $0x34] sm:$0xf]  ;;  %v1434_v38 = vrot.slane %v1433_v25, 4  ;;  %v1438_v39 = vrot.slane %v1436_v26, 5  ;;  %v2518_v40 = vshll.u32 %v4201_v32, 16 }
  0x63   : > { %v2522_v41 = vshrl.u32 %v4201_v32, 16  ;;  %247 = vst.msk [vmem:[#allocation2 + $0x48] sm:$0xf] %vm237_vm3, %v214_v37  ;;  %v213_v42 = vld [vmem:[%s4705_s30 + $0x30] sm:$0xf]  ;;  %v1424_v44 = vrot.slane %v1423_v31, 4 }
  0x64   : > { %1047 = vrot.lane.b32.xlu1 %v939_v13, %s4616_s5  ;;  %v4024_v43 = vld [vmem:[%s4705_s30 + $0xc] sm:$0xf]  ;;  %v2509_v45 = vshrl.u32 %v4200_v34, 16  ;;  %v2512_v46 = vshll.u32 %v4200_v34, 16  ;;  %246 = vst.msk [vmem:[#allocation2 + $0x40] sm:$0xf] %vm237_vm3, %v213_v42  ;;  %v1439_v51 = vsel %vm4716_vm2, %v1434_v38, %v1438_v39 }
  0x65   : > { %1045 = vrot.lane.b32.xlu0 %v936_v18, %s4616_s5  ;;  %v4104_v47 = vld [vmem:[%s4705_s30 + $0xc] sm:$0xe]  ;;  %v2030_v48 = vrot.slane %v4106_v35, 5  ;;  %v4202_v49 = vld [vmem:[%s4705_s30 + $0x20] sm:$0x1]  ;;  %v2029_v52 = vrot.slane %v2027_v36, 4  ;;  %v1429_v56 = vsel %vm4716_vm2, %v1424_v44, %v4885_v15 }
  0x66   : > { %v216_v50 = vld [vmem:[%s4705_s30 + $0x40] sm:$0xf]  ;;  %v4923_v53 = vrot.slane %v2518_v40, 5  ;;  %v2524_v54 = vrot.slane %v2522_v41, 4  ;;  %v215_v55 = vld [vmem:[%s4705_s30 + $0x3c] sm:$0xf] }
  0x67   : > { %249 = vst.msk [vmem:[#allocation2 + $0x58] sm:$0xf] %vm237_vm3, %v216_v50  ;;  %v4152_v57 = vrot.slane %v4104_v47, 9  ;;  %v2511_v58 = vrot.slane %v2509_v45, 4  ;;  %v2514_v59 = vrot.slane %v2512_v46, 5  ;;  %v2528_v63 = vshll.u32 %v4202_v49, 16 }
  0x68   : > { %1051 = vrot.lane.b32.xlu1 %v946_v24, %s4616_s5  ;;  %v4060_v60 = vld [vmem:[%s4705_s30 + $0x1c] sm:$0xf]  ;;  %248 = vst.msk [vmem:[#allocation2 + $0x50] sm:$0xf] %vm237_vm3, %v215_v55  ;;  %v4059_v61 = vld [vmem:[%s4705_s30 + $0x18] sm:$0xf]  ;;  %v2031_v1 = vsel %vm4872_vm6, %v2029_v52, %v2030_v48  ;;  %v2525_v2 = vor.u32 %v2524_v54, %v4923_v53 }
  0x69   : > { %1049 = vrot.lane.b32.xlu0 %v943_v30, %s4616_s5  ;;  %v218_v62 = vld [vmem:[%s4705_s30 + $0x4c] sm:$0xf]  ;;  %v217_v0 = vld [vmem:[%s4705_s30 + $0x48] sm:$0xf]  ;;  %v1450_v3 = vshll.u32 %v4060_v60, 16  ;;  %v1454_v4 = vshrl.u32 %v4060_v60, 16  ;;  %v2028_v6 = vsel %vm4872_vm6, %v4152_v57, %v2027_v36  ;;  %v2515_v7 = vor.u32 %v2514_v59, %v2511_v58 }
  0x6a   : > { %251 = vst.msk [vmem:[#allocation2 + $0x68] sm:$0xf] %vm237_vm3, %v218_v62  ;;  %250 = vst.msk [vmem:[#allocation2 + $0x60] sm:$0xf] %vm237_vm3, %v217_v0  ;;  %v1441_v8 = vshrl.u32 %v4059_v61, 16  ;;  %v1444_v9 = vshll.u32 %v4059_v61, 16 }
  0x6b   : > { %v220_v10 = vld [vmem:[%s4705_s30 + $0x58] sm:$0xf]  ;;  %v219_v11 = vld [vmem:[%s4705_s30 + $0x54] sm:$0xf]  ;;  %v4169_v12 = vld [vmem:[%s4705_s30 + $0x1c] sm:$0xf] }
  0x6c   : > { %1241 = vrot.lane.b32.xlu1 %v4025_v33, %s4617_s6  ;;  %253 = vst.msk [vmem:[#allocation2 + $0x78] sm:$0xf] %vm237_vm3, %v220_v10  ;;  %252 = vst.msk [vmem:[#allocation2 + $0x70] sm:$0xf] %vm237_vm3, %v219_v11  ;;  %v2526_v13 = vrot.slane %v2525_v2, 4  ;;  %v2530_v14 = vrot.slane %v2528_v63, 5 }
  0x6d   : > { %1239 = vrot.lane.b32.xlu0 %v4024_v43, %s4617_s6  ;;  %v4061_v15 = vld [vmem:[%s4705_s30 + $0x20] sm:$0x1]  ;;  %v1452_v16 = vrot.slane %v1450_v3, 5  ;;  %v1456_v17 = vrot.slane %v1454_v4, 4  ;;  %v4168_v18 = vld [vmem:[%s4705_s30 + $0x18] sm:$0xf] }
  0x6e   : > { %v2516_v19 = vrot.slane %v2515_v7, 4  ;;  %v1443_v20 = vrot.slane %v1441_v8, 4  ;;  %v1446_v21 = vrot.slane %v1444_v9, 5  ;;  %v222_v22 = vld [vmem:[%s4705_s30 + $0x64] sm:$0xf]  ;;  %v1460_v24 = vshll.u32 %v4061_v15, 16 }
  0x6f   : > { %v221_v23 = vld [vmem:[%s4705_s30 + $0x60] sm:$0xf]  ;;  %255 = vst.msk [vmem:[#allocation2 + $0x88] sm:$0xf] %vm237_vm3, %v222_v22  ;;  %v2531_v25 = vsel %vm4716_vm2, %v2526_v13, %v2530_v14  ;;  %v1457_v26 = vor.u32 %v1456_v17, %v1452_v16  ;;  %v4108_v30 = vld [vmem:[%s4705_s30 + $0x1c] sm:$0xf] }
  0x70   : > { %1802 = vrot.lane.b32.xlu1 %v1439_v51, %s4618_s7  ;;  %254 = vst.msk [vmem:[#allocation2 + $0x80] sm:$0xf] %vm237_vm3, %v221_v23  ;;  %v2521_v28 = vsel %vm4716_vm2, %v2516_v19, %v4923_v53  ;;  %v1447_v29 = vor.u32 %v1446_v21, %v1443_v20  ;;  %v4204_v31 = vld [vmem:[%s4705_s30 + $0x28] sm:$0xf]  ;;  %v4027_v32 = vld [vmem:[%s4705_s30 + $0x1c] sm:$0xf] }
  0x71   : > { %1800 = vrot.lane.b32.xlu0 %v1429_v56, %s4618_s7  ;;  %v4203_v33 = vld [vmem:[%s4705_s30 + $0x24] sm:$0xf]  ;;  %v224_v34 = vld [vmem:[%s4705_s30 + $0x70] sm:$0xf]  ;;  %v4026_v35 = vld [vmem:[%s4705_s30 + $0x18] sm:$0xf] }
  0x72   : > { %v1462_v36 = vrot.slane %v1460_v24, 5  ;;  %v4109_v37 = vld [vmem:[%s4705_s30 + $0x20] sm:$0x1]  ;;  %257 = vst.msk [vmem:[#allocation2 + $0x98] sm:$0xf] %vm237_vm3, %v224_v34  ;;  %v1458_v39 = vrot.slane %v1457_v26, 4 }
  0x73   : > { %v223_v38 = vld [vmem:[%s4705_s30 + $0x6c] sm:$0xf]  ;;  %v2034_v40 = vrot.slane %v4108_v30, 5  ;;  %v4107_v41 = vld [vmem:[%s4705_s30 + $0x18] sm:$0xe]  ;;  %v2542_v42 = vshll.u32 %v4204_v31, 16 }
  0x74   : > { %2139 = vrot.lane.b32.xlu1 %v2031_v1, %s4619_s8  ;;  %v2546_v43 = vshrl.u32 %v4204_v31, 16  ;;  %256 = vst.msk [vmem:[#allocation2 + $0x90] sm:$0xf] %vm237_vm3, %v223_v38  ;;  %v1448_v44 = vrot.slane %v1447_v29, 4  ;;  %v2533_v45 = vshrl.u32 %v4203_v33, 16  ;;  %v2536_v46 = vshll.u32 %v4203_v33, 16 }
  0x75   : > { %2137 = vrot.lane.b32.xlu0 %v2028_v6, %s4619_s8  ;;  %v226_v47 = vld [vmem:[%s4705_s30 + $0x7c] sm:$0xf]  ;;  %v225_v48 = vld [vmem:[%s4705_s30 + $0x78] sm:$0xf]  ;;  %v2037_v49 = vrot.slane %v4109_v37, 5  ;;  %v4153_v50 = vrot.slane %v4107_v41, 9  ;;  %v1463_v51 = vsel %vm4716_vm2, %v1458_v39, %v1462_v36 }
  0x76   : > { %259 = vst.msk [vmem:[#allocation2 + $0xa8] sm:$0xf] %vm237_vm3, %v226_v47  ;;  %258 = vst.msk [vmem:[#allocation2 + $0xa0] sm:$0xf] %vm237_vm3, %v225_v48  ;;  %v2036_v52 = vrot.slane %v2034_v40, 4  ;;  %v4986_v54 = vrot.slane %v2542_v42, 5  ;;  %v1453_v56 = vsel %vm4716_vm2, %v1448_v44, %v1452_v16 }
  0x77   : > { %v4205_v53 = vld [vmem:[%s4705_s30 + $0x2c] sm:$0x1]  ;;  %v2548_v55 = vrot.slane %v2546_v43, 4  ;;  %v2535_v57 = vrot.slane %v2533_v45, 4  ;;  %v2538_v58 = vrot.slane %v2536_v46, 5  ;;  %v2035_v1 = vsel %vm4872_vm6, %v4153_v50, %v2034_v40  ;;  %v4463_v9 = vld [vmem:[%s6334_s1 + $0x38] sm:$0xff]  }
  0x78   : > { %2333 = vrot.lane.b32.xlu1 %v4169_v12, %s4620_s9  ;;  %v228_v59 = vld [vmem:[%s4705_s30 + $0x88] sm:$0xf]  ;;  %v227_v60 = vld [vmem:[%s4705_s30 + $0x84] sm:$0xf]  ;;  %v2552_v61 = vshll.u32 %v4205_v53, 16  ;;  %v2038_v62 = vsel %vm4872_vm6, %v2036_v52, %v2037_v49  ;;  %v4622_v23 = vmov 0  }
  0x79   : > { %2331 = vrot.lane.b32.xlu0 %v4168_v18, %s4620_s9  ;;  %261 = vst.msk [vmem:[#allocation2 + $0xb8] sm:$0xf] %vm237_vm3, %v228_v59  ;;  %260 = vst.msk [vmem:[#allocation2 + $0xb0] sm:$0xf] %vm237_vm3, %v227_v60  ;;  %v2549_v63 = vor.u32 %v2548_v55, %v4986_v54  ;;  %v5000_v0 = vld [vmem:[%s4705_s30 + $0x1c] sm:$0xf]  ;;  %v2539_v2 = vor.u32 %v2538_v58, %v2535_v57  ;;  %3590 = vmatprep.subr.bf16.mxu0 %v4622_v23 }
  0x7a   : > { %v4063_v3 = vld [vmem:[%s4705_s30 + $0x28] sm:$0xf]  ;;  %v230_v4 = vld [vmem:[%s4705_s30 + $0x94] sm:$0xf]  ;;  %v229_v6 = vld [vmem:[%s4705_s30 + $0x90] sm:$0xf]  ;;  %4375 = vmatprep.subr.bf16.mxu1 %v4622_v23  ;;  %3591 = vmatpush1.bf16.msra.mxu0 %v4463_v9 }
  0x7b   : > { %v4171_v7 = vld [vmem:[%s4705_s30 + $0x28] sm:$0xf]  ;;  %v4062_v8 = vld [vmem:[%s4705_s30 + $0x24] sm:$0xf]  ;;  %263 = vst.msk [vmem:[#allocation2 + $0xc8] sm:$0xf] %vm237_vm3, %v230_v4  ;;  %4384 = vmatpush1.bf16.msra.mxu1 %v4463_v9  ;;  %3592 = vmatprep.subr.bf16.mxu0 %v4622_v23 }
  0x7c   : > { %2894 = vrot.lane.b32.xlu1 %v2531_v25, %s4621_s10  ;;  %262 = vst.msk [vmem:[#allocation2 + $0xc0] sm:$0xf] %vm237_vm3, %v229_v6  ;;  %v4170_v10 = vld [vmem:[%s4705_s30 + $0x24] sm:$0xf]  ;;  %v2554_v11 = vrot.slane %v2552_v61, 5  ;;  %v949_v13 = vrot.slane %v5000_v0, 5  ;;  %4376 = vmatprep.subr.bf16.mxu1 %v4622_v23 }
  0x7d   : > { %2892 = vrot.lane.b32.xlu0 %v2521_v28, %s4621_s10  ;;  %v842_v12 = vld [vmem:[%s4705_s30 + $0x20] sm:$0x1]  ;;  %v2550_v15 = vrot.slane %v2549_v63, 4  ;;  %v1474_v16 = vshll.u32 %v4063_v3, 16  ;;  %v1478_v17 = vshrl.u32 %v4063_v3, 16  ;;  %v2540_v19 = vrot.slane %v2539_v2, 4 }
  0x7e   : > { %v232_v14 = vld [vmem:[%s4705_s30 + $0xa0] sm:$0xf]  ;;  %v231_v18 = vld [vmem:[%s4705_s30 + $0x9c] sm:$0xf]  ;;  %v1465_v20 = vshrl.u32 %v4062_v8, 16  ;;  %v1468_v21 = vshll.u32 %v4062_v8, 16 }
  0x7f   : > { %265 = vst.msk [vmem:[#allocation2 + $0xd8] sm:$0xf] %vm237_vm3, %v232_v14  ;;  %264 = vst.msk [vmem:[#allocation2 + $0xd0] sm:$0xf] %vm237_vm3, %v231_v18  ;;  %v234_v22 = vld [vmem:[%s4705_s30 + $0xac] sm:$0xf]  ;;  %v2555_v31 = vsel %vm4716_vm2, %v2550_v15, %v2554_v11  ;;  %v2545_v36 = vsel %vm4716_vm2, %v2540_v19, %v4986_v54 }
  0x80   : > { %1245 = vrot.lane.b32.xlu1 %v4027_v32, %s4617_s6  ;;  %v840_v24 = vld [vmem:[%s4705_s30 + $0x18] sm:$0xe]  ;;  %267 = vst.msk [vmem:[#allocation2 + $0xe8] sm:$0xf] %vm237_vm3, %v234_v22  ;;  %v233_v25 = vld [vmem:[%s4705_s30 + $0xa8] sm:$0xf] }
  0x81   : > { %1243 = vrot.lane.b32.xlu0 %v4026_v35, %s4617_s6  ;;  %v4464_v26 = vld [vmem:[%s6334_s1 + $0x30] sm:$0xff]   ;;  %v952_v28 = vrot.slane %v842_v12, 5  ;;  %266 = vst.msk [vmem:[#allocation2 + $0xe0] sm:$0xf] %vm237_vm3, %v233_v25  ;;  %v236_v29 = vld [vmem:[%s4705_s30 + $0xb8] sm:$0xf] }
  0x82   : > { %v235_v30 = vld [vmem:[%s4705_s30 + $0xb4] sm:$0xf]  ;;  %v951_v32 = vrot.slane %v949_v13, 4  ;;  %v4064_v33 = vld [vmem:[%s4705_s30 + $0x2c] sm:$0x1]  ;;  %v5041_v34 = vrot.slane %v1474_v16, 5  ;;  %3593 = vmatpush1.bf16.msra.mxu0 %v4464_v26  ;;  %4385 = vmatpush1.bf16.msra.mxu1 %v4464_v26 }
  0x83   : > { %v1480_v35 = vrot.slane %v1478_v17, 4  ;;  %269 = vst.msk [vmem:[#allocation2 + $0xf8] sm:$0xf] %vm237_vm3, %v236_v29  ;;  %268 = vst.msk [vmem:[#allocation2 + $0xf0] sm:$0xf] %vm237_vm3, %v235_v30  ;;  %v4010_v37 = vrot.slane %v840_v24, 9  ;;  %3594 = vmatprep.subr.bf16.mxu0 %v4622_v23  ;;  %4377 = vmatprep.subr.bf16.mxu1 %v4622_v23 }
  0x84   : > { %1806 = vrot.lane.b32.xlu1 %v1463_v51, %s4618_s7  ;;  %v1467_v38 = vrot.slane %v1465_v20, 4  ;;  %v1470_v39 = vrot.slane %v1468_v21, 5  ;;  %v4465_v40 = vld [vmem:[%s6334_s1 + $0x28] sm:$0xff]   ;;  %v1484_v41 = vshll.u32 %v4064_v33, 16  ;;  %v953_v42 = vsel %vm4872_vm6, %v951_v32, %v952_v28  ;;  %v4207_v47 = vld [vmem:[%s4705_s30 + $0x34] sm:$0xf] }
  0x85   : > { %1804 = vrot.lane.b32.xlu0 %v1453_v56, %s4618_s7  ;;  %v1481_v43 = vor.u32 %v1480_v35, %v5041_v34  ;;  %v950_v44 = vsel %vm4872_vm6, %v4010_v37, %v949_v13  ;;  %v5062_v46 = vld [vmem:[%s4705_s30 + $0x28] sm:$0xf]  ;;  %v4206_v48 = vld [vmem:[%s4705_s30 + $0x30] sm:$0xf]  ;;  %v4466_v49 = vld [vmem:[%s6334_s1 + $0x20] sm:$0xff]   ;;  %v2566_v55 = vshll.u32 %v4207_v47, 16 }
  0x86   : > { %v1471_v45 = vor.u32 %v1470_v39, %v1467_v38  ;;  %3595 = vmatpush1.bf16.msra.mxu0 %v4465_v40  ;;  %4386 = vmatpush1.bf16.msra.mxu1 %v4465_v40  ;;  %v4029_v50 = vld [vmem:[%s4705_s30 + $0x28] sm:$0xf]  ;;  %v1486_v51 = vrot.slane %v1484_v41, 5  ;;  %v4112_v53 = vld [vmem:[%s4705_s30 + $0x2c] sm:$0x1]  ;;  %v2041_v54 = vrot.slane %v5062_v46, 5 }
  0x87   : > { %3596 = vmatprep.subr.bf16.mxu0 %v4622_v23  ;;  %v1482_v52 = vrot.slane %v1481_v43, 4  ;;  %v2570_v56 = vshrl.u32 %v4207_v47, 16  ;;  %4378 = vmatprep.subr.bf16.mxu1 %v4622_v23  ;;  %v4028_v58 = vld [vmem:[%s4705_s30 + $0x24] sm:$0xf]  ;;  %v2557_v60 = vshrl.u32 %v4206_v48, 16  ;;  %v2560_v61 = vshll.u32 %v4206_v48, 16 }
  0x88   : > { %2143 = vrot.lane.b32.xlu1 %v2038_v62, %s4619_s8  ;;  %v1472_v59 = vrot.slane %v1471_v45, 4  ;;  %v4110_v63 = vld [vmem:[%s4705_s30 + $0x24] sm:$0xe]  ;;  %v4467_v0 = vld [vmem:[%s6334_s1 + $0x18] sm:$0xff]   ;;  %v2043_v3 = vrot.slane %v2041_v54, 4  ;;  %v5088_v4 = vrot.slane %v2566_v55, 5 }
  0x89   : > { %2141 = vrot.lane.b32.xlu0 %v2035_v1, %s4619_s8  ;;  %v2044_v1 = vrot.slane %v4112_v53, 5  ;;  %v1487_v2 = vsel %vm4716_vm2, %v1482_v52, %v1486_v51  ;;  %v2572_v6 = vrot.slane %v2570_v56, 4  ;;  %v4154_v9 = vrot.slane %v4110_v63, 9  ;;  %v4468_v14 = vld [vmem:[%s6334_s1 + $0x10] sm:$0xff]   ;;  %v5107_v18 = vld [vmem:[%s4705_s30 + $0x28] sm:$0xf] }
  0x8a   : > { %3597 = vmatpush1.bf16.msra.mxu0 %v4466_v49  ;;  %4387 = vmatpush1.bf16.msra.mxu1 %v4466_v49  ;;  %v1477_v8 = vsel %vm4716_vm2, %v1472_v59, %v5041_v34  ;;  %v2559_v11 = vrot.slane %v2557_v60, 4  ;;  %v2562_v12 = vrot.slane %v2560_v61, 5  ;;  %v4066_v19 = vld [vmem:[%s4705_s30 + $0x34] sm:$0xf]  ;;  %v845_v26 = vld [vmem:[%s4705_s30 + $0x2c] sm:$0x1] }
  0x8b   : > { %3598 = vmatprep.subr.bf16.mxu0 %v4622_v23  ;;  %4379 = vmatprep.subr.bf16.mxu1 %v4622_v23  ;;  %v2045_v15 = vsel %vm4872_vm6, %v2043_v3, %v2044_v1  ;;  %v2573_v16 = vor.u32 %v2572_v6, %v5088_v4  ;;  %v2042_v21 = vsel %vm4872_vm6, %v4154_v9, %v2041_v54  ;;  %v4173_v25 = vld [vmem:[%s4705_s30 + $0x34] sm:$0xf]  ;;  %v4065_v28 = vld [vmem:[%s4705_s30 + $0x30] sm:$0xf]  ;;  %v4469_v29 = vld [vmem:[%s6334_s1 + $0x8] sm:$0xff]   ;;  %v956_v30 = vrot.slane %v5107_v18, 5 }
  0x8c   : > { %2337 = vrot.lane.b32.xlu1 %v4171_v7, %s4620_s9  ;;  %v2563_v22 = vor.u32 %v2562_v12, %v2559_v11  ;;  %v1498_v32 = vshll.u32 %v4066_v19, 16  ;;  %v1502_v35 = vshrl.u32 %v4066_v19, 16  ;;  %v4172_v37 = vld [vmem:[%s4705_s30 + $0x30] sm:$0xf]  ;;  %v1489_v39 = vshrl.u32 %v4065_v28, 16  ;;  %v4471_v61 = vld [vmem:[%s6334_s1 + $0x40] sm:$0xff]  }
  0x8d   : > { %2335 = vrot.lane.b32.xlu0 %v4170_v10, %s4620_s9  ;;  %v4208_v10 = vld [vmem:[%s4705_s30 + $0x38] sm:$0x1]  ;;  %v2574_v33 = vrot.slane %v2573_v16, 4  ;;  %v1492_v40 = vshll.u32 %v4065_v28, 16  ;;  %v4248_v43 = vld [vmem:[%s4705_s30 + $0x18] sm:$0xe] }
  0x8e   : > { %3599 = vmatpush1.bf16.msra.mxu0 %v4467_v0  ;;  %4388 = vmatpush1.bf16.msra.mxu1 %v4467_v0  ;;  %v2576_v17 = vshll.u32 %v4208_v10, 16  ;;  %v2564_v38 = vrot.slane %v2563_v22, 4  ;;  %v959_v45 = vrot.slane %v845_v26, 5  ;;  %v5135_v47 = vrot.slane %v1498_v32, 5  ;;  %v4249_v48 = vld [vmem:[%s4705_s30 + $0x1c] sm:$0xf] }
  0x8f   : > { %3600 = vmatprep.subr.bf16.mxu0 %v4622_v23  ;;  %4380 = vmatprep.subr.bf16.mxu1 %v4622_v23  ;;  %v4250_v51 = vld [vmem:[%s4705_s30 + $0x20] sm:$0x1]  ;;  %v4296_v52 = vrot.slane %v4248_v43, 9  ;;  %v3119_v53 = vrot.slane %v4249_v48, 5  ;;  %v4067_v56 = vld [vmem:[%s4705_s30 + $0x38] sm:$0x1] }
  0x90   : > { %2898 = vrot.lane.b32.xlu1 %v2555_v31, %s4621_s10  ;;  %v843_v31 = vld [vmem:[%s4705_s30 + $0x24] sm:$0xe]  ;;  %v2578_v34 = vrot.slane %v2576_v17, 5  ;;  %v2569_v55 = vsel %vm4716_vm2, %v2564_v38, %v5088_v4  ;;  %v3122_v59 = vrot.slane %v4250_v51, 5  ;;  %v5163_v3 = vld [vmem:[%s4705_s30 + $0x34] sm:$0xf] }
  0x91   : > { %2896 = vrot.lane.b32.xlu0 %v2545_v36, %s4621_s10  ;;  %v4011_v46 = vrot.slane %v843_v31, 9  ;;  %v3121_v63 = vrot.slane %v3119_v53, 4  ;;  %v4210_v9 = vld [vmem:[%s4705_s30 + $0x40] sm:$0xf]  ;;  %v4031_v11 = vld [vmem:[%s4705_s30 + $0x34] sm:$0xf] }
  0x92   : > { %3601 = vmatpush1.bf16.msra.mxu0 %v4468_v14  ;;  %4389 = vmatpush1.bf16.msra.mxu1 %v4468_v14  ;;  %v2579_v49 = vsel %vm4716_vm2, %v2574_v33, %v2578_v34  ;;  %v4209_v12 = vld [vmem:[%s4705_s30 + $0x3c] sm:$0xf]  ;;  %v2048_v14 = vrot.slane %v5163_v3, 5  ;;  %v4113_v17 = vld [vmem:[%s4705_s30 + $0x30] sm:$0xe]  ;;  %v2590_v18 = vshll.u32 %v4210_v9, 16 }
  0x93   : > { %3602 = vmatprep.subr.bf16.mxu0 %v4622_v23  ;;  %4381 = vmatprep.subr.bf16.mxu1 %v4622_v23  ;;  %v3123_v4 = vsel %vm4872_vm6, %v3121_v63, %v3122_v59  ;;  %v2594_v19 = vshrl.u32 %v4210_v9, 16  ;;  %v2581_v22 = vshrl.u32 %v4209_v12, 16  ;;  %v4252_v28 = vld [vmem:[%s4705_s30 + $0x28] sm:$0xf]  ;;  %v4155_v31 = vrot.slane %v4113_v17, 9 }
  0x94   : > { %1055 = vrot.lane.b32.xlu1 %v953_v42, %s4616_s5  ;;  %v4470_v42 = vld [vmem:[%s6334_s1] sm:$0xff]   ;;  %3262 = vst.msk [vmem:[#allocation2 + $0xc] sm:$0xf] %vm237_vm3, %v3123_v4  ;;  %v4253_v32 = vld [vmem:[%s4705_s30 + $0x2c] sm:$0x1] }
  0x95   : > { %1053 = vrot.lane.b32.xlu0 %v950_v44, %s4616_s5  ;;  %v958_v44 = vrot.slane %v956_v30, 4  ;;  %v3129_v43 = vrot.slane %v4253_v32, 5  ;;  %v860_v3 = vld [vmem:[%s4705_s30 + $0x68] sm:$0x1] }
  0x96   : > { %v710_v57 = vpop.permute.xlu1 %709  ;;  %3603 = vmatpush1.bf16.msra.mxu0 %v4469_v29  ;;  %4390 = vmatpush1.bf16.msra.mxu1 %v4469_v29  ;;  %v2050_v29 = vrot.slane %v2048_v14, 4 }
  0x97   : > { %804 = vst.msk [vmem:[#allocation2 + $0x10] sm:$0xf] %vm801_vm7, %v710_v57  ;;  %v706_v62 = vpop.permute.xlu0 %705  ;;  %3604 = vmatprep.subr.bf16.mxu0 %v4622_v23  ;;  %4382 = vmatprep.subr.bf16.mxu1 %v4622_v23  ;;  %v1491_v57 = vrot.slane %v1489_v39, 4  ;;  %v960_v0 = vsel %vm4872_vm6, %v958_v44, %v959_v45 }
  0x98   : > { %802 = vst.msk [vmem:[#allocation2] sm:$0xf] %vm801_vm7, %v706_v62  ;;  %1249 = vrot.lane.b32.xlu1 %v4029_v50, %s4617_s6  ;;  %v1504_v50 = vrot.slane %v1502_v35, 4  ;;  %v3120_v62 = vsel %vm4872_vm6, %v4296_v52, %v3119_v53  ;;  %v5191_v35 = vrot.slane %v2590_v18, 5  ;;  %v2049_v52 = vsel %vm4872_vm6, %v4155_v31, %v2048_v14  ;;  %v4069_v14 = vld [vmem:[%s4705_s30 + $0x40] sm:$0xf] }
  0x99   : > { %1247 = vrot.lane.b32.xlu0 %v4028_v58, %s4617_s6  ;;  %v1494_v58 = vrot.slane %v1492_v40, 5  ;;  %3261 = vst.msk [vmem:[#allocation2 + $0x4] sm:$0xf] %vm237_vm3, %v3120_v62  ;;  %v4211_v40 = vld [vmem:[%s4705_s30 + $0x44] sm:$0x1] }
  0x9a   : > { %v712_v7 = vpop.permute.xlu1 %711  ;;  %3605 = vmatpush1.bf16.msra.mxu0 %v4470_v42  ;;  %4391 = vmatpush1.bf16.msra.mxu1 %v4470_v42  ;;  %v1505_v1 = vor.u32 %v1504_v50, %v5135_v47 }
  0x9b   : > { %805 = vst.msk [vmem:[#allocation2 + $0x18] sm:$0xf] %vm801_vm7, %v712_v7  ;;  %v708_v13 = vpop.permute.xlu0 %707  ;;  %3620 = vmatprep.subr.bf16.mxu0 %v4622_v23  ;;  %4383 = vmatprep.subr.bf16.mxu1 %v4622_v23  ;;  %v957_v7 = vsel %vm4872_vm6, %v4011_v46, %v956_v30  ;;  %v4030_v23 = vld [vmem:[%s4705_s30 + $0x30] sm:$0xf] }
  0x9c   : > { %803 = vst.msk [vmem:[#allocation2 + $0x8] sm:$0xf] %vm801_vm7, %v708_v13  ;;  %1810 = vrot.lane.b32.xlu1 %v1487_v2, %s4618_s7  ;;  %v1508_v2 = vshll.u32 %v4067_v56, 16  ;;  %v4115_v13 = vld [vmem:[%s4705_s30 + $0x38] sm:$0x1] }
  0x9d   : > { %1808 = vrot.lane.b32.xlu0 %v1477_v8, %s4618_s7  ;;  %v1495_v8 = vor.u32 %v1494_v58, %v1491_v57  ;;  %v2051_v30 = vrot.slane %v4115_v13, 5  ;;  %v4175_v56 = vld [vmem:[%s4705_s30 + $0x40] sm:$0xf]  ;;  %v4174_v57 = vld [vmem:[%s4705_s30 + $0x3c] sm:$0xf] }
  0x9e   : > { %v716_v20 = vpop.permute.xlu1 %715  ;;  %3621 = vmatpush2.bf16.msra.mxu0 %v4471_v61  ;;  %4392 = vmatpush2.bf16.msra.mxu1 %v4471_v61  ;;  %v1510_v16 = vrot.slane %v1508_v2, 5  ;;  %v859_v61 = vld [vmem:[%s4705_s30 + $0x64] sm:$0xf] }
  0x9f   : > { %807 = vst.msk [vmem:[#allocation2 + $0x28] sm:$0xf] %vm801_vm7, %v716_v20  ;;  %v714_v24 = vpop.permute.xlu0 %713  ;;  %v991_v4 = vrot.slane %v859_v61, 5 }
  0xa0   : > { %806 = vst.msk [vmem:[#allocation2 + $0x20] sm:$0xf] %vm801_vm7, %v714_v24  ;;  %2147 = vrot.lane.b32.xlu1 %v2045_v15, %s4619_s8  ;;  %v1506_v15 = vrot.slane %v1505_v1, 4  ;;  %v2584_v24 = vshll.u32 %v4209_v12, 16  ;;  %v846_v1 = vld [vmem:[%s4705_s30 + $0x30] sm:$0xe] }
  0xa1   : > { %2145 = vrot.lane.b32.xlu0 %v2042_v21, %s4619_s8  ;;  %v1496_v21 = vrot.slane %v1495_v8, 4  ;;  %v4255_v12 = vld [vmem:[%s4705_s30 + $0x34] sm:$0xf] }
  0xa2   : > { %v720_v36 = vpop.permute.xlu1 %719  ;;  %v1511_v34 = vsel %vm4716_vm2, %v1506_v15, %v1510_v16  ;;  %v2586_v42 = vrot.slane %v2584_v24, 5  ;;  %v4256_v15 = vld [vmem:[%s4705_s30 + $0x38] sm:$0x1]  ;;  %v3133_v17 = vrot.slane %v4255_v12, 5 }
  0xa3   : > { %809 = vst.msk [vmem:[#allocation2 + $0x38] sm:$0xf] %vm801_vm7, %v720_v36  ;;  %v718_v41 = vpop.permute.xlu0 %717  ;;  %v2596_v36 = vrot.slane %v2594_v19, 4  ;;  %v1501_v39 = vsel %vm4716_vm2, %v1496_v21, %v5135_v47  ;;  %v2052_v47 = vsel %vm4872_vm6, %v2050_v29, %v2051_v30  ;;  %v994_v19 = vrot.slane %v860_v3, 5  ;;  %v4068_v21 = vld [vmem:[%s4705_s30 + $0x3c] sm:$0xf] }
  0xa4   : > { %808 = vst.msk [vmem:[#allocation2 + $0x30] sm:$0xf] %vm801_vm7, %v718_v41  ;;  %2341 = vrot.lane.b32.xlu1 %v4173_v25, %s4620_s9  ;;  %v4251_v25 = vld [vmem:[%s4705_s30 + $0x24] sm:$0xe]  ;;  %v2583_v41 = vrot.slane %v2581_v22, 4  ;;  %v993_v22 = vrot.slane %v991_v4, 4 }
  0xa5   : > { %2339 = vrot.lane.b32.xlu0 %v4172_v37, %s4620_s9  ;;  %v4297_v33 = vrot.slane %v4251_v25, 9  ;;  %v3126_v37 = vrot.slane %v4252_v28, 5  ;;  %v2597_v48 = vor.u32 %v2596_v36, %v5191_v35  ;;  %v3135_v25 = vrot.slane %v3133_v17, 4 }
  0xa6   : > { %v724_v54 = vpop.permute.xlu1 %723  ;;  %v2587_v53 = vor.u32 %v2586_v42, %v2583_v41  ;;  %v1522_v29 = vshll.u32 %v4069_v14, 16  ;;  %v1526_v30 = vshrl.u32 %v4069_v14, 16 }
  0xa7   : > { %811 = vst.msk [vmem:[#allocation2 + $0x48] sm:$0xf] %vm801_vm7, %v724_v54  ;;  %v722_v60 = vpop.permute.xlu0 %721  ;;  %v3127_v45 = vsel %vm4872_vm6, %v4297_v33, %v3126_v37  ;;  %v3128_v46 = vrot.slane %v3126_v37, 4  ;;  %v847_v54 = vld [vmem:[%s4705_s30 + $0x34] sm:$0xf]  ;;  %v2598_v58 = vrot.slane %v2597_v48, 4 }
  0xa8   : > { %810 = vst.msk [vmem:[#allocation2 + $0x40] sm:$0xf] %vm801_vm7, %v722_v60  ;;  %2902 = vrot.lane.b32.xlu1 %v2579_v49, %s4621_s10  ;;  %v2600_v49 = vshll.u32 %v4211_v40, 16  ;;  %v963_v60 = vrot.slane %v847_v54, 5  ;;  %v2588_v63 = vrot.slane %v2587_v53, 4  ;;  %v1513_v33 = vshrl.u32 %v4068_v21, 16 }
  0xa9   : > { %2900 = vrot.lane.b32.xlu0 %v2569_v55, %s4621_s10  ;;  %3263 = vst.msk [vmem:[#allocation2 + $0x14] sm:$0xf] %vm237_vm3, %v3127_v45  ;;  %v3130_v50 = vsel %vm4872_vm6, %v3128_v46, %v3129_v43  ;;  %v5262_v41 = vrot.slane %v1522_v29, 5  ;;  %v1528_v42 = vrot.slane %v1526_v30, 4  ;;  %v4070_v46 = vld [vmem:[%s4705_s30 + $0x44] sm:$0x1] }
  0xaa   : > { %v728_v6 = vpop.permute.xlu1 %727  ;;  %3264 = vst.msk [vmem:[#allocation2 + $0x1c] sm:$0xf] %vm237_vm3, %v3130_v50  ;;  %v2602_v59 = vrot.slane %v2600_v49, 5  ;;  %v965_v9 = vrot.slane %v963_v60, 4  ;;  %v2593_v13 = vsel %vm4716_vm2, %v2588_v63, %v5191_v35  ;;  %v4081_v35 = vld [vmem:[%s4705_s30 + $0x70] sm:$0xf] }
  0xab   : > { %813 = vst.msk [vmem:[#allocation2 + $0x58] sm:$0xf] %vm801_vm7, %v728_v6  ;;  %v726_v10 = vpop.permute.xlu0 %725  ;;  %v858_v6 = vld [vmem:[%s4705_s30 + $0x60] sm:$0xe]  ;;  %v1618_v43 = vshll.u32 %v4081_v35, 16  ;;  %v1529_v54 = vor.u32 %v1528_v42, %v5262_v41 }
  0xac   : > { %812 = vst.msk [vmem:[#allocation2 + $0x50] sm:$0xf] %vm801_vm7, %v726_v10  ;;  %1059 = vrot.lane.b32.xlu1 %v960_v0, %s4616_s5  ;;  %v848_v0 = vld [vmem:[%s4705_s30 + $0x38] sm:$0x1]  ;;  %v2603_v8 = vsel %vm4716_vm2, %v2598_v58, %v2602_v59  ;;  %v4032_v53 = vld [vmem:[%s4705_s30 + $0x3c] sm:$0xf] }
  0xad   : > { %1057 = vrot.lane.b32.xlu0 %v957_v7, %s4616_s5  ;;  %v4254_v7 = vld [vmem:[%s4705_s30 + $0x30] sm:$0xe]  ;;  %v966_v10 = vrot.slane %v848_v0, 5  ;;  %v4257_v63 = vld [vmem:[%s4705_s30 + $0x3c] sm:$0xe] }
  0xae   : > { %v732_v20 = vpop.permute.xlu1 %731  ;;  %v4298_v16 = vrot.slane %v4254_v7, 9  ;;  %v4258_v0 = vld [vmem:[%s4705_s30 + $0x40] sm:$0xf]  ;;  %v4299_v3 = vrot.slane %v4257_v63, 9  ;;  %v4041_v7 = vld [vmem:[%s4705_s30 + $0x70] sm:$0xf] }
  0xaf   : > { %815 = vst.msk [vmem:[#allocation2 + $0x68] sm:$0xf] %vm801_vm7, %v732_v20  ;;  %v730_v26 = vpop.permute.xlu0 %729  ;;  %v4016_v20 = vrot.slane %v858_v6, 9  ;;  %v967_v28 = vsel %vm4872_vm6, %v965_v9, %v966_v10  ;;  %v3140_v6 = vrot.slane %v4258_v0, 5  ;;  %v4118_v30 = vld [vmem:[%s4705_s30 + $0x44] sm:$0x1] }
  0xb0   : > { %814 = vst.msk [vmem:[#allocation2 + $0x60] sm:$0xf] %vm801_vm7, %v730_v26  ;;  %1253 = vrot.lane.b32.xlu1 %v4031_v11, %s4617_s6  ;;  %v4012_v11 = vrot.slane %v846_v1, 9  ;;  %v3134_v24 = vsel %vm4872_vm6, %v4298_v16, %v3133_v17  ;;  %v3136_v26 = vrot.slane %v4256_v15, 5  ;;  %v4117_v15 = vld [vmem:[%s4705_s30 + $0x40] sm:$0xf] }
  0xb1   : > { %1251 = vrot.lane.b32.xlu0 %v4030_v23, %s4617_s6  ;;  %3265 = vst.msk [vmem:[#allocation2 + $0x24] sm:$0xf] %vm237_vm3, %v3134_v24  ;;  %v992_v40 = vsel %vm4872_vm6, %v4016_v20, %v991_v4  ;;  %v3141_v16 = vsel %vm4872_vm6, %v4299_v3, %v3140_v6  ;;  %v4129_v24 = vld [vmem:[%s4705_s30 + $0x70] sm:$0xf]  ;;  %v4213_v42 = vld [vmem:[%s4705_s30 + $0x4c] sm:$0xf] }
  0xb2   : > { %v736_v38 = vpop.permute.xlu1 %735  ;;  %v964_v32 = vsel %vm4872_vm6, %v4012_v11, %v963_v60  ;;  %v3137_v36 = vsel %vm4872_vm6, %v3135_v25, %v3136_v26  ;;  %3267 = vst.msk [vmem:[#allocation2 + $0x34] sm:$0xf] %vm237_vm3, %v3141_v16 }
  0xb3   : > { %817 = vst.msk [vmem:[#allocation2 + $0x78] sm:$0xf] %vm801_vm7, %v736_v38  ;;  %v734_v44 = vpop.permute.xlu0 %733  ;;  %v4080_v38 = vld [vmem:[%s4705_s30 + $0x6c] sm:$0xf] }
  0xb4   : > { %816 = vst.msk [vmem:[#allocation2 + $0x70] sm:$0xf] %vm801_vm7, %v734_v44  ;;  %1814 = vrot.lane.b32.xlu1 %v1511_v34, %s4618_s7  ;;  %v1516_v34 = vshll.u32 %v4068_v21, 16  ;;  %v1622_v44 = vshrl.u32 %v4081_v35, 16  ;;  %v1609_v49 = vshrl.u32 %v4080_v38, 16  ;;  %v1612_v50 = vshll.u32 %v4080_v38, 16 }
  0xb5   : > { %1812 = vrot.lane.b32.xlu0 %v1501_v39, %s4618_s7  ;;  %3266 = vst.msk [vmem:[#allocation2 + $0x2c] sm:$0xf] %vm237_vm3, %v3137_v36  ;;  %v995_v39 = vsel %vm4872_vm6, %v993_v22, %v994_v19  ;;  %v2055_v22 = vrot.slane %v4117_v15, 5  ;;  %v2058_v36 = vrot.slane %v4118_v30, 5  ;;  %v4128_v38 = vld [vmem:[%s4705_s30 + $0x6c] sm:$0xe] }
  0xb6   : > { %v740_v51 = vpop.permute.xlu1 %739  ;;  %v1518_v48 = vrot.slane %v1516_v34, 5  ;;  %v1624_v58 = vrot.slane %v1622_v44, 4  ;;  %v1611_v61 = vrot.slane %v1609_v49, 4  ;;  %v4212_v44 = vld [vmem:[%s4705_s30 + $0x48] sm:$0xf]  ;;  %v2614_v49 = vshll.u32 %v4213_v42, 16 }
  0xb7   : > { %819 = vst.msk [vmem:[#allocation2 + $0x88] sm:$0xf] %vm801_vm7, %v740_v51  ;;  %v738_v55 = vpop.permute.xlu0 %737  ;;  %v2057_v35 = vrot.slane %v2055_v22, 4 }
  0xb8   : > { %818 = vst.msk [vmem:[#allocation2 + $0x80] sm:$0xf] %vm801_vm7, %v738_v55  ;;  %2151 = vrot.lane.b32.xlu1 %v2052_v47, %s4619_s8  ;;  %v1515_v47 = vrot.slane %v1513_v33, 4  ;;  %v1532_v55 = vshll.u32 %v4070_v46, 16  ;;  %v2083_v33 = vrot.slane %v4129_v24, 5 }
  0xb9   : > { %2149 = vrot.lane.b32.xlu0 %v2049_v52, %s4619_s8  ;;  %v4033_v52 = vld [vmem:[%s4705_s30 + $0x40] sm:$0xf] }
  0xba   : > { %v744_v62 = vpop.permute.xlu1 %743  ;;  %v1519_v60 = vor.u32 %v1518_v48, %v1515_v47  ;;  %v1534_v9 = vrot.slane %v1532_v55, 5  ;;  %v4160_v47 = vrot.slane %v4128_v38, 9  ;;  %v2059_v48 = vsel %vm4872_vm6, %v2057_v35, %v2058_v36  ;;  %v4225_v55 = vld [vmem:[%s4705_s30 + $0x7c] sm:$0xf]  ;;  %v5364_v35 = vld [vmem:[%s4705_s30 + $0x40] sm:$0xf] }
  0xbb   : > { %821 = vst.msk [vmem:[#allocation2 + $0x98] sm:$0xf] %vm801_vm7, %v744_v62  ;;  %v742_v2 = vpop.permute.xlu0 %741  ;;  %v1614_v62 = vrot.slane %v1612_v50, 5  ;;  %v2618_v50 = vshrl.u32 %v4213_v42, 16  ;;  %v2710_v63 = vshll.u32 %v4225_v55, 16  ;;  %v2714_v0 = vshrl.u32 %v4225_v55, 16 }
  0xbc   : > { %820 = vst.msk [vmem:[#allocation2 + $0x90] sm:$0xf] %vm801_vm7, %v742_v2  ;;  %2345 = vrot.lane.b32.xlu1 %v4175_v56, %s4620_s9  ;;  %v4082_v56 = vld [vmem:[%s4705_s30 + $0x74] sm:$0x1]  ;;  %v4259_v2 = vld [vmem:[%s4705_s30 + $0x44] sm:$0x1] }
  0xbd   : > { %2343 = vrot.lane.b32.xlu0 %v4174_v57, %s4620_s9  ;;  %v5273_v57 = vrot.slane %v1618_v43, 5  ;;  %v1628_v4 = vshll.u32 %v4082_v56, 16  ;;  %v3143_v11 = vrot.slane %v4259_v2, 5  ;;  %v1615_v14 = vor.u32 %v1614_v62, %v1611_v61 }
  0xbe   : > { %v748_v23 = vpop.permute.xlu1 %747  ;;  %v5336_v61 = vrot.slane %v2614_v49, 5  ;;  %v2620_v62 = vrot.slane %v2618_v50, 4  ;;  %v2716_v15 = vrot.slane %v2714_v0, 4 }
  0xbf   : > { %823 = vst.msk [vmem:[#allocation2 + $0xa8] sm:$0xf] %vm801_vm7, %v748_v23  ;;  %v746_v18 = vpop.permute.xlu0 %745  ;;  %v1625_v10 = vor.u32 %v1624_v58, %v5273_v57  ;;  %v4040_v23 = vld [vmem:[%s4705_s30 + $0x6c] sm:$0xf]  ;;  %v1630_v19 = vrot.slane %v1628_v4, 5  ;;  %v1616_v29 = vrot.slane %v1615_v14, 4 }
  0xc0   : > { %822 = vst.msk [vmem:[#allocation2 + $0xa0] sm:$0xf] %vm801_vm7, %v746_v18  ;;  %2906 = vrot.lane.b32.xlu1 %v2603_v8, %s4621_s10  ;;  %v1530_v8 = vrot.slane %v1529_v54, 4  ;;  %v3142_v18 = vrot.slane %v3140_v6, 4  ;;  %v2608_v54 = vshll.u32 %v4212_v44, 16  ;;  %v5347_v14 = vrot.slane %v2710_v63, 5 }
  0xc1   : > { %2904 = vrot.lane.b32.xlu0 %v2593_v13, %s4621_s10  ;;  %v1520_v13 = vrot.slane %v1519_v60, 4  ;;  %v1626_v21 = vrot.slane %v1625_v10, 4  ;;  %v4214_v60 = vld [vmem:[%s4705_s30 + $0x50] sm:$0x1] }
  0xc2   : > { %v752_v31 = vpop.permute.xlu1 %751  ;;  %v1535_v20 = vsel %vm4716_vm2, %v1530_v8, %v1534_v9  ;;  %v3144_v25 = vsel %vm4872_vm6, %v3142_v18, %v3143_v11  ;;  %v2610_v4 = vrot.slane %v2608_v54, 5  ;;  %v4261_v8 = vld [vmem:[%s4705_s30 + $0x4c] sm:$0xf]  ;;  %v4176_v18 = vld [vmem:[%s4705_s30 + $0x48] sm:$0xf] }
  0xc3   : > { %825 = vst.msk [vmem:[#allocation2 + $0xb8] sm:$0xf] %vm801_vm7, %v752_v31  ;;  %v750_v37 = vpop.permute.xlu0 %749  ;;  %v1631_v34 = vsel %vm4716_vm2, %v1626_v21, %v1630_v19  ;;  %v4177_v11 = vld [vmem:[%s4705_s30 + $0x4c] sm:$0xf]  ;;  %v3147_v16 = vrot.slane %v4261_v8, 5 }
  0xc4   : > { %824 = vst.msk [vmem:[#allocation2 + $0xb0] sm:$0xf] %vm801_vm7, %v750_v37  ;;  %1063 = vrot.lane.b32.xlu1 %v967_v28, %s4616_s5  ;;  %v1525_v28 = vsel %vm4716_vm2, %v1520_v13, %v5262_v41  ;;  %v4130_v37 = vld [vmem:[%s4705_s30 + $0x74] sm:$0x1]  ;;  %v4226_v13 = vld [vmem:[%s4705_s30 + $0x80] sm:$0x1] }
  0xc5   : > { %1061 = vrot.lane.b32.xlu0 %v964_v32, %s4616_s5  ;;  %3268 = vst.msk [vmem:[#allocation2 + $0x3c] sm:$0xf] %vm237_vm3, %v3144_v25  ;;  %v4116_v32 = vld [vmem:[%s4705_s30 + $0x3c] sm:$0xe]  ;;  %v2086_v46 = vrot.slane %v4130_v37, 5  ;;  %v2720_v30 = vshll.u32 %v4226_v13, 16 }
  0xc6   : > { %v756_v45 = vpop.permute.xlu1 %755  ;;  %v4156_v41 = vrot.slane %v4116_v32, 9  ;;  %v4185_v25 = vld [vmem:[%s4705_s30 + $0x7c] sm:$0xf]  ;;  %v4274_v32 = vld [vmem:[%s4705_s30 + $0x80] sm:$0x1]  ;;  %v3149_v36 = vrot.slane %v3147_v16, 4 }
  0xc7   : > { %827 = vst.msk [vmem:[#allocation2 + $0xc8] sm:$0xf] %vm801_vm7, %v756_v45  ;;  %v754_v51 = vpop.permute.xlu0 %753  ;;  %v2085_v45 = vrot.slane %v2083_v33, 4 }
  0xc8   : > { %826 = vst.msk [vmem:[#allocation2 + $0xc0] sm:$0xf] %vm801_vm7, %v754_v51  ;;  %1079 = vrot.lane.b32.xlu1 %v995_v39, %s4616_s5 }
  0xc9   : > { %1077 = vrot.lane.b32.xlu0 %v992_v40, %s4616_s5  ;;  %v1621_v40 = vsel %vm4716_vm2, %v1616_v29, %v5273_v57  ;;  %v4224_v57 = vld [vmem:[%s4705_s30 + $0x78] sm:$0xf]  ;;  %v2087_v58 = vsel %vm4872_vm6, %v2085_v45, %v2086_v46  ;;  %v3178_v46 = vrot.slane %v4274_v32, 5 }
  0xca   : > { %v760_v59 = vpop.permute.xlu1 %759  ;;  %v2701_v6 = vshrl.u32 %v4224_v57, 16 }
  0xcb   : > { %829 = vst.msk [vmem:[#allocation2 + $0xd8] sm:$0xf] %vm801_vm7, %v760_v59  ;;  %v758_v1 = vpop.permute.xlu0 %757  ;;  %v2084_v59 = vsel %vm4872_vm6, %v4160_v47, %v2083_v33  ;;  %v2722_v47 = vrot.slane %v2720_v30, 5 }
  0xcc   : > { %828 = vst.msk [vmem:[#allocation2 + $0xd0] sm:$0xf] %vm801_vm7, %v758_v1  ;;  %1257 = vrot.lane.b32.xlu1 %v4033_v52, %s4617_s6  ;;  %v2056_v52 = vsel %vm4872_vm6, %v4156_v41, %v2055_v22  ;;  %v4260_v1 = vld [vmem:[%s4705_s30 + $0x48] sm:$0xe]  ;;  %v4262_v22 = vld [vmem:[%s4705_s30 + $0x50] sm:$0x1] }
  0xcd   : > { %1255 = vrot.lane.b32.xlu0 %v4032_v53, %s4617_s6  ;;  %v2605_v53 = vshrl.u32 %v4212_v44, 16  ;;  %v4300_v10 = vrot.slane %v4260_v1, 9  ;;  %v3150_v37 = vrot.slane %v4262_v22, 5  ;;  %v863_v1 = vld [vmem:[%s4705_s30 + $0x74] sm:$0x1] }
  0xce   : > { %v764_v12 = vpop.permute.xlu1 %763 }
  0xcf   : > { %831 = vst.msk [vmem:[#allocation2 + $0xe8] sm:$0xf] %vm801_vm7, %v764_v12  ;;  %v762_v17 = vpop.permute.xlu0 %761  ;;  %v2607_v3 = vrot.slane %v2605_v53, 4  ;;  %v2624_v12 = vshll.u32 %v4214_v60, 16  ;;  %v3151_v44 = vsel %vm4872_vm6, %v3149_v36, %v3150_v37 }
  0xd0   : > { %830 = vst.msk [vmem:[#allocation2 + $0xe0] sm:$0xf] %vm801_vm7, %v762_v17  ;;  %1273 = vrot.lane.b32.xlu1 %v4041_v7, %s4617_s6  ;;  %v2704_v7 = vshll.u32 %v4224_v57, 16  ;;  %v851_v57 = vld [vmem:[%s4705_s30 + $0x44] sm:$0x1] }
  0xd1   : > { %1271 = vrot.lane.b32.xlu0 %v4040_v23, %s4617_s6  ;;  %v2621_v23 = vor.u32 %v2620_v62, %v5336_v61  ;;  %v2611_v19 = vor.u32 %v2610_v4, %v2607_v3  ;;  %v2626_v29 = vrot.slane %v2624_v12, 5  ;;  %3270 = vst.msk [vmem:[#allocation2 + $0x4c] sm:$0xf] %vm237_vm3, %v3151_v44  ;;  %v973_v0 = vrot.slane %v851_v57, 5  ;;  %v4042_v57 = vld [vmem:[%s4705_s30 + $0x78] sm:$0xf] }
  0xd2   : > { %v768_v26 = vpop.permute.xlu1 %767  ;;  %v2706_v21 = vrot.slane %v2704_v7, 5  ;;  %v4072_v7 = vld [vmem:[%s4705_s30 + $0x4c] sm:$0xf] }
  0xd3   : > { %833 = vst.msk [vmem:[#allocation2 + $0xf8] sm:$0xf] %vm801_vm7, %v768_v26  ;;  %v766_v31 = vpop.permute.xlu0 %765  ;;  %v3148_v26 = vsel %vm4872_vm6, %v4300_v10, %v3147_v16  ;;  %v2622_v33 = vrot.slane %v2621_v23, 4  ;;  %v1546_v13 = vshll.u32 %v4072_v7, 16 }
  0xd4   : > { %832 = vst.msk [vmem:[#allocation2 + $0xf0] sm:$0xf] %vm801_vm7, %v766_v31  ;;  %1818 = vrot.lane.b32.xlu1 %v1535_v20, %s4618_s7  ;;  %v2703_v20 = vrot.slane %v2701_v6, 4  ;;  %v4273_v31 = vld [vmem:[%s4705_s30 + $0x7c] sm:$0xf] }
  0xd5   : > { %1816 = vrot.lane.b32.xlu0 %v1525_v28, %s4618_s7  ;;  %v4272_v28 = vld [vmem:[%s4705_s30 + $0x78] sm:$0xe]  ;;  %3269 = vst.msk [vmem:[#allocation2 + $0x44] sm:$0xf] %vm237_vm3, %v3148_v26  ;;  %v3175_v45 = vrot.slane %v4273_v31, 5  ;;  %v2627_v49 = vsel %vm4716_vm2, %v2622_v33, %v2626_v29  ;;  %v5421_v26 = vrot.slane %v1546_v13, 5 }
  0xd6   : > { %v1048_v39 = vpop.permute.xlu1 %1047  ;;  %v2707_v41 = vor.u32 %v2706_v21, %v2703_v20  ;;  %v4304_v42 = vrot.slane %v4272_v28, 9  ;;  %v4083_v21 = vld [vmem:[%s4705_s30 + $0x78] sm:$0xf] }
  0xd7   : > { %1143 = vst.msk [vmem:[#allocation2 + $0x8] sm:$0xf] %vm1141_vm8, %v1048_v39  ;;  %v1046_v43 = vpop.permute.xlu0 %1045  ;;  %v4184_v39 = vld [vmem:[%s4705_s30 + $0x78] sm:$0xf]  ;;  %v3177_v53 = vrot.slane %v3175_v45, 4 }
  0xd8   : > { %1142 = vst.msk [vmem:[#allocation2] sm:$0xf] %vm1141_vm8, %v1046_v43  ;;  %1834 = vrot.lane.b32.xlu1 %v1631_v34, %s4618_s7  ;;  %v2717_v34 = vor.u32 %v2716_v15, %v5347_v14 }
  0xd9   : > { %1832 = vrot.lane.b32.xlu0 %v1621_v40, %s4618_s7  ;;  %v2612_v40 = vrot.slane %v2611_v19, 4  ;;  %v3179_v60 = vsel %vm4872_vm6, %v3177_v53, %v3178_v46  ;;  %v4084_v19 = vld [vmem:[%s4705_s30 + $0x7c] sm:$0xf] }
  0xda   : > { %v1052_v51 = vpop.permute.xlu1 %1051  ;;  %v2718_v50 = vrot.slane %v2717_v34, 4  ;;  %3278 = vst.msk [vmem:[#allocation2 + $0x8c] sm:$0xf] %vm237_vm3, %v3179_v60  ;;  %v1642_v29 = vshll.u32 %v4084_v19, 16  ;;  %v1646_v30 = vshrl.u32 %v4084_v19, 16  ;;  %v1633_v34 = vshrl.u32 %v4083_v21, 16 }
  0xdb   : > { %1145 = vst.msk [vmem:[#allocation2 + $0x18] sm:$0xf] %vm1141_vm8, %v1052_v51  ;;  %v1050_v56 = vpop.permute.xlu0 %1049  ;;  %v862_v51 = vld [vmem:[%s4705_s30 + $0x70] sm:$0xf]  ;;  %v2617_v55 = vsel %vm4716_vm2, %v2612_v40, %v5336_v61  ;;  %v4120_v60 = vld [vmem:[%s4705_s30 + $0x4c] sm:$0xf] }
  0xdc   : > { %1144 = vst.msk [vmem:[#allocation2 + $0x10] sm:$0xf] %vm1141_vm8, %v1050_v56  ;;  %2155 = vrot.lane.b32.xlu1 %v2059_v48, %s4619_s8  ;;  %v970_v48 = vrot.slane %v5364_v35, 5  ;;  %v2708_v56 = vrot.slane %v2707_v41, 4  ;;  %v998_v61 = vrot.slane %v862_v51, 5  ;;  %v2723_v62 = vsel %vm4716_vm2, %v2718_v50, %v2722_v47 }
  0xdd   : > { %2153 = vrot.lane.b32.xlu0 %v2056_v52, %s4619_s8  ;;  %v3176_v52 = vsel %vm4872_vm6, %v4304_v42, %v3175_v45  ;;  %v1636_v35 = vshll.u32 %v4083_v21, 16  ;;  %v5430_v42 = vrot.slane %v1642_v29, 5  ;;  %v4034_v45 = vld [vmem:[%s4705_s30 + $0x48] sm:$0xf]  ;;  %v4085_v47 = vld [vmem:[%s4705_s30 + $0x80] sm:$0x1] }
  0xde   : > { %v1242_v2 = vpop.permute.xlu1 %1241  ;;  %3277 = vst.msk [vmem:[#allocation2 + $0x84] sm:$0xf] %vm237_vm3, %v3176_v52  ;;  %v972_v63 = vrot.slane %v970_v48, 4  ;;  %v2713_v4 = vsel %vm4716_vm2, %v2708_v56, %v5347_v14  ;;  %v1000_v10 = vrot.slane %v998_v61, 4  ;;  %v1550_v14 = vshrl.u32 %v4072_v7, 16 }
  0xdf   : > { %1337 = vst.msk [vmem:[#allocation2 + $0x8] sm:$0xf] %vm1335_vm9, %v1242_v2  ;;  %v1240_v9 = vpop.permute.xlu0 %1239  ;;  %v861_v2 = vld [vmem:[%s4705_s30 + $0x6c] sm:$0xe]  ;;  %v4043_v51 = vld [vmem:[%s4705_s30 + $0x7c] sm:$0xf] }
  0xe0   : > { %1336 = vst.msk [vmem:[#allocation2] sm:$0xf] %vm1335_vm9, %v1240_v9  ;;  %2171 = vrot.lane.b32.xlu1 %v2087_v58, %s4619_s8  ;;  %v4071_v9 = vld [vmem:[%s4705_s30 + $0x48] sm:$0xf]  ;;  %v4017_v12 = vrot.slane %v861_v2, 9  ;;  %v974_v23 = vsel %vm4872_vm6, %v972_v63, %v973_v0  ;;  %v1552_v28 = vrot.slane %v1550_v14, 4 }
  0xe1   : > { %2169 = vrot.lane.b32.xlu0 %v2084_v59, %s4619_s8  ;;  %v849_v59 = vld [vmem:[%s4705_s30 + $0x3c] sm:$0xe]  ;;  %v4121_v7 = vld [vmem:[%s4705_s30 + $0x50] sm:$0x1]  ;;  %v4133_v14 = vld [vmem:[%s4705_s30 + $0x80] sm:$0x1] }
  0xe2   : > { %v1803_v17 = vpop.permute.xlu1 %1802  ;;  %v4013_v6 = vrot.slane %v849_v59, 9  ;;  %v1553_v40 = vor.u32 %v1552_v28, %v5421_v26  ;;  %v5449_v2 = vld [vmem:[%s4705_s30 + $0x7c] sm:$0xf]  ;;  %v2065_v13 = vrot.slane %v4121_v7, 5  ;;  %v4228_v28 = vld [vmem:[%s4705_s30 + $0x88] sm:$0xf] }
  0xe3   : > { %1898 = vst.msk [vmem:[#allocation2 + $0x8] sm:$0xf] %vm1896_vm10, %v1803_v17  ;;  %v1801_v24 = vpop.permute.xlu0 %1800  ;;  %v1537_v17 = vshrl.u32 %v4071_v9, 16 }
  0xe4   : > { %1897 = vst.msk [vmem:[#allocation2] sm:$0xf] %vm1896_vm10, %v1801_v24  ;;  %2349 = vrot.lane.b32.xlu1 %v4177_v11, %s4620_s9  ;;  %v1001_v11 = vrot.slane %v863_v1, 5  ;;  %v971_v16 = vsel %vm4872_vm6, %v4013_v6, %v970_v48  ;;  %v999_v24 = vsel %vm4872_vm6, %v4017_v12, %v998_v61  ;;  %v1635_v48 = vrot.slane %v1633_v34, 4 }
  0xe5   : > { %2347 = vrot.lane.b32.xlu0 %v4176_v18, %s4620_s9  ;;  %v1540_v18 = vshll.u32 %v4071_v9, 16  ;;  %v1539_v32 = vrot.slane %v1537_v17, 4  ;;  %v1554_v52 = vrot.slane %v1553_v40, 4  ;;  %v2062_v1 = vrot.slane %v4120_v60, 5  ;;  %v4119_v9 = vld [vmem:[%s4705_s30 + $0x48] sm:$0xe] }
  0xe6   : > { %v2140_v38 = vpop.permute.xlu1 %2139  ;;  %v1002_v22 = vsel %vm4872_vm6, %v1000_v10, %v1001_v11  ;;  %v4216_v10 = vld [vmem:[%s4705_s30 + $0x58] sm:$0xf]  ;;  %v2090_v11 = vrot.slane %v5449_v2, 5  ;;  %v4475_v40 = vld [vmem:[#allocation2 + $0x14] ss:$8 sps:$4 sm:$0xff]  }
  0xe7   : > { %2235 = vst.msk [vmem:[#allocation2 + $0x8] sm:$0xf] %vm2233_vm11, %v2140_v38  ;;  %v2138_v43 = vpop.permute.xlu0 %2137  ;;  %v1542_v33 = vrot.slane %v1540_v18, 5  ;;  %v4474_v38 = vld [vmem:[#allocation2 + $0x4] ss:$8 sps:$4 sm:$0xff]   ;;  %v4157_v18 = vrot.slane %v4119_v9, 9 }
  0xe8   : > { %2234 = vst.msk [vmem:[#allocation2] sm:$0xf] %vm2233_vm11, %v2138_v43  ;;  %2365 = vrot.lane.b32.xlu1 %v4185_v25, %s4620_s9  ;;  %v4073_v25 = vld [vmem:[%s4705_s30 + $0x50] sm:$0x1]  ;;  %4353 = vmatprep.mubr.msk.bf16.mxu0 %vm3541_vm14, %v4474_v38  ;;  %v1648_v43 = vrot.slane %v1646_v30, 4  ;;  %v2638_v19 = vshll.u32 %v4216_v10, 16 }
  0xe9   : > { %2363 = vrot.lane.b32.xlu0 %v4184_v39, %s4620_s9  ;;  %v4035_v39 = vld [vmem:[%s4705_s30 + $0x4c] sm:$0xf]  ;;  %v1556_v41 = vshll.u32 %v4073_v25, 16  ;;  %v1543_v46 = vor.u32 %v1542_v33, %v1539_v32  ;;  %v2093_v25 = vrot.slane %v4133_v14, 5  ;;  %v2063_v32 = vsel %vm4872_vm6, %v4157_v18, %v2062_v1  ;;  %v4275_v2 = vld [vmem:[%s4705_s30 + $0x84] sm:$0xe] }
  0xea   : > { %v2334_v54 = vpop.permute.xlu1 %2333 }
  0xeb   : > { %2429 = vst.msk [vmem:[#allocation2 + $0x8] sm:$0xf] %vm2427_vm12, %v2334_v54  ;;  %v2332_v58 = vpop.permute.xlu0 %2331  ;;  %v1558_v53 = vrot.slane %v1556_v41, 5  ;;  %v1649_v54 = vor.u32 %v1648_v43, %v5430_v42  ;;  %v2734_v41 = vshll.u32 %v4228_v28, 16 }
  0xec   : > { %2428 = vst.msk [vmem:[#allocation2] sm:$0xf] %vm2427_vm12, %v2332_v58  ;;  %2910 = vrot.lane.b32.xlu1 %v2627_v49, %s4621_s10  ;;  %v1638_v49 = vrot.slane %v1636_v35, 5  ;;  %v1544_v58 = vrot.slane %v1543_v46, 4  ;;  %v5479_v35 = vrot.slane %v2638_v19, 5 }
  0xed   : > { %2908 = vrot.lane.b32.xlu0 %v2617_v55, %s4621_s10  ;;  %v1652_v55 = vshll.u32 %v4085_v47, 16  ;;  %v1650_v63 = vrot.slane %v1649_v54, 4  ;;  %v4263_v46 = vld [vmem:[%s4705_s30 + $0x54] sm:$0xe]  ;;  %v4265_v47 = vld [vmem:[%s4705_s30 + $0x5c] sm:$0x1] }
  0xee   : > { %v2895_v3 = vpop.permute.xlu1 %2894  ;;  %v1639_v59 = vor.u32 %v1638_v49, %v1635_v48  ;;  %v4217_v49 = vld [vmem:[%s4705_s30 + $0x5c] sm:$0x1]  ;;  %v4187_v19 = vld [vmem:[%s4705_s30 + $0x88] sm:$0xf] }
  0xef   : > { %2990 = vst.msk [vmem:[#allocation2 + $0x8] sm:$0xf] %vm2988_vm13, %v2895_v3  ;;  %v2893_v8 = vpop.permute.xlu0 %2892  ;;  %v1654_v0 = vrot.slane %v1652_v55, 5 }
  0xf0   : > { %2989 = vst.msk [vmem:[#allocation2] sm:$0xf] %vm2988_vm13, %v2893_v8  ;;  %2926 = vrot.lane.b32.xlu1 %v2723_v62, %s4621_s10  ;;  %v1559_v62 = vsel %vm4716_vm2, %v1554_v52, %v1558_v53  ;;  %v1640_v6 = vrot.slane %v1639_v59, 4  ;;  %v4301_v52 = vrot.slane %v4263_v46, 9  ;;  %v3157_v53 = vrot.slane %v4265_v47, 5 }
  0xf1   : > { %2924 = vrot.lane.b32.xlu0 %v2713_v4, %s4621_s10  ;;  %v1549_v4 = vsel %vm4716_vm2, %v1544_v58, %v5421_v26  ;;  %v1655_v12 = vsel %vm4716_vm2, %v1650_v63, %v1654_v0  ;;  %v4276_v59 = vld [vmem:[%s4705_s30 + $0x88] sm:$0xf]  ;;  %v2648_v0 = vshll.u32 %v4217_v49, 16  ;;  %v866_v47 = vld [vmem:[%s4705_s30 + $0x80] sm:$0x1] }
  0xf2   : > { %v1246_v15 = vpop.permute.xlu1 %1245  ;;  %v1645_v17 = vsel %vm4716_vm2, %v1640_v6, %v5430_v42  ;;  %v4227_v42 = vld [vmem:[%s4705_s30 + $0x84] sm:$0xf]  ;;  %v4178_v6 = vld [vmem:[%s4705_s30 + $0x54] sm:$0xf] }
  0xf3   : > { %1339 = vst.msk [vmem:[#allocation2 + $0x18] sm:$0xf] %vm1335_vm9, %v1246_v15  ;;  %v1244_v20 = vpop.permute.xlu0 %1243  ;;  %v4215_v15 = vld [vmem:[%s4705_s30 + $0x54] sm:$0xf] }
  0xf4   : > { %1338 = vst.msk [vmem:[#allocation2 + $0x10] sm:$0xf] %vm1335_vm9, %v1244_v20  ;;  %1067 = vrot.lane.b32.xlu1 %v974_v23, %s4616_s5  ;;  %v2064_v23 = vrot.slane %v2062_v1, 4  ;;  %v2642_v20 = vshrl.u32 %v4216_v10, 16  ;;  %v2629_v26 = vshrl.u32 %v4215_v15, 16  ;;  %v2632_v30 = vshll.u32 %v4215_v15, 16 }
  0xf5   : > { %1065 = vrot.lane.b32.xlu0 %v971_v16, %s4616_s5  ;;  %v5505_v1 = vrot.slane %v2734_v41, 5  ;;  %v4305_v10 = vrot.slane %v4275_v2, 9  ;;  %v854_v41 = vld [vmem:[%s4705_s30 + $0x50] sm:$0x1]  ;;  %v4087_v2 = vld [vmem:[%s4705_s30 + $0x88] sm:$0xf] }
  0xf6   : > { %v1807_v31 = vpop.permute.xlu1 %1806  ;;  %v2066_v29 = vsel %vm4872_vm6, %v2064_v23, %v2065_v13 }
  0xf7   : > { %1900 = vst.msk [vmem:[#allocation2 + $0x18] sm:$0xf] %vm1896_vm10, %v1807_v31  ;;  %v1805_v36 = vpop.permute.xlu0 %1804  ;;  %v4472_v37 = vld [vmem:[#allocation2] ss:$8 sps:$4 sm:$0xff]  }
  0xf8   : > { %1899 = vst.msk [vmem:[#allocation2 + $0x10] sm:$0xf] %vm1896_vm10, %v1805_v36  ;;  %1083 = vrot.lane.b32.xlu1 %v1002_v22, %s4616_s5  ;;  %3623 = vmatmul.mubr.bf16.vlgmr.msra.gmra.mxu0 %v4472_v37  ;;  %v4131_v22 = vld [vmem:[%s4705_s30 + $0x78] sm:$0xe]  ;;  %v5481_v36 = vrot.slane %v2642_v20, 4 }
  0xf9   : > { %1081 = vrot.lane.b32.xlu0 %v999_v24, %s4616_s5  ;;  %v2092_v24 = vrot.slane %v2090_v11, 4  ;;  %v4161_v34 = vrot.slane %v4131_v22, 9  ;;  %v4264_v37 = vld [vmem:[%s4705_s30 + $0x58] sm:$0xf]  ;;  %4354 = vmatprep.mubr.msk.bf16.mxu0 %vm3541_vm14, %v4475_v40 }
  0xfa   : > { %v2144_v44 = vpop.permute.xlu1 %2143  ;;  %v3154_v48 = vrot.slane %v4264_v37, 5  ;;  %v2645_v63 = vor.u32 %v5481_v36, %v5479_v35  ;;  %v865_v37 = vld [vmem:[%s4705_s30 + $0x7c] sm:$0xf] }
  0xfb   : > { %2237 = vst.msk [vmem:[#allocation2 + $0x18] sm:$0xf] %vm2233_vm11, %v2144_v44  ;;  %v2142_v50 = vpop.permute.xlu0 %2141  ;;  %v2094_v44 = vsel %vm4872_vm6, %v2092_v24, %v2093_v25  ;;  %v2091_v55 = vsel %vm4872_vm6, %v4161_v34, %v2090_v11 }
  0xfc   : > { %2236 = vst.msk [vmem:[#allocation2 + $0x10] sm:$0xf] %vm2233_vm11, %v2142_v50  ;;  %1261 = vrot.lane.b32.xlu1 %v4035_v39, %s4617_s6  ;;  %v2634_v50 = vrot.slane %v2632_v30, 5  ;;  %v3156_v58 = vrot.slane %v3154_v48, 4  ;;  %v2646_v20 = vrot.slane %v2645_v63, 4 }
  0xfd   : > { %1259 = vrot.lane.b32.xlu0 %v4034_v45, %s4617_s6  ;;  %v2631_v45 = vrot.slane %v2629_v26, 4  ;;  %v4186_v26 = vld [vmem:[%s4705_s30 + $0x84] sm:$0xf]  ;;  %v853_v30 = vld [vmem:[%s4705_s30 + $0x4c] sm:$0xf] }
  0xfe   : > { %v2338_v56 = vpop.permute.xlu1 %2337  ;;  %v3158_v9 = vsel %vm4872_vm6, %v3156_v58, %v3157_v53  ;;  %v977_v36 = vrot.slane %v853_v30, 5 }
  0xff   : > { %2431 = vst.msk [vmem:[#allocation2 + $0x18] sm:$0xf] %vm2427_vm12, %v2338_v56  ;;  %v2336_v61 = vpop.permute.xlu0 %2335  ;;  %v2725_v56 = vshrl.u32 %v4227_v42, 16  ;;  %v2635_v7 = vor.u32 %v2634_v50, %v2631_v45 }
 0x100   : > { %2430 = vst.msk [vmem:[#allocation2 + $0x10] sm:$0xf] %vm2427_vm12, %v2336_v61  ;;  %1277 = vrot.lane.b32.xlu1 %v4043_v51, %s4617_s6  ;;  %v2738_v51 = vshrl.u32 %v4228_v28, 16  ;;  %v3155_v61 = vsel %vm4872_vm6, %v4301_v52, %v3154_v48  ;;  %v979_v46 = vrot.slane %v977_v36, 4  ;;  %v864_v48 = vld [vmem:[%s4705_s30 + $0x78] sm:$0xe] }
 0x101   : > { %1275 = vrot.lane.b32.xlu0 %v4042_v57, %s4617_s6  ;;  %v2728_v57 = vshll.u32 %v4227_v42, 16  ;;  %3271 = vst.msk [vmem:[#allocation2 + $0x54] sm:$0xf] %vm237_vm3, %v3155_v61  ;;  %v2727_v23 = vrot.slane %v2725_v56, 4  ;;  %3272 = vst.msk [vmem:[#allocation2 + $0x5c] sm:$0xf] %vm237_vm3, %v3158_v9 }
 0x102   : > { %v2899_v3 = vpop.permute.xlu1 %2898  ;;  %v2636_v28 = vrot.slane %v2635_v7, 4  ;;  %v4075_v52 = vld [vmem:[%s4705_s30 + $0x58] sm:$0xf]  ;;  %v1008_v56 = vrot.slane %v866_v47, 5  ;;  %v4086_v7 = vld [vmem:[%s4705_s30 + $0x84] sm:$0xf] }
 0x103   : > { %2992 = vst.msk [vmem:[#allocation2 + $0x18] sm:$0xf] %vm2988_vm13, %v2899_v3  ;;  %v2897_v8 = vpop.permute.xlu0 %2896  ;;  %v4277_v3 = vld [vmem:[%s4705_s30 + $0x8c] sm:$0x1]  ;;  %v2730_v13 = vrot.slane %v2728_v57, 5  ;;  %v4018_v57 = vrot.slane %v864_v48, 9 }
 0x104   : > { %2991 = vst.msk [vmem:[#allocation2 + $0x10] sm:$0xf] %vm2988_vm13, %v2897_v8  ;;  %1822 = vrot.lane.b32.xlu1 %v1559_v62, %s4618_s7  ;;  %v3182_v62 = vrot.slane %v4276_v59, 5  ;;  %v2740_v8 = vrot.slane %v2738_v51, 4  ;;  %v3185_v15 = vrot.slane %v4277_v3, 5  ;;  %v1570_v59 = vshll.u32 %v4075_v52, 16 }
 0x105   : > { %1820 = vrot.lane.b32.xlu0 %v1549_v4, %s4618_s7  ;;  %v4179_v4 = vld [vmem:[%s4705_s30 + $0x58] sm:$0xf] }
 0x106   : > { %v1056_v16 = vpop.permute.xlu1 %1055  ;;  %v3184_v14 = vrot.slane %v3182_v62, 4  ;;  %v2741_v22 = vor.u32 %v2740_v8, %v5505_v1 }
 0x107   : > { %1147 = vst.msk [vmem:[#allocation2 + $0x28] sm:$0xf] %vm1141_vm8, %v1056_v16  ;;  %v1054_v21 = vpop.permute.xlu0 %1053 }
 0x108   : > { %1146 = vst.msk [vmem:[#allocation2 + $0x20] sm:$0xf] %vm1141_vm8, %v1054_v21  ;;  %1838 = vrot.lane.b32.xlu1 %v1655_v12, %s4618_s7  ;;  %v4229_v12 = vld [vmem:[%s4705_s30 + $0x8c] sm:$0x1]  ;;  %v3186_v18 = vsel %vm4872_vm6, %v3184_v14, %v3185_v15  ;;  %v2650_v21 = vrot.slane %v2648_v0, 5 }
 0x109   : > { %1836 = vrot.lane.b32.xlu0 %v1645_v17, %s4618_s7  ;;  %v3183_v17 = vsel %vm4872_vm6, %v4305_v10, %v3182_v62  ;;  %v2744_v24 = vshll.u32 %v4229_v12, 16  ;;  %3280 = vst.msk [vmem:[#allocation2 + $0x9c] sm:$0xf] %vm237_vm3, %v3186_v18  ;;  %v4076_v15 = vld [vmem:[%s4705_s30 + $0x5c] sm:$0x1]  ;;  %v1657_v18 = vshrl.u32 %v4086_v7, 16 }
 0x10a   : > { %v1250_v31 = vpop.permute.xlu1 %1249  ;;  %v3296_v33 = vld [vmem:[#allocation2 + $0x18] sm:$0xff]  ;;  %3279 = vst.msk [vmem:[#allocation2 + $0x94] sm:$0xf] %vm237_vm3, %v3183_v17 }
 0x10b   : > { %1341 = vst.msk [vmem:[#allocation2 + $0x28] sm:$0xf] %vm1335_vm9, %v1250_v31  ;;  %v1248_v38 = vpop.permute.xlu0 %1247  ;;  %v3295_v39 = vld [vmem:[#allocation2 + $0x10] sm:$0xff]  ;;  %v2746_v34 = vrot.slane %v2744_v24, 5  ;;  %v1580_v24 = vshll.u32 %v4076_v15, 16 }
 0x10c   : > { %1340 = vst.msk [vmem:[#allocation2 + $0x20] sm:$0xf] %vm1335_vm9, %v1248_v38  ;;  %2159 = vrot.lane.b32.xlu1 %v2066_v29, %s4619_s8  ;;  %v4314_v43 = vcombine.low %v3295_v39, %v3296_v33  ;;  %v2731_v29 = vor.u32 %v2730_v13, %v2727_v23  ;;  %v2742_v33 = vrot.slane %v2741_v22, 4  ;;  %v2641_v39 = vsel %vm4716_vm2, %v2636_v28, %v5479_v35 }
 0x10d   : > { %2157 = vrot.lane.b32.xlu0 %v2063_v32, %s4619_s8  ;;  %v2651_v32 = vsel %vm4716_vm2, %v2646_v20, %v2650_v21  ;;  %v980_v35 = vrot.slane %v854_v41, 5  ;;  %v1666_v23 = vshll.u32 %v4087_v2, 16  ;;  %v1670_v13 = vshrl.u32 %v4087_v2, 16  ;;  %v4037_v21 = vld [vmem:[%s4705_s30 + $0x58] sm:$0xf] }
 0x10e   : > { %v1811_v54 = vpop.permute.xlu1 %1810  ;;  %3631 = vmatmul.mubr.bf16.gmra.mxu0 %v4314_v43  ;;  %v2732_v40 = vrot.slane %v2731_v29, 4  ;;  %v852_v43 = vld [vmem:[%s4705_s30 + $0x48] sm:$0xe]  ;;  %v2747_v45 = vsel %vm4716_vm2, %v2742_v33, %v2746_v34  ;;  %v4036_v29 = vld [vmem:[%s4705_s30 + $0x54] sm:$0xf] }
 0x10f   : > { %1902 = vst.msk [vmem:[#allocation2 + $0x28] sm:$0xf] %vm1896_vm10, %v1811_v54  ;;  %v1809_v60 = vpop.permute.xlu0 %1808  ;;  %v4014_v51 = vrot.slane %v852_v43, 9  ;;  %v4074_v54 = vld [vmem:[%s4705_s30 + $0x54] sm:$0xf]  ;;  %v981_v58 = vsel %vm4872_vm6, %v979_v46, %v980_v35 }
 0x110   : > { %1901 = vst.msk [vmem:[#allocation2 + $0x20] sm:$0xf] %vm1896_vm10, %v1809_v60  ;;  %2175 = vrot.lane.b32.xlu1 %v2094_v44, %s4619_s8  ;;  %v1005_v44 = vrot.slane %v865_v37, 5  ;;  %v2737_v50 = vsel %vm4716_vm2, %v2732_v40, %v5505_v1  ;;  %v1574_v60 = vshrl.u32 %v4075_v52, 16  ;;  %v1561_v0 = vshrl.u32 %v4074_v54, 16 }
 0x111   : > { %2173 = vrot.lane.b32.xlu0 %v2091_v55, %s4619_s8  ;;  %v978_v62 = vsel %vm4872_vm6, %v4014_v51, %v977_v36  ;;  %v1564_v1 = vshll.u32 %v4074_v54, 16  ;;  %v4045_v36 = vld [vmem:[%s4705_s30 + $0x88] sm:$0xf]  ;;  %v4124_v54 = vld [vmem:[%s4705_s30 + $0x5c] sm:$0x1] }
 0x112   : > { %v2148_v11 = vpop.permute.xlu1 %2147  ;;  %v1007_v55 = vrot.slane %v1005_v44, 4  ;;  %v1006_v10 = vsel %vm4872_vm6, %v4018_v57, %v1005_v44  ;;  %v1576_v12 = vrot.slane %v1574_v60, 4  ;;  %v4219_v57 = vld [vmem:[%s4705_s30 + $0x64] sm:$0xf] }
 0x113   : > { %2239 = vst.msk [vmem:[#allocation2 + $0x28] sm:$0xf] %vm2233_vm11, %v2148_v11  ;;  %v2146_v16 = vpop.permute.xlu0 %2145  ;;  %v5575_v11 = vrot.slane %v1570_v59, 5  ;;  %v1566_v17 = vrot.slane %v1564_v1, 5  ;;  %v2662_v2 = vshll.u32 %v4219_v57, 16 }
 0x114   : > { %2238 = vst.msk [vmem:[#allocation2 + $0x20] sm:$0xf] %vm2233_vm11, %v2146_v16  ;;  %2353 = vrot.lane.b32.xlu1 %v4179_v4, %s4620_s9  ;;  %v1009_v9 = vsel %vm4872_vm6, %v1007_v55, %v1008_v56  ;;  %v1563_v16 = vrot.slane %v1561_v0, 4  ;;  %v4122_v56 = vld [vmem:[%s4705_s30 + $0x54] sm:$0xe] }
 0x115   : > { %2351 = vrot.lane.b32.xlu0 %v4178_v6, %s4620_s9  ;;  %v4477_v6 = vld [vmem:[#allocation2 + $0x24] ss:$8 sps:$4 sm:$0xff]   ;;  %v1577_v22 = vor.u32 %v1576_v12, %v5575_v11  ;;  %v4158_v1 = vrot.slane %v4122_v56, 9 }
 0x116   : > { %v2342_v25 = vpop.permute.xlu1 %2341  ;;  %4355 = vmatprep.mubr.msk.bf16.mxu0 %vm3541_vm14, %v4477_v6  ;;  %v1567_v30 = vor.u32 %v1566_v17, %v1563_v16  ;;  %v4134_v6 = vld [vmem:[%s4705_s30 + $0x84] sm:$0xe]  ;;  %v5634_v17 = vld [vmem:[%s4705_s30 + $0x68] sm:$0x1] }
 0x117   : > { %2433 = vst.msk [vmem:[#allocation2 + $0x28] sm:$0xf] %vm2427_vm12, %v2342_v25  ;;  %v2340_v31 = vpop.permute.xlu0 %2339  ;;  %v5584_v25 = vrot.slane %v1666_v23, 5  ;;  %v1578_v37 = vrot.slane %v1577_v22, 4  ;;  %v4162_v16 = vrot.slane %v4134_v6, 9 }
 0x118   : > { %2432 = vst.msk [vmem:[#allocation2 + $0x20] sm:$0xf] %vm2427_vm12, %v2340_v31  ;;  %2369 = vrot.lane.b32.xlu1 %v4187_v19, %s4620_s9  ;;  %v1660_v19 = vshll.u32 %v4086_v7, 16  ;;  %v4088_v31 = vld [vmem:[%s4705_s30 + $0x8c] sm:$0x1]  ;;  %v1568_v43 = vrot.slane %v1567_v30, 4 }
 0x119   : > { %2367 = vrot.lane.b32.xlu0 %v4186_v26, %s4620_s9  ;;  %v1672_v26 = vrot.slane %v1670_v13, 4  ;;  %v1676_v40 = vshll.u32 %v4088_v31, 16  ;;  %v4231_v7 = vld [vmem:[%s4705_s30 + $0x94] sm:$0xf]  ;;  %v4266_v31 = vld [vmem:[%s4705_s30 + $0x60] sm:$0xe] }
 0x11a   : > { %v2903_v38 = vpop.permute.xlu1 %2902  ;;  %v1662_v33 = vrot.slane %v1660_v19, 5  ;;  %v1573_v52 = vsel %vm4716_vm2, %v1568_v43, %v5575_v11  ;;  %v2758_v19 = vshll.u32 %v4231_v7, 16 }
 0x11b   : > { %2994 = vst.msk [vmem:[#allocation2 + $0x28] sm:$0xf] %vm2988_vm13, %v2903_v38  ;;  %v2901_v42 = vpop.permute.xlu0 %2900  ;;  %v1582_v38 = vrot.slane %v1580_v24, 5  ;;  %v1678_v48 = vrot.slane %v1676_v40, 5  ;;  %v4479_v24 = vld [vmem:[#allocation2 + $0x34] ss:$8 sps:$4 sm:$0xff]  }
 0x11c   : > { %2993 = vst.msk [vmem:[#allocation2 + $0x20] sm:$0xf] %vm2988_vm13, %v2901_v42  ;;  %2914 = vrot.lane.b32.xlu1 %v2651_v32, %s4621_s10  ;;  %v1659_v32 = vrot.slane %v1657_v18, 4  ;;  %v4044_v42 = vld [vmem:[%s4705_s30 + $0x84] sm:$0xf]  ;;  %v5636_v18 = vrot.slane %v2662_v2, 5 }
 0x11d   : > { %2912 = vrot.lane.b32.xlu0 %v2641_v39, %s4621_s10  ;;  %v1673_v39 = vor.u32 %v1672_v26, %v5584_v25  ;;  %v1583_v35 = vsel %vm4716_vm2, %v1578_v37, %v1582_v38  ;;  %v4230_v26 = vld [vmem:[%s4705_s30 + $0x90] sm:$0xf]  ;;  %v4302_v37 = vrot.slane %v4266_v31, 9  ;;  %v869_v31 = vld [vmem:[%s4705_s30 + $0x8c] sm:$0x1] }
 0x11e   : > { %v1060_v49 = vpop.permute.xlu1 %1059  ;;  %v1663_v44 = vor.u32 %v1662_v33, %v1659_v32  ;;  %v4268_v32 = vld [vmem:[%s4705_s30 + $0x68] sm:$0x1] }
 0x11f   : > { %1149 = vst.msk [vmem:[#allocation2 + $0x38] sm:$0xf] %vm1141_vm8, %v1060_v49  ;;  %v1058_v53 = vpop.permute.xlu0 %1057  ;;  %v1674_v47 = vrot.slane %v1673_v39, 4  ;;  %v3164_v38 = vrot.slane %v4268_v32, 5  ;;  %v867_v32 = vld [vmem:[%s4705_s30 + $0x84] sm:$0xe] }
 0x120   : > { %1148 = vst.msk [vmem:[#allocation2 + $0x30] sm:$0xf] %vm1141_vm8, %v1058_v53  ;;  %2930 = vrot.lane.b32.xlu1 %v2747_v45, %s4621_s10  ;;  %v4123_v45 = vld [vmem:[%s4705_s30 + $0x58] sm:$0xf]  ;;  %v1664_v53 = vrot.slane %v1663_v44, 4 }
 0x121   : > { %2928 = vrot.lane.b32.xlu0 %v2737_v50, %s4621_s10  ;;  %v2069_v49 = vrot.slane %v4123_v45, 5  ;;  %v5603_v50 = vld [vmem:[%s4705_s30 + $0x88] sm:$0xf]  ;;  %v1679_v59 = vsel %vm4716_vm2, %v1674_v47, %v1678_v48  ;;  %v4279_v44 = vld [vmem:[%s4705_s30 + $0x94] sm:$0xf]  ;;  %v5658_v48 = vrot.slane %v2758_v19, 5 }
 0x122   : > { %v1254_v61 = vpop.permute.xlu1 %1253  ;;  %v3298_v63 = vld [vmem:[#allocation2 + $0x28] sm:$0xff]  ;;  %v1669_v0 = vsel %vm4716_vm2, %v1664_v53, %v5584_v25  ;;  %v2762_v25 = vshrl.u32 %v4231_v7, 16  ;;  %v3189_v47 = vrot.slane %v4279_v44, 5  ;;  %v4180_v53 = vld [vmem:[%s4705_s30 + $0x60] sm:$0xf] }
 0x123   : > { %1343 = vst.msk [vmem:[#allocation2 + $0x38] sm:$0xf] %vm1335_vm9, %v1254_v61  ;;  %v1252_v3 = vpop.permute.xlu0 %1251  ;;  %v3297_v4 = vld [vmem:[#allocation2 + $0x20] sm:$0xff]  ;;  %v2071_v60 = vrot.slane %v2069_v49, 4  ;;  %v2072_v61 = vrot.slane %v4124_v54, 5 }
 0x124   : > { %1342 = vst.msk [vmem:[#allocation2 + $0x30] sm:$0xf] %vm1335_vm9, %v1252_v3  ;;  %1071 = vrot.lane.b32.xlu1 %v981_v58, %s4616_s5  ;;  %v4316_v8 = vcombine.low %v3297_v4, %v3298_v63  ;;  %v2097_v58 = vrot.slane %v5603_v50, 5  ;;  %v4218_v3 = vld [vmem:[%s4705_s30 + $0x60] sm:$0xf] }
 0x125   : > { %1069 = vrot.lane.b32.xlu0 %v978_v62, %s4616_s5  ;;  %v4136_v62 = vld [vmem:[%s4705_s30 + $0x8c] sm:$0x1]  ;;  %v2073_v11 = vsel %vm4872_vm6, %v2071_v60, %v2072_v61  ;;  %v2653_v12 = vshrl.u32 %v4218_v3, 16  ;;  %v2656_v23 = vshll.u32 %v4218_v3, 16  ;;  %v4278_v50 = vld [vmem:[%s4705_s30 + $0x90] sm:$0xe] }
 0x126   : > { %v1815_v14 = vpop.permute.xlu1 %1814  ;;  %3639 = vmatmul.mubr.bf16.gmra.mxu0 %v4316_v8  ;;  %v2099_v8 = vrot.slane %v2097_v58, 4  ;;  %v2098_v40 = vsel %vm4872_vm6, %v4162_v16, %v2097_v58  ;;  %v4189_v3 = vld [vmem:[%s4705_s30 + $0x94] sm:$0xf]  ;;  %v868_v19 = vld [vmem:[%s4705_s30 + $0x88] sm:$0xf] }
 0x127   : > { %1904 = vst.msk [vmem:[#allocation2 + $0x38] sm:$0xf] %vm1896_vm10, %v1815_v14  ;;  %v1813_v20 = vpop.permute.xlu0 %1812  ;;  %v2070_v14 = vsel %vm4872_vm6, %v4158_v1, %v2069_v49  ;;  %4356 = vmatprep.mubr.msk.bf16.mxu0 %vm3541_vm14, %v4479_v24  ;;  %v2764_v49 = vrot.slane %v2762_v25, 4  ;;  %v857_v24 = vld [vmem:[%s4705_s30 + $0x5c] sm:$0x1] }
 0x128   : > { %1903 = vst.msk [vmem:[#allocation2 + $0x30] sm:$0xf] %vm1896_vm10, %v1813_v20  ;;  %1087 = vrot.lane.b32.xlu1 %v1009_v9, %s4616_s5  ;;  %v2100_v9 = vrot.slane %v4136_v62, 5  ;;  %v4267_v20 = vld [vmem:[%s4705_s30 + $0x64] sm:$0xf]  ;;  %v3191_v62 = vrot.slane %v3189_v47, 4 }
 0x129   : > { %1085 = vrot.lane.b32.xlu0 %v1006_v10, %s4616_s5  ;;  %v2666_v10 = vshrl.u32 %v4219_v57, 16  ;;  %v3161_v33 = vrot.slane %v4267_v20, 5  ;;  %v4306_v57 = vrot.slane %v4278_v50, 9  ;;  %v2765_v7 = vor.u32 %v2764_v49, %v5658_v48  ;;  %v4090_v49 = vld [vmem:[%s4705_s30 + $0x94] sm:$0xf] }
 0x12a   : > { %v2152_v28 = vpop.permute.xlu1 %2151 }
 0x12b   : > { %2241 = vst.msk [vmem:[#allocation2 + $0x38] sm:$0xf] %vm2233_vm11, %v2152_v28  ;;  %v2150_v34 = vpop.permute.xlu0 %2149  ;;  %v2668_v30 = vrot.slane %v2666_v10, 4  ;;  %v3163_v43 = vrot.slane %v3161_v33, 4  ;;  %v3190_v1 = vsel %vm4872_vm6, %v4306_v57, %v3189_v47  ;;  %v4188_v10 = vld [vmem:[%s4705_s30 + $0x90] sm:$0xf] }
 0x12c   : > { %2240 = vst.msk [vmem:[#allocation2 + $0x30] sm:$0xf] %vm2233_vm11, %v2150_v34  ;;  %1265 = vrot.lane.b32.xlu1 %v4037_v21, %s4617_s6  ;;  %v2655_v34 = vrot.slane %v2653_v12, 4  ;;  %v1694_v57 = vshrl.u32 %v4090_v49, 16 }
 0x12d   : > { %1263 = vrot.lane.b32.xlu0 %v4036_v29, %s4617_s6  ;;  %v2101_v29 = vsel %vm4872_vm6, %v2099_v8, %v2100_v9  ;;  %v2669_v54 = vor.u32 %v2668_v30, %v5636_v18  ;;  %v3165_v56 = vsel %vm4872_vm6, %v3163_v43, %v3164_v38  ;;  %3281 = vst.msk [vmem:[#allocation2 + $0xa4] sm:$0xf] %vm237_vm3, %v3190_v1  ;;  %v4039_v1 = vld [vmem:[%s4705_s30 + $0x64] sm:$0xf] }
 0x12e   : > { %v2346_v41 = vpop.permute.xlu1 %2345  ;;  %3274 = vst.msk [vmem:[#allocation2 + $0x6c] sm:$0xf] %vm237_vm3, %v3165_v56  ;;  %v1690_v56 = vshll.u32 %v4090_v49, 16  ;;  %v4221_v49 = vld [vmem:[%s4705_s30 + $0x6c] sm:$0xf] }
 0x12f   : > { %2435 = vst.msk [vmem:[#allocation2 + $0x38] sm:$0xf] %vm2427_vm12, %v2346_v41  ;;  %v2344_v46 = vpop.permute.xlu0 %2343  ;;  %v2749_v41 = vshrl.u32 %v4230_v26, 16 }
 0x130   : > { %2434 = vst.msk [vmem:[#allocation2 + $0x30] sm:$0xf] %vm2427_vm12, %v2344_v46  ;;  %1281 = vrot.lane.b32.xlu1 %v4045_v36, %s4617_s6  ;;  %v2658_v36 = vrot.slane %v2656_v23, 5  ;;  %v2672_v46 = vshll.u32 %v5634_v17, 16  ;;  %v856_v23 = vld [vmem:[%s4705_s30 + $0x58] sm:$0xf] }
 0x131   : > { %1279 = vrot.lane.b32.xlu0 %v4044_v42, %s4617_s6  ;;  %v2752_v42 = vshll.u32 %v4230_v26, 16  ;;  %v2751_v60 = vrot.slane %v2749_v41, 4  ;;  %v984_v17 = vrot.slane %v856_v23, 5  ;;  %v855_v26 = vld [vmem:[%s4705_s30 + $0x54] sm:$0xe]  ;;  %v1015_v41 = vrot.slane %v869_v31, 5 }
 0x132   : > { %v2907_v51 = vpop.permute.xlu1 %2906  ;;  %v2674_v6 = vrot.slane %v2672_v46, 5 }
 0x133   : > { %2996 = vst.msk [vmem:[#allocation2 + $0x38] sm:$0xf] %vm2988_vm13, %v2907_v51  ;;  %v2905_v55 = vpop.permute.xlu0 %2904  ;;  %v4280_v51 = vld [vmem:[%s4705_s30 + $0x98] sm:$0x1]  ;;  %v2754_v61 = vrot.slane %v2752_v42, 5  ;;  %v986_v30 = vrot.slane %v984_v17, 4 }
 0x134   : > { %2995 = vst.msk [vmem:[#allocation2 + $0x30] sm:$0xf] %vm2988_vm13, %v2905_v55  ;;  %1826 = vrot.lane.b32.xlu1 %v1583_v35, %s4618_s7  ;;  %v3162_v35 = vsel %vm4872_vm6, %v4302_v37, %v3161_v33  ;;  %v2659_v55 = vor.u32 %v2658_v36, %v2655_v34  ;;  %v4015_v36 = vrot.slane %v855_v26, 9  ;;  %v4078_v37 = vld [vmem:[%s4705_s30 + $0x64] sm:$0xf]  ;;  %v4019_v42 = vrot.slane %v867_v32, 9 }
 0x135   : > { %1824 = vrot.lane.b32.xlu0 %v1573_v52, %s4618_s7  ;;  %3273 = vst.msk [vmem:[#allocation2 + $0x64] sm:$0xf] %vm237_vm3, %v3162_v35  ;;  %v4181_v52 = vld [vmem:[%s4705_s30 + $0x64] sm:$0xf]  ;;  %v2755_v12 = vor.u32 %v2754_v61, %v2751_v60  ;;  %v1594_v44 = vshll.u32 %v4078_v37, 16 }
 0x136   : > { %v1064_v63 = vpop.permute.xlu1 %1063  ;;  %v985_v35 = vsel %vm4872_vm6, %v4015_v36, %v984_v17  ;;  %v4138_v26 = vld [vmem:[%s4705_s30 + $0x94] sm:$0xf] }
 0x137   : > { %1151 = vst.msk [vmem:[#allocation2 + $0x48] sm:$0xf] %vm1141_vm8, %v1064_v63  ;;  %v1062_v4 = vpop.permute.xlu0 %1061  ;;  %v3192_v63 = vrot.slane %v4280_v51, 5  ;;  %v4089_v51 = vld [vmem:[%s4705_s30 + $0x90] sm:$0xf] }
 0x138   : > { %1150 = vst.msk [vmem:[#allocation2 + $0x40] sm:$0xf] %vm1141_vm8, %v1062_v4  ;;  %1842 = vrot.lane.b32.xlu1 %v1679_v59, %s4618_s7  ;;  %v4232_v59 = vld [vmem:[%s4705_s30 + $0x98] sm:$0x1]  ;;  %v2670_v4 = vrot.slane %v2669_v54, 4  ;;  %v1596_v54 = vrot.slane %v1594_v44, 5 }
 0x139   : > { %1840 = vrot.lane.b32.xlu0 %v1669_v0, %s4618_s7  ;;  %v3193_v2 = vsel %vm4872_vm6, %v3191_v62, %v3192_v63  ;;  %v2768_v8 = vshll.u32 %v4232_v59, 16  ;;  %v4079_v59 = vld [vmem:[%s4705_s30 + $0x68] sm:$0x1]  ;;  %v1681_v62 = vshrl.u32 %v4089_v51, 16  ;;  %v1684_v63 = vshll.u32 %v4089_v51, 16 }
 0x13a   : > { %v1080_v13 = vpop.permute.xlu1 %1079  ;;  %v3300_v15 = vld [vmem:[#allocation2 + $0x38] sm:$0xff]  ;;  %3282 = vst.msk [vmem:[#allocation2 + $0xac] sm:$0xf] %vm237_vm3, %v3193_v2  ;;  %v4137_v44 = vld [vmem:[%s4705_s30 + $0x90] sm:$0xe] }
 0x13b   : > { %1159 = vst.msk [vmem:[#allocation2 + $0x88] sm:$0xf] %vm1141_vm8, %v1080_v13  ;;  %v1078_v21 = vpop.permute.xlu0 %1077  ;;  %v3299_v22 = vld [vmem:[#allocation2 + $0x30] sm:$0xff]  ;;  %v2770_v16 = vrot.slane %v2768_v8, 5  ;;  %v4038_v8 = vld [vmem:[%s4705_s30 + $0x60] sm:$0xf] }
 0x13c   : > { %1158 = vst.msk [vmem:[#allocation2 + $0x80] sm:$0xf] %vm1141_vm8, %v1078_v21  ;;  %2163 = vrot.lane.b32.xlu1 %v2073_v11, %s4619_s8  ;;  %v4318_v28 = vcombine.low %v3299_v22, %v3300_v15  ;;  %v2660_v11 = vrot.slane %v2659_v55, 4  ;;  %v2766_v15 = vrot.slane %v2765_v7, 4  ;;  %v2756_v22 = vrot.slane %v2755_v12, 4 }
 0x13d   : > { %2161 = vrot.lane.b32.xlu0 %v2070_v14, %s4619_s8  ;;  %v2675_v14 = vsel %vm4716_vm2, %v2670_v4, %v2674_v6  ;;  %v5734_v4 = vrot.slane %v1690_v56, 5  ;;  %v1696_v6 = vrot.slane %v1694_v57, 4  ;;  %v1686_v12 = vrot.slane %v1684_v63, 5 }
 0x13e   : > { %v1258_v39 = vpop.permute.xlu1 %1257  ;;  %3647 = vmatmul.mubr.bf16.gmra.mxu0 %v4318_v28  ;;  %v2665_v21 = vsel %vm4716_vm2, %v2660_v11, %v5636_v18  ;;  %v1012_v28 = vrot.slane %v868_v19, 5  ;;  %v987_v18 = vrot.slane %v857_v24, 5  ;;  %v2761_v34 = vsel %vm4716_vm2, %v2756_v22, %v5658_v48  ;;  %v4126_v24 = vld [vmem:[%s4705_s30 + $0x64] sm:$0xf] }
 0x13f   : > { %1345 = vst.msk [vmem:[#allocation2 + $0x48] sm:$0xf] %vm1335_vm9, %v1258_v39  ;;  %v1256_v45 = vpop.permute.xlu0 %1255  ;;  %v4077_v39 = vld [vmem:[%s4705_s30 + $0x60] sm:$0xf]  ;;  %v1683_v11 = vrot.slane %v1681_v62, 4  ;;  %v4163_v56 = vrot.slane %v4137_v44, 9 }
 0x140   : > { %1344 = vst.msk [vmem:[#allocation2 + $0x40] sm:$0xf] %vm1335_vm9, %v1256_v45  ;;  %2179 = vrot.lane.b32.xlu1 %v2101_v29, %s4619_s8  ;;  %v2771_v29 = vsel %vm4716_vm2, %v2766_v15, %v2770_v16  ;;  %v988_v43 = vsel %vm4872_vm6, %v986_v30, %v987_v18  ;;  %v1598_v45 = vshrl.u32 %v4078_v37, 16  ;;  %v1585_v47 = vshrl.u32 %v4077_v39, 16  ;;  %v4125_v37 = vld [vmem:[%s4705_s30 + $0x60] sm:$0xe] }
 0x141   : > { %2177 = vrot.lane.b32.xlu0 %v2098_v40, %s4619_s8  ;;  %v1014_v40 = vrot.slane %v1012_v28, 4  ;;  %v1588_v48 = vshll.u32 %v4077_v39, 16  ;;  %v1697_v16 = vor.u32 %v1696_v6, %v5734_v4  ;;  %v1687_v22 = vor.u32 %v1686_v12, %v1683_v11  ;;  %v4222_v39 = vld [vmem:[%s4705_s30 + $0x70] sm:$0xf]  ;;  %v4485_v6 = vld [vmem:[#allocation2 + $0x84] ss:$8 sps:$4 sm:$0xff]  }
 0x142   : > { %v1274_v58 = vpop.permute.xlu1 %1273  ;;  %v1600_v55 = vrot.slane %v1598_v45, 4  ;;  %v1587_v60 = vrot.slane %v1585_v47, 4  ;;  %v2076_v18 = vrot.slane %v4126_v24, 5  ;;  %v4159_v47 = vrot.slane %v4125_v37, 9  ;;  %v4269_v12 = vld [vmem:[%s4705_s30 + $0x6c] sm:$0xe]  ;;  %4361 = vmatprep.mubr.msk.bf16.mxu1 %vm3541_vm14, %v4485_v6 }
 0x143   : > { %1353 = vst.msk [vmem:[#allocation2 + $0x88] sm:$0xf] %vm1335_vm9, %v1274_v58  ;;  %v1272_v0 = vpop.permute.xlu0 %1271  ;;  %v1590_v61 = vrot.slane %v1588_v48, 5  ;;  %v2686_v48 = vshll.u32 %v4222_v39, 16  ;;  %v2690_v57 = vshrl.u32 %v4222_v39, 16 }
 0x144   : > { %1352 = vst.msk [vmem:[#allocation2 + $0x80] sm:$0xf] %vm1335_vm9, %v1272_v0  ;;  %2357 = vrot.lane.b32.xlu1 %v4181_v52, %s4620_s9  ;;  %v1016_v52 = vsel %vm4872_vm6, %v1014_v40, %v1015_v41  ;;  %v1601_v2 = vor.u32 %v1600_v55, %v1596_v54  ;;  %v2078_v41 = vrot.slane %v2076_v18, 4  ;;  %v2077_v63 = vsel %vm4872_vm6, %v4159_v47, %v2076_v18  ;;  %v4235_v44 = vld [vmem:[%s4705_s30 + $0xa4] sm:$0x1] }
 0x145   : > { %2355 = vrot.lane.b32.xlu0 %v4180_v53, %s4620_s9  ;;  %v1013_v53 = vsel %vm4872_vm6, %v4019_v42, %v1012_v28 }
 0x146   : > { %v1819_v9 = vpop.permute.xlu1 %1818 }
 0x147   : > { %1906 = vst.msk [vmem:[#allocation2 + $0x48] sm:$0xf] %vm1896_vm10, %v1819_v9  ;;  %v1817_v13 = vpop.permute.xlu0 %1816  ;;  %v1591_v9 = vor.u32 %v1590_v61, %v1587_v60  ;;  %v2680_v60 = vshll.u32 %v4221_v49, 16  ;;  %v4234_v61 = vld [vmem:[%s4705_s30 + $0xa0] sm:$0xf] }
 0x148   : > { %1905 = vst.msk [vmem:[#allocation2 + $0x40] sm:$0xf] %vm1896_vm10, %v1817_v13  ;;  %2373 = vrot.lane.b32.xlu1 %v4189_v3, %s4620_s9  ;;  %v1604_v3 = vshll.u32 %v4079_v59, 16  ;;  %v4047_v13 = vld [vmem:[%s4705_s30 + $0x94] sm:$0xf]  ;;  %v2677_v59 = vshrl.u32 %v4221_v49, 16 }
 0x149   : > { %2371 = vrot.lane.b32.xlu0 %v4188_v10, %s4620_s9  ;;  %v4091_v10 = vld [vmem:[%s4705_s30 + $0x98] sm:$0x1]  ;;  %v2782_v11 = vshll.u32 %v4234_v61, 16  ;;  %v4191_v49 = vld [vmem:[%s4705_s30 + $0xa0] sm:$0xf] }
 0x14a   : > { %v1835_v20 = vpop.permute.xlu1 %1834  ;;  %v1606_v15 = vrot.slane %v1604_v3, 5  ;;  %v1700_v17 = vshll.u32 %v4091_v10, 16  ;;  %v2692_v10 = vrot.slane %v2690_v57, 4 }
 0x14b   : > { %1914 = vst.msk [vmem:[#allocation2 + $0x88] sm:$0xf] %vm1896_vm10, %v1835_v20  ;;  %v1833_v25 = vpop.permute.xlu0 %1832  ;;  %v4046_v20 = vld [vmem:[%s4705_s30 + $0x90] sm:$0xf] }
 0x14c   : > { %1913 = vst.msk [vmem:[#allocation2 + $0x80] sm:$0xf] %vm1896_vm10, %v1833_v25  ;;  %2918 = vrot.lane.b32.xlu1 %v2675_v14, %s4621_s10  ;;  %v1602_v14 = vrot.slane %v1601_v2, 4  ;;  %v1702_v30 = vrot.slane %v1700_v17, 5  ;;  %v4270_v2 = vld [vmem:[%s4705_s30 + $0x70] sm:$0xf] }
 0x14d   : > { %2916 = vrot.lane.b32.xlu0 %v2665_v21, %s4621_s10  ;;  %v1592_v21 = vrot.slane %v1591_v9, 4 }
 0x14e   : > { %v2156_v33 = vpop.permute.xlu1 %2155  ;;  %v1607_v28 = vsel %vm4716_vm2, %v1602_v14, %v1606_v15  ;;  %v2786_v14 = vshrl.u32 %v4234_v61, 16  ;;  %v4303_v15 = vrot.slane %v4269_v12, 9  ;;  %v4092_v61 = vld [vmem:[%s4705_s30 + $0x9c] sm:$0xf] }
 0x14f   : > { %2243 = vst.msk [vmem:[#allocation2 + $0x48] sm:$0xf] %vm2233_vm11, %v2156_v33  ;;  %v2154_v38 = vpop.permute.xlu0 %2153  ;;  %v1597_v32 = vsel %vm4716_vm2, %v1592_v21, %v1596_v54  ;;  %v1688_v33 = vrot.slane %v1687_v22, 4  ;;  %v2682_v21 = vrot.slane %v2680_v60, 5 }
 0x150   : > { %2242 = vst.msk [vmem:[#allocation2 + $0x40] sm:$0xf] %vm2233_vm11, %v2154_v38  ;;  %2934 = vrot.lane.b32.xlu1 %v2771_v29, %s4621_s10  ;;  %v1698_v29 = vrot.slane %v1697_v16, 4  ;;  %v2104_v38 = vrot.slane %v4138_v26, 5  ;;  %v2788_v37 = vrot.slane %v2786_v14, 4 }
 0x151   : > { %2932 = vrot.lane.b32.xlu0 %v2761_v34, %s4621_s10  ;;  %v4127_v34 = vld [vmem:[%s4705_s30 + $0x68] sm:$0x1] }
 0x152   : > { %v2172_v46 = vpop.permute.xlu1 %2171  ;;  %v1703_v40 = vsel %vm4716_vm2, %v1698_v29, %v1702_v30  ;;  %v2079_v42 = vrot.slane %v4127_v34, 5  ;;  %v2105_v9 = vsel %vm4872_vm6, %v4163_v56, %v2104_v38  ;;  %v4283_v34 = vld [vmem:[%s4705_s30 + $0xa4] sm:$0x1]  ;;  %v4190_v56 = vld [vmem:[%s4705_s30 + $0x9c] sm:$0xf] }
 0x153   : > { %2251 = vst.msk [vmem:[#allocation2 + $0x88] sm:$0xf] %vm2233_vm11, %v2172_v46  ;;  %v2170_v50 = vpop.permute.xlu0 %2169  ;;  %v1693_v46 = vsel %vm4716_vm2, %v1688_v33, %v5734_v4  ;;  %v4281_v33 = vld [vmem:[%s4705_s30 + $0x9c] sm:$0xe] }
 0x154   : > { %2250 = vst.msk [vmem:[#allocation2 + $0x80] sm:$0xf] %vm2233_vm11, %v2170_v50  ;;  %1075 = vrot.lane.b32.xlu1 %v988_v43, %s4616_s5  ;;  %v4139_v43 = vld [vmem:[%s4705_s30 + $0x98] sm:$0x1] }
 0x155   : > { %1073 = vrot.lane.b32.xlu0 %v985_v35, %s4616_s5  ;;  %v2107_v55 = vrot.slane %v4139_v43, 5 }
 0x156   : > { %v2350_v58 = vpop.permute.xlu1 %2349 }
 0x157   : > { %2437 = vst.msk [vmem:[#allocation2 + $0x48] sm:$0xf] %vm2427_vm12, %v2350_v58  ;;  %v2348_v0 = vpop.permute.xlu0 %2347  ;;  %v2080_v58 = vsel %vm4872_vm6, %v2078_v41, %v2079_v42  ;;  %v4182_v42 = vld [vmem:[%s4705_s30 + $0x6c] sm:$0xf] }
 0x158   : > { %2436 = vst.msk [vmem:[#allocation2 + $0x40] sm:$0xf] %vm2427_vm12, %v2348_v0  ;;  %1091 = vrot.lane.b32.xlu1 %v1016_v52, %s4616_s5  ;;  %v4481_v52 = vld [vmem:[#allocation2 + $0x44] ss:$8 sps:$4 sm:$0xff]   ;;  %v5780_v0 = vrot.slane %v2686_v48, 5 }
 0x159   : > { %1089 = vrot.lane.b32.xlu0 %v1013_v53, %s4616_s5  ;;  %v2106_v53 = vrot.slane %v2104_v38, 4  ;;  %4357 = vmatprep.mubr.msk.bf16.mxu0 %vm3541_vm14, %v4481_v52  ;;  %v4307_v38 = vrot.slane %v4281_v33, 9 }
 0x15a   : > { %v2366_v7 = vpop.permute.xlu1 %2365  ;;  %v2693_v18 = vor.u32 %v2692_v10, %v5780_v0  ;;  %v1705_v10 = vshrl.u32 %v4092_v61, 16 }
 0x15b   : > { %2445 = vst.msk [vmem:[#allocation2 + $0x88] sm:$0xf] %vm2427_vm12, %v2366_v7  ;;  %v2364_v23 = vpop.permute.xlu0 %2363  ;;  %v3168_v7 = vrot.slane %v4270_v2, 5 }
 0x15c   : > { %2444 = vst.msk [vmem:[#allocation2 + $0x80] sm:$0xf] %vm2427_vm12, %v2364_v23  ;;  %1269 = vrot.lane.b32.xlu1 %v4039_v1, %s4617_s6  ;;  %v4233_v1 = vld [vmem:[%s4705_s30 + $0x9c] sm:$0xf]  ;;  %v4271_v23 = vld [vmem:[%s4705_s30 + $0x74] sm:$0x1] }
 0x15d   : > { %1267 = vrot.lane.b32.xlu0 %v4038_v8, %s4617_s6  ;;  %v2108_v8 = vsel %vm4872_vm6, %v2106_v53, %v2107_v55  ;;  %v3170_v16 = vrot.slane %v3168_v7, 4  ;;  %v3171_v17 = vrot.slane %v4271_v23, 5  ;;  %v2773_v22 = vshrl.u32 %v4233_v1, 16  ;;  %v870_v23 = vld [vmem:[%s4705_s30 + $0x90] sm:$0xe] }
 0x15e   : > { %v2911_v19 = vpop.permute.xlu1 %2910  ;;  %v2776_v24 = vshll.u32 %v4233_v1, 16  ;;  %v2792_v53 = vshll.u32 %v4235_v44, 16 }
 0x15f   : > { %2998 = vst.msk [vmem:[#allocation2 + $0x48] sm:$0xf] %vm2988_vm13, %v2911_v19  ;;  %v2909_v25 = vpop.permute.xlu0 %2908  ;;  %v3172_v29 = vsel %vm4872_vm6, %v3170_v16, %v3171_v17  ;;  %v4094_v17 = vld [vmem:[%s4705_s30 + $0xa4] sm:$0x1] }
 0x160   : > { %2997 = vst.msk [vmem:[#allocation2 + $0x40] sm:$0xf] %vm2988_vm13, %v2909_v25  ;;  %1285 = vrot.lane.b32.xlu1 %v4047_v13, %s4617_s6  ;;  %v4223_v13 = vld [vmem:[%s4705_s30 + $0x74] sm:$0x1]  ;;  %v4282_v25 = vld [vmem:[%s4705_s30 + $0xa0] sm:$0xf] }
 0x161   : > { %1283 = vrot.lane.b32.xlu0 %v4046_v20, %s4617_s6  ;;  %v2679_v20 = vrot.slane %v2677_v59, 4  ;;  %v3196_v30 = vrot.slane %v4282_v25, 5  ;;  %3276 = vst.msk [vmem:[#allocation2 + $0x7c] sm:$0xf] %vm237_vm3, %v3172_v29  ;;  %v871_v59 = vld [vmem:[%s4705_s30 + $0x94] sm:$0xf] }
 0x162   : > { %v2927_v31 = vpop.permute.xlu1 %2926  ;;  %v5859_v29 = vld [vmem:[%s4705_s30 + $0xa0] sm:$0xf] }
 0x163   : > { %3006 = vst.msk [vmem:[#allocation2 + $0x88] sm:$0xf] %vm2988_vm13, %v2927_v31  ;;  %v2925_v36 = vpop.permute.xlu0 %2924  ;;  %v2696_v31 = vshll.u32 %v4223_v13, 16  ;;  %v3198_v39 = vrot.slane %v3196_v30, 4  ;;  %v2683_v43 = vor.u32 %v2682_v21, %v2679_v20  ;;  %v3197_v47 = vsel %vm4872_vm6, %v4307_v38, %v3196_v30  ;;  %v4049_v38 = vld [vmem:[%s4705_s30 + $0xa0] sm:$0xf] }
 0x164   : > { %3005 = vst.msk [vmem:[#allocation2 + $0x80] sm:$0xf] %vm2988_vm13, %v2925_v36  ;;  %1830 = vrot.lane.b32.xlu1 %v1607_v28, %s4618_s7  ;;  %v3169_v28 = vsel %vm4872_vm6, %v4303_v15, %v3168_v7  ;;  %v4183_v36 = vld [vmem:[%s4705_s30 + $0x70] sm:$0xf]  ;;  %v4020_v21 = vrot.slane %v870_v23, 9 }
 0x165   : > { %1828 = vrot.lane.b32.xlu0 %v1597_v32, %s4618_s7  ;;  %v5805_v32 = vrot.slane %v2782_v11, 5  ;;  %3275 = vst.msk [vmem:[#allocation2 + $0x74] sm:$0xf] %vm237_vm3, %v3169_v28  ;;  %3283 = vst.msk [vmem:[#allocation2 + $0xb4] sm:$0xf] %vm237_vm3, %v3197_v47  ;;  %v2684_v57 = vrot.slane %v2683_v43, 4 }
 0x166   : > { %v1068_v45 = vpop.permute.xlu1 %1067  ;;  %v3302_v35 = vld [vmem:[#allocation2 + $0x48] sm:$0xff]  ;;  %v1708_v11 = vshll.u32 %v4092_v61, 16  ;;  %v1724_v28 = vshll.u32 %v4094_v17, 16  ;;  %v4142_v43 = vld [vmem:[%s4705_s30 + $0xa4] sm:$0x1] }
 0x167   : > { %1153 = vst.msk [vmem:[#allocation2 + $0x58] sm:$0xf] %vm1141_vm8, %v1068_v45  ;;  %v1066_v50 = vpop.permute.xlu0 %1065  ;;  %v3301_v51 = vld [vmem:[#allocation2 + $0x40] sm:$0xff]  ;;  %v2775_v45 = vrot.slane %v2773_v22, 4  ;;  %v2789_v52 = vor.u32 %v2788_v37, %v5805_v32  ;;  %v2689_v7 = vsel %vm4716_vm2, %v2684_v57, %v5780_v0  ;;  %v1707_v22 = vrot.slane %v1705_v10, 4 }
 0x168   : > { %1152 = vst.msk [vmem:[#allocation2 + $0x50] sm:$0xf] %vm1141_vm8, %v1066_v50  ;;  %1846 = vrot.lane.b32.xlu1 %v1703_v40, %s4618_s7  ;;  %v4320_v54 = vcombine.low %v3301_v51, %v3302_v35  ;;  %v3199_v40 = vrot.slane %v4283_v34, 5  ;;  %v2694_v50 = vrot.slane %v2693_v18, 4  ;;  %v2698_v51 = vrot.slane %v2696_v31, 5 }
 0x169   : > { %1844 = vrot.lane.b32.xlu0 %v1693_v46, %s4618_s7  ;;  %v2778_v46 = vrot.slane %v2776_v24, 5  ;;  %v2790_v2 = vrot.slane %v2789_v52, 4  ;;  %v1710_v24 = vrot.slane %v1708_v11, 5  ;;  %v4237_v18 = vld [vmem:[%s4705_s30 + $0xac] sm:$0xf] }
 0x16a   : > { %v1084_v62 = vpop.permute.xlu1 %1083  ;;  %3655 = vmatmul.mubr.bf16.gmra.mxu0 %v4320_v54  ;;  %v3200_v48 = vsel %vm4872_vm6, %v3198_v39, %v3199_v40  ;;  %v4093_v54 = vld [vmem:[%s4705_s30 + $0xa0] sm:$0xf]  ;;  %v2699_v1 = vsel %vm4716_vm2, %v2694_v50, %v2698_v51  ;;  %v4236_v37 = vld [vmem:[%s4705_s30 + $0xa8] sm:$0xf]  ;;  %v1726_v40 = vrot.slane %v1724_v28, 5  ;;  %v2810_v44 = vshrl.u32 %v4237_v18, 16 }
 0x16b   : > { %1161 = vst.msk [vmem:[#allocation2 + $0x98] sm:$0xf] %vm1141_vm8, %v1084_v62  ;;  %v1082_v3 = vpop.permute.xlu0 %1081  ;;  %v4483_v4 = vld [vmem:[#allocation2 + $0x80] ss:$8 sps:$4 sm:$0xff]   ;;  %v1714_v62 = vshll.u32 %v4093_v54, 16  ;;  %v1711_v33 = vor.u32 %v1710_v24, %v1707_v22  ;;  %v2800_v47 = vshll.u32 %v4236_v37, 16 }
 0x16c   : > { %1160 = vst.msk [vmem:[#allocation2 + $0x90] sm:$0xf] %vm1141_vm8, %v1082_v3  ;;  %2167 = vrot.lane.b32.xlu1 %v2080_v58, %s4619_s8  ;;  %3687 = vmatmul.mubr.bf16.vlgmr.msra.gmra.mxu1 %v4483_v4  ;;  %v2779_v58 = vor.u32 %v2778_v46, %v2775_v45  ;;  %v2794_v3 = vrot.slane %v2792_v53, 5  ;;  %v1019_v4 = vrot.slane %v871_v59, 5  ;;  %v4140_v51 = vld [vmem:[%s4705_s30 + $0x9c] sm:$0xe] }
 0x16d   : > { %2165 = vrot.lane.b32.xlu0 %v2077_v63, %s4619_s8  ;;  %3284 = vst.msk [vmem:[#allocation2 + $0xbc] sm:$0xf] %vm237_vm3, %v3200_v48  ;;  %v1718_v63 = vshrl.u32 %v4093_v54, 16  ;;  %v5845_v13 = vrot.slane %v1714_v62, 5  ;;  %v1712_v46 = vrot.slane %v1711_v33, 4  ;;  %v2114_v54 = vrot.slane %v4142_v43, 5 }
 0x16e   : > { %v1262_v19 = vpop.permute.xlu1 %1261  ;;  %v2795_v0 = vsel %vm4716_vm2, %v2790_v2, %v2794_v3  ;;  %v1021_v15 = vrot.slane %v1019_v4, 4  ;;  %v4285_v48 = vld [vmem:[%s4705_s30 + $0xac] sm:$0xf]  ;;  %v4286_v57 = vld [vmem:[%s4705_s30 + $0xb0] sm:$0x1] }
 0x16f   : > { %1347 = vst.msk [vmem:[#allocation2 + $0x58] sm:$0xf] %vm1335_vm9, %v1262_v19  ;;  %v1260_v26 = vpop.permute.xlu0 %1259  ;;  %v1720_v14 = vrot.slane %v1718_v63, 4  ;;  %v3203_v52 = vrot.slane %v4285_v48, 5  ;;  %v3206_v61 = vrot.slane %v4286_v57, 5  ;;  %v1717_v63 = vsel %vm4716_vm2, %v1712_v46, %v5845_v13 }
 0x170   : > { %1346 = vst.msk [vmem:[#allocation2 + $0x50] sm:$0xf] %vm1335_vm9, %v1260_v26  ;;  %2183 = vrot.lane.b32.xlu1 %v2108_v8, %s4619_s8  ;;  %v2780_v8 = vrot.slane %v2779_v58, 4  ;;  %v2812_v58 = vrot.slane %v2810_v44, 4  ;;  %v4238_v2 = vld [vmem:[%s4705_s30 + $0xb0] sm:$0x1] }
 0x171   : > { %2181 = vrot.lane.b32.xlu0 %v2105_v9, %s4619_s8  ;;  %v872_v9 = vld [vmem:[%s4705_s30 + $0x98] sm:$0x1]  ;;  %v1721_v26 = vor.u32 %v1720_v14, %v5845_v13  ;;  %v2816_v11 = vshll.u32 %v4238_v2, 16  ;;  %v4193_v17 = vld [vmem:[%s4705_s30 + $0xac] sm:$0xf] }
 0x172   : > { %v1278_v41 = vpop.permute.xlu1 %1277  ;;  %v1022_v16 = vrot.slane %v872_v9, 5  ;;  %v2785_v20 = vsel %vm4716_vm2, %v2780_v8, %v5805_v32  ;;  %v1020_v32 = vsel %vm4872_vm6, %v4020_v21, %v1019_v4  ;;  %v2802_v4 = vrot.slane %v2800_v47, 5  ;;  %v4192_v21 = vld [vmem:[%s4705_s30 + $0xa8] sm:$0xf]  ;;  %v4486_v47 = vld [vmem:[#allocation2 + $0x54] ss:$8 sps:$4 sm:$0xff]  }
 0x173   : > { %1355 = vst.msk [vmem:[#allocation2 + $0x98] sm:$0xf] %vm1335_vm9, %v1278_v41  ;;  %v1276_v35 = vpop.permute.xlu0 %1275  ;;  %v1722_v39 = vrot.slane %v1721_v26, 4  ;;  %v2806_v41 = vshll.u32 %v4237_v18, 16  ;;  %v2818_v24 = vrot.slane %v2816_v11, 5  ;;  %4358 = vmatprep.mubr.msk.bf16.mxu0 %vm3541_vm14, %v4486_v47 }
 0x174   : > { %1354 = vst.msk [vmem:[#allocation2 + $0x90] sm:$0xf] %vm1335_vm9, %v1276_v35  ;;  %2361 = vrot.lane.b32.xlu1 %v4183_v36, %s4620_s9  ;;  %v1023_v30 = vsel %vm4872_vm6, %v1021_v15, %v1022_v16  ;;  %v2111_v36 = vrot.slane %v5859_v29, 5  ;;  %v2797_v35 = vshrl.u32 %v4236_v37, 16  ;;  %v4095_v16 = vld [vmem:[%s4705_s30 + $0xa8] sm:$0xf] }
 0x175   : > { %2359 = vrot.lane.b32.xlu0 %v4182_v42, %s4620_s9  ;;  %v4048_v42 = vld [vmem:[%s4705_s30 + $0x9c] sm:$0xf]  ;;  %v1727_v53 = vsel %vm4716_vm2, %v1722_v39, %v1726_v40  ;;  %v875_v29 = vld [vmem:[%s4705_s30 + $0xa4] sm:$0x1]  ;;  %v1732_v18 = vshll.u32 %v4095_v16, 16 }
 0x176   : > { %v1823_v55 = vpop.permute.xlu1 %1822  ;;  %v2113_v50 = vrot.slane %v2111_v36, 4  ;;  %v2799_v3 = vrot.slane %v2797_v35, 4  ;;  %v4097_v39 = vld [vmem:[%s4705_s30 + $0xb0] sm:$0x1] }
 0x177   : > { %1908 = vst.msk [vmem:[#allocation2 + $0x58] sm:$0xf] %vm1896_vm10, %v1823_v55  ;;  %v1821_v60 = vpop.permute.xlu0 %1820  ;;  %v5883_v55 = vrot.slane %v2806_v41, 5 }
 0x178   : > { %1907 = vst.msk [vmem:[#allocation2 + $0x50] sm:$0xf] %vm1896_vm10, %v1821_v60  ;;  %2377 = vrot.lane.b32.xlu1 %v4191_v49, %s4620_s9  ;;  %v3205_v60 = vrot.slane %v3203_v52, 4  ;;  %v2115_v9 = vsel %vm4872_vm6, %v2113_v50, %v2114_v54  ;;  %v2803_v14 = vor.u32 %v2802_v4, %v2799_v3  ;;  %v1748_v50 = vshll.u32 %v4097_v39, 16 }
 0x179   : > { %2375 = vrot.lane.b32.xlu0 %v4190_v56, %s4620_s9  ;;  %v4284_v56 = vld [vmem:[%s4705_s30 + $0xa8] sm:$0xe]  ;;  %v2813_v10 = vor.u32 %v2812_v58, %v5883_v55 }
 0x17a   : > { %v1839_v6 = vpop.permute.xlu1 %1838  ;;  %v4308_v59 = vrot.slane %v4284_v56, 9  ;;  %v3207_v8 = vsel %vm4872_vm6, %v3205_v60, %v3206_v61  ;;  %v2804_v28 = vrot.slane %v2803_v14, 4  ;;  %v4488_v60 = vld [vmem:[#allocation2 + $0x94] ss:$8 sps:$4 sm:$0xff]   ;;  %v1750_v3 = vrot.slane %v1748_v50, 5 }
 0x17b   : > { %1916 = vst.msk [vmem:[#allocation2 + $0x98] sm:$0xf] %vm1896_vm10, %v1839_v6  ;;  %v1837_v12 = vpop.permute.xlu0 %1836  ;;  %v2814_v22 = vrot.slane %v2813_v10, 4  ;;  %4362 = vmatprep.mubr.msk.bf16.mxu1 %vm3541_vm14, %v4488_v60  ;;  %v4195_v50 = vld [vmem:[%s4705_s30 + $0xb8] sm:$0xf] }
 0x17c   : > { %1915 = vst.msk [vmem:[#allocation2 + $0x90] sm:$0xf] %vm1896_vm10, %v1837_v12  ;;  %2922 = vrot.lane.b32.xlu1 %v2699_v1, %s4621_s10  ;;  %v4164_v1 = vrot.slane %v4140_v51, 9  ;;  %v4096_v12 = vld [vmem:[%s4705_s30 + $0xac] sm:$0xf]  ;;  %v2809_v41 = vsel %vm4716_vm2, %v2804_v28, %v5883_v55 }
 0x17d   : > { %2920 = vrot.lane.b32.xlu0 %v2689_v7, %s4621_s10  ;;  %v3204_v7 = vsel %vm4872_vm6, %v4308_v59, %v3203_v52  ;;  %3286 = vst.msk [vmem:[#allocation2 + $0xcc] sm:$0xf] %vm237_vm3, %v3207_v8  ;;  %v5935_v51 = vld [vmem:[%s4705_s30 + $0xac] sm:$0xf] }
 0x17e   : > { %v2160_v19 = vpop.permute.xlu1 %2159  ;;  %3285 = vst.msk [vmem:[#allocation2 + $0xc4] sm:$0xf] %vm237_vm3, %v3204_v7  ;;  %v2112_v13 = vsel %vm4872_vm6, %v4164_v1, %v2111_v36  ;;  %v2819_v36 = vsel %vm4716_vm2, %v2814_v22, %v2818_v24  ;;  %v2118_v61 = vrot.slane %v5935_v51, 5  ;;  %v4051_v1 = vld [vmem:[%s4705_s30 + $0xac] sm:$0xf] }
 0x17f   : > { %2245 = vst.msk [vmem:[#allocation2 + $0x58] sm:$0xf] %vm2233_vm11, %v2160_v19  ;;  %v2158_v25 = vpop.permute.xlu0 %2157  ;;  %v1738_v19 = vshll.u32 %v4096_v12, 16  ;;  %v4145_v7 = vld [vmem:[%s4705_s30 + $0xb0] sm:$0x1] }
 0x180   : > { %2244 = vst.msk [vmem:[#allocation2 + $0x50] sm:$0xf] %vm2233_vm11, %v2158_v25  ;;  %2938 = vrot.lane.b32.xlu1 %v2795_v0, %s4621_s10  ;;  %v874_v0 = vld [vmem:[%s4705_s30 + $0xa0] sm:$0xf]  ;;  %v2120_v14 = vrot.slane %v2118_v61, 4 }
 0x181   : > { %2936 = vrot.lane.b32.xlu0 %v2785_v20, %s4621_s10  ;;  %v1742_v20 = vshrl.u32 %v4096_v12, 16  ;;  %v1026_v25 = vrot.slane %v874_v0, 5  ;;  %v5921_v33 = vrot.slane %v1738_v19, 5  ;;  %v4143_v0 = vld [vmem:[%s4705_s30 + $0xa8] sm:$0xe] }
 0x182   : > { %v2176_v31 = vpop.permute.xlu1 %2175 }
 0x183   : > { %2253 = vst.msk [vmem:[#allocation2 + $0x98] sm:$0xf] %vm2233_vm11, %v2176_v31  ;;  %v2174_v34 = vpop.permute.xlu0 %2173  ;;  %v1028_v37 = vrot.slane %v1026_v25, 4 }
 0x184   : > { %2252 = vst.msk [vmem:[#allocation2 + $0x90] sm:$0xf] %vm2233_vm11, %v2174_v34  ;;  %1095 = vrot.lane.b32.xlu1 %v1023_v30, %s4616_s5  ;;  %v1729_v30 = vshrl.u32 %v4095_v16, 16  ;;  %v1744_v34 = vrot.slane %v1742_v20, 4  ;;  %v4287_v20 = vld [vmem:[%s4705_s30 + $0xb4] sm:$0xe] }
 0x185   : > { %1093 = vrot.lane.b32.xlu0 %v1020_v32, %s4616_s5  ;;  %v873_v32 = vld [vmem:[%s4705_s30 + $0x9c] sm:$0xe]  ;;  %v4309_v24 = vrot.slane %v4287_v20, 9  ;;  %v4053_v20 = vld [vmem:[%s4705_s30 + $0xb8] sm:$0xf] }
 0x186   : > { %v2354_v45 = vpop.permute.xlu1 %2353  ;;  %v4021_v43 = vrot.slane %v873_v32, 9  ;;  %v1731_v44 = vrot.slane %v1729_v30, 4  ;;  %v4165_v30 = vrot.slane %v4143_v0, 9 }
 0x187   : > { %2439 = vst.msk [vmem:[#allocation2 + $0x58] sm:$0xf] %vm2427_vm12, %v2354_v45  ;;  %v2352_v49 = vpop.permute.xlu0 %2351  ;;  %v1734_v45 = vrot.slane %v1732_v18, 5  ;;  %v4241_v18 = vld [vmem:[%s4705_s30 + $0xbc] sm:$0x1] }
 0x188   : > { %2438 = vst.msk [vmem:[#allocation2 + $0x50] sm:$0xf] %vm2427_vm12, %v2352_v49  ;;  %1289 = vrot.lane.b32.xlu1 %v4049_v38, %s4617_s6  ;;  %v1029_v38 = vrot.slane %v875_v29, 5  ;;  %v1745_v49 = vor.u32 %v1744_v34, %v5921_v33  ;;  %v1027_v55 = vsel %vm4872_vm6, %v4021_v43, %v1026_v25  ;;  %v2840_v39 = vshll.u32 %v4241_v18, 16 }
 0x189   : > { %1287 = vrot.lane.b32.xlu0 %v4048_v42, %s4617_s6  ;;  %v1735_v57 = vor.u32 %v1734_v45, %v1731_v44  ;;  %v2119_v43 = vsel %vm4872_vm6, %v4165_v30, %v2118_v61  ;;  %v877_v45 = vld [vmem:[%s4705_s30 + $0xac] sm:$0xf] }
 0x18a   : > { %v2370_v62 = vpop.permute.xlu1 %2369  ;;  %v1030_v52 = vsel %vm4872_vm6, %v1028_v37, %v1029_v38  ;;  %v1746_v2 = vrot.slane %v1745_v49, 4 }
 0x18b   : > { %2447 = vst.msk [vmem:[#allocation2 + $0x98] sm:$0xf] %vm2427_vm12, %v2370_v62  ;;  %v2368_v6 = vpop.permute.xlu0 %2367  ;;  %v4239_v62 = vld [vmem:[%s4705_s30 + $0xb4] sm:$0xf]  ;;  %v1736_v10 = vrot.slane %v1735_v57, 4 }
 0x18c   : > { %2446 = vst.msk [vmem:[#allocation2 + $0x90] sm:$0xf] %vm2427_vm12, %v2368_v6  ;;  %1850 = vrot.lane.b32.xlu1 %v1727_v53, %s4618_s7  ;;  %v4240_v53 = vld [vmem:[%s4705_s30 + $0xb8] sm:$0xf]  ;;  %v4050_v6 = vld [vmem:[%s4705_s30 + $0xa8] sm:$0xf]  ;;  %v1751_v16 = vsel %vm4716_vm2, %v1746_v2, %v1750_v3 }
 0x18d   : > { %1848 = vrot.lane.b32.xlu0 %v1717_v63, %s4618_s7  ;;  %v2830_v4 = vshll.u32 %v4240_v53, 16  ;;  %v2834_v8 = vshrl.u32 %v4240_v53, 16  ;;  %v2821_v11 = vshrl.u32 %v4239_v62, 16  ;;  %v2824_v12 = vshll.u32 %v4239_v62, 16  ;;  %v878_v57 = vld [vmem:[%s4705_s30 + $0xb0] sm:$0x1] }
 0x18e   : > { %v2915_v23 = vpop.permute.xlu1 %2914  ;;  %v1741_v29 = vsel %vm4716_vm2, %v1736_v10, %v5921_v33  ;;  %v1033_v53 = vrot.slane %v877_v45, 5  ;;  %v1036_v3 = vrot.slane %v878_v57, 5  ;;  %v4290_v45 = vld [vmem:[%s4705_s30 + $0xc0] sm:$0xe] }
 0x18f   : > { %3000 = vst.msk [vmem:[#allocation2 + $0x58] sm:$0xf] %vm2988_vm13, %v2915_v23  ;;  %v2913_v15 = vpop.permute.xlu0 %2912  ;;  %v4288_v23 = vld [vmem:[%s4705_s30 + $0xb8] sm:$0xf]  ;;  %v5961_v19 = vrot.slane %v2830_v4, 5  ;;  %v2836_v22 = vrot.slane %v2834_v8, 4 }
 0x190   : > { %2999 = vst.msk [vmem:[#allocation2 + $0x50] sm:$0xf] %vm2988_vm13, %v2913_v15  ;;  %2187 = vrot.lane.b32.xlu1 %v2115_v9, %s4619_s8  ;;  %v3210_v15 = vrot.slane %v4288_v23, 5  ;;  %v2826_v32 = vrot.slane %v2824_v12, 5  ;;  %v1035_v2 = vrot.slane %v1033_v53, 4 }
 0x191   : > { %2185 = vrot.lane.b32.xlu0 %v2112_v13, %s4619_s8  ;;  %v2837_v38 = vor.u32 %v2836_v22, %v5961_v19  ;;  %v4100_v4 = vld [vmem:[%s4705_s30 + $0xbc] sm:$0x1]  ;;  %v6013_v23 = vld [vmem:[%s4705_s30 + $0xb8] sm:$0xf] }
 0x192   : > { %v2931_v26 = vpop.permute.xlu1 %2930  ;;  %v3212_v25 = vrot.slane %v3210_v15, 4 }
 0x193   : > { %3008 = vst.msk [vmem:[#allocation2 + $0x98] sm:$0xf] %vm2988_vm13, %v2931_v26  ;;  %v2929_v31 = vpop.permute.xlu0 %2928  ;;  %v2838_v51 = vrot.slane %v2837_v38, 4 }
 0x194   : > { %3007 = vst.msk [vmem:[#allocation2 + $0x90] sm:$0xf] %vm2988_vm13, %v2929_v31  ;;  %2381 = vrot.lane.b32.xlu1 %v4193_v17, %s4620_s9  ;;  %v2121_v17 = vrot.slane %v4145_v7, 5  ;;  %v2823_v31 = vrot.slane %v2821_v11, 4  ;;  %v1772_v11 = vshll.u32 %v4100_v4, 16 }
 0x195   : > { %2379 = vrot.lane.b32.xlu0 %v4192_v21, %s4620_s9  ;;  %v4289_v21 = vld [vmem:[%s4705_s30 + $0xbc] sm:$0x1] }
 0x196   : > { %v1072_v40 = vpop.permute.xlu1 %1071  ;;  %v3304_v42 = vld [vmem:[#allocation2 + $0x58] sm:$0xff]  ;;  %v3213_v26 = vrot.slane %v4289_v21, 5  ;;  %v2122_v33 = vsel %vm4872_vm6, %v2120_v14, %v2121_v17  ;;  %v2827_v44 = vor.u32 %v2826_v32, %v2823_v31  ;;  %v4243_v14 = vld [vmem:[%s4705_s30 + $0xc4] sm:$0xf]  ;;  %v1774_v22 = vrot.slane %v1772_v11, 5 }
 0x197   : > { %1155 = vst.msk [vmem:[#allocation2 + $0x68] sm:$0xf] %vm1141_vm8, %v1072_v40  ;;  %v1070_v46 = vpop.permute.xlu0 %1069  ;;  %v3303_v35 = vld [vmem:[#allocation2 + $0x50] sm:$0xff]  ;;  %v4099_v40 = vld [vmem:[%s4705_s30 + $0xb8] sm:$0xf] }
 0x198   : > { %1154 = vst.msk [vmem:[#allocation2 + $0x60] sm:$0xf] %vm1141_vm8, %v1070_v46  ;;  %2942 = vrot.lane.b32.xlu1 %v2819_v36, %s4621_s10  ;;  %v4322_v48 = vcombine.low %v3303_v35, %v3304_v42  ;;  %v3211_v36 = vsel %vm4872_vm6, %v4309_v24, %v3210_v15  ;;  %v3214_v37 = vsel %vm4872_vm6, %v3212_v25, %v3213_v26  ;;  %v1762_v35 = vshll.u32 %v4099_v40, 16  ;;  %v4148_v26 = vld [vmem:[%s4705_s30 + $0xbc] sm:$0x1] }
 0x199   : > { %2940 = vrot.lane.b32.xlu0 %v2809_v41, %s4621_s10  ;;  %3287 = vst.msk [vmem:[#allocation2 + $0xd4] sm:$0xf] %vm237_vm3, %v3211_v36  ;;  %3288 = vst.msk [vmem:[#allocation2 + $0xdc] sm:$0xf] %vm237_vm3, %v3214_v37  ;;  %v4098_v41 = vld [vmem:[%s4705_s30 + $0xb4] sm:$0xf] }
 0x19a   : > { %v1088_v54 = vpop.permute.xlu1 %1087  ;;  %3663 = vmatmul.mubr.bf16.gmra.mxu0 %v4322_v48  ;;  %v3312_v56 = vld [vmem:[#allocation2 + $0x98] sm:$0xff]  ;;  %v1766_v47 = vshrl.u32 %v4099_v40, 16  ;;  %v1753_v48 = vshrl.u32 %v4098_v41, 16  ;;  %v1756_v49 = vshll.u32 %v4098_v41, 16  ;;  %v5999_v60 = vrot.slane %v1762_v35, 5 }
 0x19b   : > { %1163 = vst.msk [vmem:[#allocation2 + $0xa8] sm:$0xf] %vm1141_vm8, %v1088_v54  ;;  %v1086_v58 = vpop.permute.xlu0 %1085  ;;  %v3311_v59 = vld [vmem:[#allocation2 + $0x90] sm:$0xff]  ;;  %v2854_v25 = vshll.u32 %v4243_v14, 16  ;;  %v4291_v37 = vld [vmem:[%s4705_s30 + $0xc4] sm:$0xf] }
 0x19c   : > { %1162 = vst.msk [vmem:[#allocation2 + $0xa0] sm:$0xf] %vm1141_vm8, %v1086_v58  ;;  %1099 = vrot.lane.b32.xlu1 %v1030_v52, %s4616_s5  ;;  %v4330_v63 = vcombine.low %v3311_v59, %v3312_v56  ;;  %v2842_v52 = vrot.slane %v2840_v39, 5  ;;  %v2828_v56 = vrot.slane %v2827_v44, 4  ;;  %v876_v59 = vld [vmem:[%s4705_s30 + $0xa8] sm:$0xe] }
 0x19d   : > { %1097 = vrot.lane.b32.xlu0 %v1027_v55, %s4616_s5  ;;  %v4194_v55 = vld [vmem:[%s4705_s30 + $0xb4] sm:$0xf]  ;;  %v1768_v61 = vrot.slane %v1766_v47, 4  ;;  %v1755_v62 = vrot.slane %v1753_v48, 4  ;;  %v4022_v8 = vrot.slane %v876_v59, 9  ;;  %v6035_v39 = vrot.slane %v2854_v25, 5 }
 0x19e   : > { %v1266_v9 = vpop.permute.xlu1 %1265  ;;  %3695 = vmatmul.mubr.bf16.gmra.mxu1 %v4330_v63  ;;  %v1758_v63 = vrot.slane %v1756_v49, 5  ;;  %v2833_v7 = vsel %vm4716_vm2, %v2828_v56, %v5961_v19  ;;  %v2125_v19 = vrot.slane %v6013_v23, 5  ;;  %v4052_v31 = vld [vmem:[%s4705_s30 + $0xb4] sm:$0xf]  ;;  %v3217_v40 = vrot.slane %v4291_v37, 5 }
 0x19f   : > { %1349 = vst.msk [vmem:[#allocation2 + $0x68] sm:$0xf] %vm1335_vm9, %v1266_v9  ;;  %v1264_v13 = vpop.permute.xlu0 %1263  ;;  %v1769_v10 = vor.u32 %v1768_v61, %v5999_v60  ;;  %v1034_v15 = vsel %vm4872_vm6, %v4022_v8, %v1033_v53  ;;  %v4244_v48 = vld [vmem:[%s4705_s30 + $0xc8] sm:$0x1]  ;;  %v4101_v61 = vld [vmem:[%s4705_s30 + $0xc0] sm:$0xf] }
 0x1a0   : > { %1348 = vst.msk [vmem:[#allocation2 + $0x60] sm:$0xf] %vm1335_vm9, %v1264_v13  ;;  %1293 = vrot.lane.b32.xlu1 %v4051_v1, %s4617_s6  ;;  %v2843_v1 = vsel %vm4716_vm2, %v2838_v51, %v2842_v52  ;;  %v1759_v12 = vor.u32 %v1758_v63, %v1755_v62  ;;  %v1037_v13 = vsel %vm4872_vm6, %v1035_v2, %v1036_v3  ;;  %v2127_v36 = vrot.slane %v2125_v19, 4  ;;  %v880_v3 = vld [vmem:[%s4705_s30 + $0xb8] sm:$0xf] }
 0x1a1   : > { %1291 = vrot.lane.b32.xlu0 %v4050_v6, %s4617_s6  ;;  %v1770_v21 = vrot.slane %v1769_v10, 4  ;;  %v3219_v51 = vrot.slane %v3217_v40, 4  ;;  %v1780_v23 = vshll.u32 %v4101_v61, 16 }
 0x1a2   : > { %v1282_v28 = vpop.permute.xlu1 %1281  ;;  %v1760_v24 = vrot.slane %v1759_v12, 4  ;;  %v1777_v12 = vshrl.u32 %v4101_v61, 16  ;;  %v4151_v61 = vld [vmem:[%s4705_s30 + $0xc8] sm:$0x1] }
 0x1a3   : > { %1357 = vst.msk [vmem:[#allocation2 + $0xa8] sm:$0xf] %vm1335_vm9, %v1282_v28  ;;  %v1280_v34 = vpop.permute.xlu0 %1279  ;;  %v4146_v28 = vld [vmem:[%s4705_s30 + $0xb4] sm:$0xe]  ;;  %v1775_v41 = vsel %vm4716_vm2, %v1770_v21, %v1774_v22  ;;  %v881_v21 = vld [vmem:[%s4705_s30 + $0xbc] sm:$0x1] }
 0x1a4   : > { %1356 = vst.msk [vmem:[#allocation2 + $0xa0] sm:$0xf] %vm1335_vm9, %v1280_v34  ;;  %1854 = vrot.lane.b32.xlu1 %v1751_v16, %s4618_s7  ;;  %v4242_v16 = vld [vmem:[%s4705_s30 + $0xc0] sm:$0xf]  ;;  %v4166_v38 = vrot.slane %v4146_v28, 9 }
 0x1a5   : > { %1852 = vrot.lane.b32.xlu0 %v1741_v29, %s4618_s7  ;;  %v2858_v29 = vshrl.u32 %v4243_v14, 16  ;;  %v2845_v30 = vshrl.u32 %v4242_v16, 16  ;;  %v2848_v32 = vshll.u32 %v4242_v16, 16  ;;  %v4197_v14 = vld [vmem:[%s4705_s30 + $0xc4] sm:$0xf]  ;;  %v1040_v16 = vrot.slane %v880_v3, 5 }
 0x1a6   : > { %v1827_v42 = vpop.permute.xlu1 %1826  ;;  %v4103_v28 = vld [vmem:[%s4705_s30 + $0xc8] sm:$0x1] }
 0x1a7   : > { %1910 = vst.msk [vmem:[#allocation2 + $0x68] sm:$0xf] %vm1896_vm10, %v1827_v42  ;;  %v1825_v46 = vpop.permute.xlu0 %1824  ;;  %v1765_v42 = vsel %vm4716_vm2, %v1760_v24, %v5999_v60  ;;  %v2847_v44 = vrot.slane %v2845_v30, 4  ;;  %v2850_v49 = vrot.slane %v2848_v32, 5  ;;  %v2864_v60 = vshll.u32 %v4244_v48, 16 }
 0x1a8   : > { %1909 = vst.msk [vmem:[#allocation2 + $0x60] sm:$0xf] %vm1896_vm10, %v1825_v46  ;;  %2191 = vrot.lane.b32.xlu1 %v2122_v33, %s4619_s8  ;;  %v2128_v33 = vrot.slane %v4148_v26, 5  ;;  %v4292_v46 = vld [vmem:[%s4705_s30 + $0xc8] sm:$0x1]  ;;  %v1782_v30 = vrot.slane %v1780_v23, 5 }
 0x1a9   : > { %2189 = vrot.lane.b32.xlu0 %v2119_v43, %s4619_s8  ;;  %v2860_v43 = vrot.slane %v2858_v29, 4  ;;  %v3220_v52 = vrot.slane %v4292_v46, 5  ;;  %v2851_v2 = vor.u32 %v2850_v49, %v2847_v44  ;;  %v879_v24 = vld [vmem:[%s4705_s30 + $0xb4] sm:$0xe]  ;;  %v1779_v29 = vrot.slane %v1777_v12, 4 }
 0x1aa   : > { %v1843_v54 = vpop.permute.xlu1 %1842  ;;  %v1043_v32 = vrot.slane %v881_v21, 5  ;;  %v6093_v46 = vld [vmem:[%s4705_s30 + $0xc4] sm:$0xf]  ;;  %v4294_v23 = vld [vmem:[%s4705_s30 + $0xd0] sm:$0xf] }
 0x1ab   : > { %1918 = vst.msk [vmem:[#allocation2 + $0xa8] sm:$0xf] %vm1896_vm10, %v1843_v54  ;;  %v1841_v58 = vpop.permute.xlu0 %1840  ;;  %v4102_v54 = vld [vmem:[%s4705_s30 + $0xc4] sm:$0xf]  ;;  %v3221_v57 = vsel %vm4872_vm6, %v3219_v51, %v3220_v52  ;;  %v2861_v59 = vor.u32 %v2860_v43, %v6035_v39  ;;  %v1796_v43 = vshll.u32 %v4103_v28, 16 }
 0x1ac   : > { %1917 = vst.msk [vmem:[#allocation2 + $0xa0] sm:$0xf] %vm1896_vm10, %v1841_v58  ;;  %2385 = vrot.lane.b32.xlu1 %v4195_v50, %s4620_s9  ;;  %v4310_v50 = vrot.slane %v4290_v45, 9  ;;  %v2129_v58 = vsel %vm4872_vm6, %v2127_v36, %v2128_v33  ;;  %v1786_v4 = vshll.u32 %v4102_v54, 16  ;;  %v1790_v10 = vshrl.u32 %v4102_v54, 16 }
 0x1ad   : > { %2383 = vrot.lane.b32.xlu0 %v4194_v55, %s4620_s9  ;;  %3290 = vst.msk [vmem:[#allocation2 + $0xec] sm:$0xf] %vm237_vm3, %v3221_v57  ;;  %v4023_v33 = vrot.slane %v879_v24, 9  ;;  %v1783_v45 = vor.u32 %v1782_v30, %v1779_v29  ;;  %v4295_v24 = vld [vmem:[%s4705_s30 + $0xd4] sm:$0x1] }
 0x1ae   : > { %v2164_v6 = vpop.permute.xlu1 %2163  ;;  %v3218_v56 = vsel %vm4872_vm6, %v4310_v50, %v3217_v40  ;;  %v6077_v25 = vrot.slane %v1786_v4, 5  ;;  %v1792_v26 = vrot.slane %v1790_v10, 4  ;;  %v4245_v50 = vld [vmem:[%s4705_s30 + $0xcc] sm:$0xf]  ;;  %v4054_v4 = vld [vmem:[%s4705_s30 + $0xc0] sm:$0xf] }
 0x1af   : > { %2247 = vst.msk [vmem:[#allocation2 + $0x68] sm:$0xf] %vm2233_vm11, %v2164_v6  ;;  %v2162_v9 = vpop.permute.xlu0 %2161  ;;  %v1041_v48 = vsel %vm4872_vm6, %v4023_v33, %v1040_v16  ;;  %v4247_v29 = vld [vmem:[%s4705_s30 + $0xd4] sm:$0x1] }
 0x1b0   : > { %2246 = vst.msk [vmem:[#allocation2 + $0x60] sm:$0xf] %vm2233_vm11, %v2162_v9  ;;  %2946 = vrot.lane.b32.xlu1 %v2843_v1, %s4621_s10  ;;  %v2126_v1 = vsel %vm4872_vm6, %v4166_v38, %v2125_v19  ;;  %v4196_v19 = vld [vmem:[%s4705_s30 + $0xc0] sm:$0xf] }
 0x1b1   : > { %2944 = vrot.lane.b32.xlu0 %v2833_v7, %s4621_s10  ;;  %3289 = vst.msk [vmem:[#allocation2 + $0xe4] sm:$0xf] %vm237_vm3, %v3218_v56  ;;  %v2132_v56 = vrot.slane %v6093_v46, 5 }
 0x1b2   : > { %v2180_v0 = vpop.permute.xlu1 %2179 }
 0x1b3   : > { %2255 = vst.msk [vmem:[#allocation2 + $0xa8] sm:$0xf] %vm2233_vm11, %v2180_v0  ;;  %v2178_v17 = vpop.permute.xlu0 %2177  ;;  %v2862_v0 = vrot.slane %v2861_v59, 4  ;;  %v1784_v59 = vrot.slane %v1783_v45, 4  ;;  %v2134_v12 = vrot.slane %v2132_v56, 4 }
 0x1b4   : > { %2254 = vst.msk [vmem:[#allocation2 + $0xa0] sm:$0xf] %vm2233_vm11, %v2178_v17  ;;  %1103 = vrot.lane.b32.xlu1 %v1037_v13, %s4616_s5 }
 0x1b5   : > { %1101 = vrot.lane.b32.xlu0 %v1034_v15, %s4616_s5  ;;  %v2866_v15 = vrot.slane %v2864_v60, 5 }
 0x1b6   : > { %v2358_v18 = vpop.permute.xlu1 %2357 }
 0x1b7   : > { %2441 = vst.msk [vmem:[#allocation2 + $0x68] sm:$0xf] %vm2427_vm12, %v2358_v18  ;;  %v2356_v34 = vpop.permute.xlu0 %2355  ;;  %v2867_v18 = vsel %vm4716_vm2, %v2862_v0, %v2866_v15  ;;  %v2135_v0 = vrot.slane %v4151_v61, 5 }
 0x1b8   : > { %2440 = vst.msk [vmem:[#allocation2 + $0x60] sm:$0xf] %vm2427_vm12, %v2356_v34  ;;  %1297 = vrot.lane.b32.xlu1 %v4053_v20, %s4617_s6  ;;  %v3624_v47 = vpop.f32.mrf.mxu0  ;;  %v2852_v20 = vrot.slane %v2851_v2, 4 }
 0x1b9   : > { %1295 = vrot.lane.b32.xlu0 %v4052_v31, %s4617_s6  ;;  %v3798_v6 = vmul.f32 %v3624_v47, %v3624_v47  ;;  %v1042_v31 = vrot.slane %v1040_v16, 4 }
 0x1ba   : > { %v2374_v35 = vpop.permute.xlu1 %2373  ;;  %v3626_v55 = vpop.f32.mrf.mxu0  ;;  %v2857_v36 = vsel %vm4716_vm2, %v2852_v20, %v6035_v39 }
 0x1bb   : > { %2449 = vst.msk [vmem:[#allocation2 + $0xa8] sm:$0xf] %vm2427_vm12, %v2374_v35  ;;  %v2372_v53 = vpop.permute.xlu0 %2371  ;;  %v1044_v39 = vsel %vm4872_vm6, %v1042_v31, %v1043_v32  ;;  %v4246_v35 = vld [vmem:[%s4705_s30 + $0xd0] sm:$0xf]  ;;  %v1798_v55 = vrot.slane %v1796_v43, 5  ;;  %v3227_v32 = vrot.slane %v4295_v24, 5 }
 0x1bc   : > { %2448 = vst.msk [vmem:[#allocation2 + $0xa0] sm:$0xf] %vm2427_vm12, %v2372_v53  ;;  %1858 = vrot.lane.b32.xlu1 %v1775_v41, %s4618_s7  ;;  %v3627_v63 = vpop.f32.mrf.mxu0  ;;  %v4490_v41 = vld [vmem:[#allocation2 + $0x64] ss:$8 sps:$4 sm:$0xff]   ;;  %v2878_v60 = vshll.u32 %v4246_v35, 16 }
 0x1bd   : > { %1856 = vrot.lane.b32.xlu0 %v1765_v42, %s4618_s7  ;;  %v6065_v8 = vadd.f32 %v3627_v63, %v3624_v47  ;;  %v3799_v9 = vmul.f32 %v3627_v63, %v3627_v63  ;;  %v1793_v42 = vor.u32 %v1792_v26, %v6077_v25  ;;  %4359 = vmatprep.mubr.msk.bf16.mxu0 %vm3541_vm14, %v4490_v41  ;;  %v4492_v53 = vld [vmem:[#allocation2 + $0xa4] ss:$8 sps:$4 sm:$0xff]   ;;  %v2882_v63 = vshrl.u32 %v4246_v35, 16  ;;  %v4199_v35 = vld [vmem:[%s4705_s30 + $0xd0] sm:$0xf] }
 0x1be   : > { %v2919_v62 = vpop.permute.xlu1 %2918  ;;  %v3629_v11 = vpop.f32.mrf.mxu0  ;;  %4363 = vmatprep.mubr.msk.bf16.mxu1 %vm3541_vm14, %v4492_v53  ;;  %v2880_v16 = vrot.slane %v2878_v60, 5 }
 0x1bf   : > { %3002 = vst.msk [vmem:[#allocation2 + $0x68] sm:$0xf] %vm2988_vm13, %v2919_v62  ;;  %v2917_v7 = vpop.permute.xlu0 %2916  ;;  %v6069_v13 = vadd.f32 %v3799_v9, %v3798_v6  ;;  %v1794_v54 = vrot.slane %v1793_v42, 4  ;;  %v4149_v62 = vld [vmem:[%s4705_s30 + $0xc0] sm:$0xe]  ;;  %v2872_v6 = vshll.u32 %v4245_v50, 16 }
 0x1c0   : > { %3001 = vst.msk [vmem:[#allocation2 + $0x60] sm:$0xf] %vm2988_vm13, %v2917_v7  ;;  %2195 = vrot.lane.b32.xlu1 %v2129_v58, %s4619_s8  ;;  %v4055_v58 = vld [vmem:[%s4705_s30 + $0xc4] sm:$0xf]  ;;  %v4167_v15 = vrot.slane %v4149_v62, 9  ;;  %v2884_v20 = vrot.slane %v2882_v63, 4 }
 0x1c1   : > { %2193 = vrot.lane.b32.xlu0 %v2126_v1, %s4619_s8  ;;  %v2869_v1 = vshrl.u32 %v4245_v50, 16  ;;  %v1799_v11 = vsel %vm4716_vm2, %v1794_v54, %v1798_v55  ;;  %v2874_v30 = vrot.slane %v2872_v6, 5  ;;  %v2888_v42 = vshll.u32 %v4247_v29, 16  ;;  %v4198_v50 = vld [vmem:[%s4705_s30 + $0xcc] sm:$0xf] }
 0x1c2   : > { %v2935_v17 = vpop.permute.xlu1 %2934  ;;  %v2885_v41 = vor.u32 %v2884_v20, %v2880_v16 }
 0x1c3   : > { %3010 = vst.msk [vmem:[#allocation2 + $0xa8] sm:$0xf] %vm2988_vm13, %v2935_v17  ;;  %v2933_v22 = vpop.permute.xlu0 %2932  ;;  %v2871_v21 = vrot.slane %v2869_v1, 4 }
 0x1c4   : > { %3009 = vst.msk [vmem:[#allocation2 + $0xa0] sm:$0xf] %vm2988_vm13, %v2933_v22  ;;  %2389 = vrot.lane.b32.xlu1 %v4197_v14, %s4620_s9  ;;  %v4293_v22 = vld [vmem:[%s4705_s30 + $0xcc] sm:$0xe]  ;;  %s6233_s30 = sand.u32 1, %s4597_s13  }
 0x1c5   : > { %2387 = vrot.lane.b32.xlu0 %v4196_v19, %s4620_s9  ;;  %v1789_v19 = vsel %vm4716_vm2, %v1784_v59, %v6077_v25  ;;  %v2875_v45 = vor.u32 %v2874_v30, %v2871_v21  ;;  %s3870_s21 = scalar_lea.sflag [#allocation4], %s6233_s30 }
 0x1c6   : > { %v1076_v34 = vpop.permute.xlu1 %1075  ;;  %v3306_v37 = vld [vmem:[#allocation2 + $0x68] sm:$0xff] }
 0x1c7   : > { %1157 = vst.msk [vmem:[#allocation2 + $0x78] sm:$0xf] %vm1141_vm8, %v1076_v34  ;;  %v1074_v38 = vpop.permute.xlu0 %1073  ;;  %v3305_v40 = vld [vmem:[#allocation2 + $0x60] sm:$0xff] }
 0x1c8   : > { %1156 = vst.msk [vmem:[#allocation2 + $0x70] sm:$0xf] %vm1141_vm8, %v1074_v38  ;;  %2950 = vrot.lane.b32.xlu1 %v2867_v18, %s4621_s10  ;;  %v4324_v44 = vcombine.low %v3305_v40, %v3306_v37  ;;  %v4311_v18 = vrot.slane %v4293_v22, 9  ;;  %v2136_v40 = vsel %vm4872_vm6, %v2134_v12, %v2135_v0  ;;  %v4496_v22 = vld [vmem:[#allocation2 + $0xb4] ss:$8 sps:$4 sm:$0xff]  }
 0x1c9   : > { %2948 = vrot.lane.b32.xlu0 %v2857_v36, %s4621_s10 }
 0x1ca   : > { %v1092_v47 = vpop.permute.xlu1 %1091  ;;  %3671 = vmatmul.mubr.bf16.gmra.mxu0 %v4324_v44  ;;  %v3314_v49 = vld [vmem:[#allocation2 + $0xa8] sm:$0xff]  ;;  %v2133_v44 = vsel %vm4872_vm6, %v4167_v15, %v2132_v56 }
 0x1cb   : > { %1165 = vst.msk [vmem:[#allocation2 + $0xb8] sm:$0xf] %vm1141_vm8, %v1092_v47  ;;  %v1090_v51 = vpop.permute.xlu0 %1089  ;;  %v3313_v52 = vld [vmem:[#allocation2 + $0xa0] sm:$0xff]  ;;  %v2886_v47 = vrot.slane %v2885_v41, 4 }
 0x1cc   : > { %1164 = vst.msk [vmem:[#allocation2 + $0xb0] sm:$0xf] %vm1141_vm8, %v1090_v51  ;;  %1107 = vrot.lane.b32.xlu1 %v1044_v39, %s4616_s5  ;;  %v4332_v57 = vcombine.low %v3313_v52, %v3314_v49  ;;  %v2876_v51 = vrot.slane %v2875_v45, 4 }
 0x1cd   : > { %1105 = vrot.lane.b32.xlu0 %v1041_v48, %s4616_s5  ;;  %v2890_v48 = vrot.slane %v2888_v42, 5  ;;  %s4005_s5 = sshll.u32 %s6233_s30, 3 }
 0x1ce   : > { %v1270_v2 = vpop.permute.xlu1 %1269  ;;  %v3632_v3 = vpop.f32.mrf.mxu0  ;;  %3703 = vmatmul.mubr.bf16.gmra.mxu1 %v4332_v57  ;;  %v2881_v53 = vsel %vm4716_vm2, %v2876_v51, %v2880_v16  ;;  %v4494_v16 = vld [vmem:[#allocation2 + $0x74] ss:$8 sps:$4 sm:$0xff]  }
 0x1cf   : > { %1351 = vst.msk [vmem:[#allocation2 + $0x78] sm:$0xf] %vm1335_vm9, %v1270_v2  ;;  %v1268_v7 = vpop.permute.xlu0 %1267  ;;  %v3759_v9 = vadd.f32 %v6065_v8, %v3632_v3  ;;  %v3800_v10 = vmul.f32 %v3632_v3, %v3632_v3  ;;  %v3224_v8 = vrot.slane %v4294_v23, 5  ;;  %v2891_v46 = vsel %vm4716_vm2, %v2886_v47, %v2890_v48  ;;  %4360 = vmatprep.mubr.msk.bf16.mxu0 %vm3541_vm14, %v4494_v16 }
 0x1d0   : > { %1350 = vst.msk [vmem:[#allocation2 + $0x70] sm:$0xf] %vm1335_vm9, %v1268_v7  ;;  %1301 = vrot.lane.b32.xlu1 %v4055_v58, %s4617_s6  ;;  %v3634_v14 = vpop.f32.mrf.mxu0  ;;  %4364 = vmatprep.mubr.msk.bf16.mxu1 %vm3541_vm14, %v4496_v22 }
 0x1d1   : > { %v3831_v17 = vadd.f32 %v6069_v13, %v3800_v10  ;;  %1299 = vrot.lane.b32.xlu0 %v4054_v4, %s4617_s6  ;;  %v3226_v31 = vrot.slane %v3224_v8, 4  ;;  %v3225_v37 = vsel %vm4872_vm6, %v4311_v18, %v3224_v8  ;;  %s6236_s6 = scalar_lea.vmem [#allocation3], %s4005_s5 }
 0x1d2   : > { %v1286_v26 = vpop.permute.xlu1 %1285  ;;  %v3635_v28 = vpop.f32.mrf.mxu0  ;;  %3291 = vst.msk [vmem:[#allocation2 + $0xf4] sm:$0xf] %vm237_vm3, %v3225_v37 }
 0x1d3   : > { %1359 = vst.msk [vmem:[#allocation2 + $0xb8] sm:$0xf] %vm1335_vm9, %v1286_v26  ;;  %v1284_v13 = vpop.permute.xlu0 %1283  ;;  %v3760_v34 = vadd.f32 %v3759_v9, %v3635_v28  ;;  %v3801_v36 = vmul.f32 %v3635_v28, %v3635_v28  ;;  %v3228_v33 = vsel %vm4872_vm6, %v3226_v31, %v3227_v32 }
 0x1d4   : > { %1358 = vst.msk [vmem:[#allocation2 + $0xb0] sm:$0xf] %vm1335_vm9, %v1284_v13  ;;  %1862 = vrot.lane.b32.xlu1 %v1799_v11, %s4618_s7  ;;  %v3637_v25 = vpop.f32.mrf.mxu0 }
 0x1d5   : > { %v3832_v38 = vadd.f32 %v3831_v17, %v3801_v36  ;;  %1860 = vrot.lane.b32.xlu0 %v1789_v19, %s4618_s7  ;;  %3292 = vst.msk [vmem:[#allocation2 + $0xfc] sm:$0xf] %vm237_vm3, %v3228_v33  ;;  %s6239_s7 = scalar_lea.vmem [#allocation5], %s4005_s5 }
 0x1d6   : > { %v1831_v43 = vpop.permute.xlu1 %1830 }
 0x1d7   : > { %1912 = vst.msk [vmem:[#allocation2 + $0x78] sm:$0xf] %vm1896_vm10, %v1831_v43  ;;  %v1829_v39 = vpop.permute.xlu0 %1828 }
 0x1d8   : > { %1911 = vst.msk [vmem:[#allocation2 + $0x70] sm:$0xf] %vm1896_vm10, %v1829_v39  ;;  %2199 = vrot.lane.b32.xlu1 %v2136_v40, %s4619_s8 }
 0x1d9   : > { %2197 = vrot.lane.b32.xlu0 %v2133_v44, %s4619_s8  ;;  %s4371_s8 = sshll.u32 %s4605_s15, 7 }
 0x1da   : > { %v1847_v49 = vpop.permute.xlu1 %1846  ;;  %s6256_s11 = scalar_lea.hbm %s6335_s2, %s4371_s8  ;;  %s6264_s19 = scalar_lea.hbm %s6336_s3, %s4371_s8 }
 0x1db   : > { %1920 = vst.msk [vmem:[#allocation2 + $0xb8] sm:$0xf] %vm1896_vm10, %v1847_v49  ;;  %v1845_v5 = vpop.permute.xlu0 %1844  ;;  %v4498_v49 = vld [vmem:[#allocation2 + $0xc4] ss:$8 sps:$4 sm:$0xff]  }
 0x1dc   : > { %1919 = vst.msk [vmem:[#allocation2 + $0xb0] sm:$0xf] %vm1896_vm10, %v1845_v5  ;;  %2393 = vrot.lane.b32.xlu1 %v4199_v35, %s4620_s9 }
 0x1dd   : > { %2391 = vrot.lane.b32.xlu0 %v4198_v50, %s4620_s9  ;;  %s3888_s9 = sshll.u32 %s6236_s6, 4  ;;  %s6258_s9 = int_to_ptr.vmem [resolvable:$true] %s3888_s9 }
 0x1de   : > { %v2168_v52 = vpop.permute.xlu1 %2167  ;;  %s4507_s23 = scalar_lea.vmem %s6258_s9, 128  ;;  %p4514_p1 = scmp.lt.s32.totalorder %s6258_s9, %s4512_s27 }
 0x1df   : > { %2249 = vst.msk [vmem:[#allocation2 + $0x78] sm:$0xf] %vm2233_vm11, %v2168_v52  ;;  %v2166_v54 = vpop.permute.xlu0 %2165  ;;  %p4508_p12 = scmp.ne.s32.totalorder %s6258_s9, %s4507_s23  ;;  %p4515_p2 = scmp.lt.s32.totalorder %s4513_s28, %s4507_s23 }
 0x1e0   : > { %2248 = vst.msk [vmem:[#allocation2 + $0x70] sm:$0xf] %vm2233_vm11, %v2166_v54  ;;  %2954 = vrot.lane.b32.xlu1 %v2891_v46, %s4621_s10 }
 0x1e1   : > { %2952 = vrot.lane.b32.xlu0 %v2881_v53, %s4621_s10  ;;  %s3901_s10 = sshll.u32 %s6239_s7, 4  ;;  %p4509_p13 = pnand %p4508_p12, %p4686_p4  ;;  %s6266_s10 = int_to_ptr.vmem [resolvable:$true] %s3901_s10 }
 0x1e2   : > { %v2184_v55 = vpop.permute.xlu1 %2183  ;;  %p4516_p3 = por %p4515_p2, %p4514_p1 }
 0x1e3   : > { %2257 = vst.msk [vmem:[#allocation2 + $0xb8] sm:$0xf] %vm2233_vm11, %v2184_v55  ;;  %v2182_v56 = vpop.permute.xlu0 %2181  ;;  %p4510_p0 = pneg %p4509_p13 }
 0x1e4   : > { %2256 = vst.msk [vmem:[#allocation2 + $0xb0] sm:$0xf] %vm2233_vm11, %v2182_v56 }
 0x1e5   : > { %p4517_p5 = pnand %p4516_p3, %p4510_p0 }
 0x1e6   : > { %v2362_v57 = vpop.permute.xlu1 %2361  ;;  %v3640_v58 = vpop.f32.mrf.mxu0 }
 0x1e7   : > { %2443 = vst.msk [vmem:[#allocation2 + $0x78] sm:$0xf] %vm2427_vm12, %v2362_v57  ;;  %v2360_v27 = vpop.permute.xlu0 %2359  ;;  %v3761_v59 = vadd.f32 %v3760_v34, %v3640_v58  ;;  %v3802_v60 = vmul.f32 %v3640_v58, %v3640_v58 }
 0x1e8   : > { %2442 = vst.msk [vmem:[#allocation2 + $0x70] sm:$0xf] %vm2427_vm12, %v2360_v27  ;;  %v3642_v61 = vpop.f32.mrf.mxu0 }
 0x1e9   : > { %v3833_v62 = vadd.f32 %v3832_v38, %v3802_v60 }
 0x1ea   : > { %v2378_v63 = vpop.permute.xlu1 %2377  ;;  %v3643_v1 = vpop.f32.mrf.mxu0 }
 0x1eb   : > { %2451 = vst.msk [vmem:[#allocation2 + $0xb8] sm:$0xf] %vm2427_vm12, %v2378_v63  ;;  %v2376_v2 = vpop.permute.xlu0 %2375  ;;  %v3762_v3 = vadd.f32 %v3761_v59, %v3643_v1  ;;  %v3803_v4 = vmul.f32 %v3643_v1, %v3643_v1 }
 0x1ec   : > { %2450 = vst.msk [vmem:[#allocation2 + $0xb0] sm:$0xf] %vm2427_vm12, %v2376_v2  ;;  %v3645_v6 = vpop.f32.mrf.mxu0  ;;  %v4500_v2 = vld [vmem:[#allocation2 + $0xd4] ss:$8 sps:$4 sm:$0xff]  }
 0x1ed   : > { %v3834_v7 = vadd.f32 %v3833_v62, %v3803_v4 }
 0x1ee   : > { %v2923_v9 = vpop.permute.xlu1 %2922 }
 0x1ef   : > { %3004 = vst.msk [vmem:[#allocation2 + $0x78] sm:$0xf] %vm2988_vm13, %v2923_v9  ;;  %v2921_v10 = vpop.permute.xlu0 %2920 }
 0x1f0   : > { %3003 = vst.msk [vmem:[#allocation2 + $0x70] sm:$0xf] %vm2988_vm13, %v2921_v10 }
 0x1f2   : > { %v2939_v11 = vpop.permute.xlu1 %2938 }
 0x1f3   : > { %3012 = vst.msk [vmem:[#allocation2 + $0xb8] sm:$0xf] %vm2988_vm13, %v2939_v11  ;;  %v2937_v12 = vpop.permute.xlu0 %2936 }
 0x1f4   : > { %3011 = vst.msk [vmem:[#allocation2 + $0xb0] sm:$0xf] %vm2988_vm13, %v2937_v12 }
 0x1f6   : > { %v1096_v23 = vpop.permute.xlu1 %1095  ;;  %v3308_v14 = vld [vmem:[#allocation2 + $0x78] sm:$0xff] }
 0x1f7   : > { %1167 = vst.msk [vmem:[#allocation2 + $0xc8] sm:$0xf] %vm1141_vm8, %v1096_v23  ;;  %v1094_v0 = vpop.permute.xlu0 %1093  ;;  %v3307_v15 = vld [vmem:[#allocation2 + $0x70] sm:$0xff] }
 0x1f8   : > { %1166 = vst.msk [vmem:[#allocation2 + $0xc0] sm:$0xf] %vm1141_vm8, %v1094_v0  ;;  %v4326_v8 = vcombine.low %v3307_v15, %v3308_v14 }
 0x1fa   : > { %v1290_v17 = vpop.permute.xlu1 %1289  ;;  %3679 = vmatmul.mubr.bf16.gmra.mxu0 %v4326_v8  ;;  %v3316_v19 = vld [vmem:[#allocation2 + $0xb8] sm:$0xff] }
 0x1fb   : > { %1361 = vst.msk [vmem:[#allocation2 + $0xc8] sm:$0xf] %vm1335_vm9, %v1290_v17  ;;  %v1288_v20 = vpop.permute.xlu0 %1287  ;;  %v3315_v21 = vld [vmem:[#allocation2 + $0xb0] sm:$0xff] }
 0x1fc   : > { %1360 = vst.msk [vmem:[#allocation2 + $0xc0] sm:$0xf] %vm1335_vm9, %v1288_v20  ;;  %v4334_v24 = vcombine.low %v3315_v21, %v3316_v19 }
 0x1fe   : > { %v1851_v26 = vpop.permute.xlu1 %1850  ;;  %v3648_v28 = vpop.f32.mrf.mxu0  ;;  %3711 = vmatmul.mubr.bf16.gmra.mxu1 %v4334_v24 }
 0x1ff   : > { %1922 = vst.msk [vmem:[#allocation2 + $0xc8] sm:$0xf] %vm1896_vm10, %v1851_v26  ;;  %v1849_v29 = vpop.permute.xlu0 %1848  ;;  %v3763_v30 = vadd.f32 %v3762_v3, %v3648_v28  ;;  %v3804_v18 = vmul.f32 %v3648_v28, %v3648_v28  ;;  %4365 = vmatprep.mubr.msk.bf16.mxu1 %vm3541_vm14, %v4498_v49 }
 0x200   : > { %1921 = vst.msk [vmem:[#allocation2 + $0xc0] sm:$0xf] %vm1896_vm10, %v1849_v29  ;;  %v3650_v31 = vpop.f32.mrf.mxu0 }
 0x201   : > { %v3835_v32 = vadd.f32 %v3834_v7, %v3804_v18 }
 0x202   : > { %v2188_v13 = vpop.permute.xlu1 %2187  ;;  %v3651_v34 = vpop.f32.mrf.mxu0 }
 0x203   : > { %2259 = vst.msk [vmem:[#allocation2 + $0xc8] sm:$0xf] %vm2233_vm11, %v2188_v13  ;;  %v2186_v36 = vpop.permute.xlu0 %2185  ;;  %v3764_v25 = vadd.f32 %v3763_v30, %v3651_v34  ;;  %v3805_v37 = vmul.f32 %v3651_v34, %v3651_v34 }
 0x204   : > { %2258 = vst.msk [vmem:[#allocation2 + $0xc0] sm:$0xf] %vm2233_vm11, %v2186_v36  ;;  %v3653_v33 = vpop.f32.mrf.mxu0 }
 0x205   : > { %v3836_v38 = vadd.f32 %v3835_v32, %v3805_v37  ;;  %v4502_v32 = vld [vmem:[#allocation2 + $0xe4] ss:$8 sps:$4 sm:$0xff]  }
 0x206   : > { %v2382_v40 = vpop.permute.xlu1 %2381 }
 0x207   : > { %2453 = vst.msk [vmem:[#allocation2 + $0xc8] sm:$0xf] %vm2427_vm12, %v2382_v40  ;;  %v2380_v41 = vpop.permute.xlu0 %2379 }
 0x208   : > { %2452 = vst.msk [vmem:[#allocation2 + $0xc0] sm:$0xf] %vm2427_vm12, %v2380_v41 }
 0x20a   : > { %v2943_v42 = vpop.permute.xlu1 %2942 }
 0x20b   : > { %3014 = vst.msk [vmem:[#allocation2 + $0xc8] sm:$0xf] %vm2988_vm13, %v2943_v42  ;;  %v2941_v43 = vpop.permute.xlu0 %2940 }
 0x20c   : > { %3013 = vst.msk [vmem:[#allocation2 + $0xc0] sm:$0xf] %vm2988_vm13, %v2941_v43 }
 0x20e   : > { %v1100_v44 = vpop.permute.xlu1 %1099 }
 0x20f   : > { %1169 = vst.msk [vmem:[#allocation2 + $0xd8] sm:$0xf] %vm1141_vm8, %v1100_v44  ;;  %v1098_v45 = vpop.permute.xlu0 %1097 }
 0x210   : > { %1168 = vst.msk [vmem:[#allocation2 + $0xd0] sm:$0xf] %vm1141_vm8, %v1098_v45  ;;  %v4504_v45 = vld [vmem:[#allocation2 + $0xf4] ss:$8 sps:$4 sm:$0xff]  }
 0x212   : > { %v1294_v39 = vpop.permute.xlu1 %1293  ;;  %v3318_v35 = vld [vmem:[#allocation2 + $0xc8] sm:$0xff] }
 0x213   : > { %1363 = vst.msk [vmem:[#allocation2 + $0xd8] sm:$0xf] %vm1335_vm9, %v1294_v39  ;;  %v1292_v47 = vpop.permute.xlu0 %1291  ;;  %v3317_v48 = vld [vmem:[#allocation2 + $0xc0] sm:$0xff] }
 0x214   : > { %1362 = vst.msk [vmem:[#allocation2 + $0xd0] sm:$0xf] %vm1335_vm9, %v1292_v47  ;;  %v4336_v50 = vcombine.low %v3317_v48, %v3318_v35 }
 0x216   : > { %v1855_v51 = vpop.permute.xlu1 %1854  ;;  %3719 = vmatmul.mubr.bf16.gmra.mxu1 %v4336_v50 }
 0x217   : > { %1924 = vst.msk [vmem:[#allocation2 + $0xd8] sm:$0xf] %vm1896_vm10, %v1855_v51  ;;  %v1853_v5 = vpop.permute.xlu0 %1852  ;;  %4366 = vmatprep.mubr.msk.bf16.mxu1 %vm3541_vm14, %v4500_v2 }
 0x218   : > { %1923 = vst.msk [vmem:[#allocation2 + $0xd0] sm:$0xf] %vm1896_vm10, %v1853_v5 }
 0x21a   : > { %v2192_v46 = vpop.permute.xlu1 %2191 }
 0x21b   : > { %2261 = vst.msk [vmem:[#allocation2 + $0xd8] sm:$0xf] %vm2233_vm11, %v2192_v46  ;;  %v2190_v52 = vpop.permute.xlu0 %2189 }
 0x21c   : > { %2260 = vst.msk [vmem:[#allocation2 + $0xd0] sm:$0xf] %vm2233_vm11, %v2190_v52 }
 0x21e   : > { %v2386_v53 = vpop.permute.xlu1 %2385 }
 0x21f   : > { %2455 = vst.msk [vmem:[#allocation2 + $0xd8] sm:$0xf] %vm2427_vm12, %v2386_v53  ;;  %v2384_v54 = vpop.permute.xlu0 %2383 }
 0x220   : > { %2454 = vst.msk [vmem:[#allocation2 + $0xd0] sm:$0xf] %vm2427_vm12, %v2384_v54 }
 0x222   : > { %v2947_v55 = vpop.permute.xlu1 %2946 }
 0x223   : > { %3016 = vst.msk [vmem:[#allocation2 + $0xd8] sm:$0xf] %vm2988_vm13, %v2947_v55  ;;  %v2945_v56 = vpop.permute.xlu0 %2944 }
 0x224   : > { %3015 = vst.msk [vmem:[#allocation2 + $0xd0] sm:$0xf] %vm2988_vm13, %v2945_v56 }
 0x226   : > { %v1104_v57 = vpop.permute.xlu1 %1103 }
 0x227   : > { %1171 = vst.msk [vmem:[#allocation2 + $0xe8] sm:$0xf] %vm1141_vm8, %v1104_v57  ;;  %v1102_v58 = vpop.permute.xlu0 %1101 }
 0x228   : > { %1170 = vst.msk [vmem:[#allocation2 + $0xe0] sm:$0xf] %vm1141_vm8, %v1102_v58 }
 0x22a   : > { %v1298_v27 = vpop.permute.xlu1 %1297  ;;  %v3656_v59 = vpop.f32.mrf.mxu0  ;;  %v3320_v60 = vld [vmem:[#allocation2 + $0xd8] sm:$0xff] }
 0x22b   : > { %1365 = vst.msk [vmem:[#allocation2 + $0xe8] sm:$0xf] %vm1335_vm9, %v1298_v27  ;;  %v1296_v61 = vpop.permute.xlu0 %1295  ;;  %v3765_v62 = vadd.f32 %v3764_v25, %v3656_v59  ;;  %v3806_v63 = vmul.f32 %v3656_v59, %v3656_v59  ;;  %v3319_v1 = vld [vmem:[#allocation2 + $0xd0] sm:$0xff] }
 0x22c   : > { %1364 = vst.msk [vmem:[#allocation2 + $0xe0] sm:$0xf] %vm1335_vm9, %v1296_v61  ;;  %v3658_v3 = vpop.f32.mrf.mxu0  ;;  %v4338_v4 = vcombine.low %v3319_v1, %v3320_v60  ;;  %v6207_v23 = vpop.f32.mrf.mxu1 }
 0x22d   : > { %v3837_v6 = vadd.f32 %v3836_v38, %v3806_v63 }
 0x22e   : > { %v1859_v7 = vpop.permute.xlu1 %1858  ;;  %v3659_v9 = vpop.f32.mrf.mxu0  ;;  %3727 = vmatmul.mubr.bf16.gmra.mxu1 %v4338_v4 }
 0x22f   : > { %1926 = vst.msk [vmem:[#allocation2 + $0xe8] sm:$0xf] %vm1896_vm10, %v1859_v7  ;;  %v1857_v10 = vpop.permute.xlu0 %1856  ;;  %v3766_v11 = vadd.f32 %v3765_v62, %v3659_v9  ;;  %v3807_v12 = vmul.f32 %v3659_v9, %v3659_v9  ;;  %v3690_v15 = vpop.f32.mrf.mxu1  ;;  %4367 = vmatprep.mubr.msk.bf16.mxu1 %vm3541_vm14, %v4502_v32 }
 0x230   : > { %1925 = vst.msk [vmem:[#allocation2 + $0xe0] sm:$0xf] %vm1896_vm10, %v1857_v10  ;;  %v3661_v14 = vpop.f32.mrf.mxu0 }
 0x231   : > { %v3838_v0 = vadd.f32 %v3837_v6, %v3807_v12  ;;  %v6211_v17 = vpop.f32.mrf.mxu1  ;;  %v4623_v6 = vmov 0.0  }
 0x232   : > { %v2196_v16 = vpop.permute.xlu1 %2195  ;;  %3755 = vst [vmem:[%s6236_s6] sm:$0xff] %v4623_v6  ;;  %3756 = vst [vmem:[%s6239_s7] sm:$0xff] %v4623_v6 }
 0x233   : > { %2263 = vst.msk [vmem:[#allocation2 + $0xe8] sm:$0xf] %vm2233_vm11, %v2196_v16  ;;  %v2194_v8 = vpop.permute.xlu0 %2193  ;;  %v3693_v19 = vpop.f32.mrf.mxu1 }
 0x234   : > { %2262 = vst.msk [vmem:[#allocation2 + $0xe0] sm:$0xf] %vm2233_vm11, %v2194_v8 }
 0x236   : > { %v2390_v20 = vpop.permute.xlu1 %2389 }
 0x237   : > { %2457 = vst.msk [vmem:[#allocation2 + $0xe8] sm:$0xf] %vm2427_vm12, %v2390_v20  ;;  %v2388_v21 = vpop.permute.xlu0 %2387  ;;  %v3814_v20 = vmul.f32 %v6207_v23, %v6207_v23 }
 0x238   : > { %2456 = vst.msk [vmem:[#allocation2 + $0xe0] sm:$0xf] %vm2427_vm12, %v2388_v21 }
 0x23a   : > { %v2951_v22 = vpop.permute.xlu1 %2950 }
 0x23b   : > { %3018 = vst.msk [vmem:[#allocation2 + $0xe8] sm:$0xf] %vm2988_vm13, %v2951_v22  ;;  %v2949_v24 = vpop.permute.xlu0 %2948 }
 0x23c   : > { %3017 = vst.msk [vmem:[#allocation2 + $0xe0] sm:$0xf] %vm2988_vm13, %v2949_v24 }
 0x23e   : > { %v1108_v26 = vpop.permute.xlu1 %1107 }
 0x23f   : > { %1173 = vst.msk [vmem:[#allocation2 + $0xf8] sm:$0xf] %vm1141_vm8, %v1108_v26  ;;  %v1106_v28 = vpop.permute.xlu0 %1105  ;;  %v3815_v26 = vmul.f32 %v6211_v17, %v6211_v17 }
 0x240   : > { %1172 = vst.msk [vmem:[#allocation2 + $0xf0] sm:$0xf] %vm1141_vm8, %v1106_v28 }
 0x242   : > { %v1302_v29 = vpop.permute.xlu1 %1301  ;;  %v3322_v30 = vld [vmem:[#allocation2 + $0xe8] sm:$0xff] }
 0x243   : > { %1367 = vst.msk [vmem:[#allocation2 + $0xf8] sm:$0xf] %vm1335_vm9, %v1302_v29  ;;  %v1300_v18 = vpop.permute.xlu0 %1299  ;;  %v3321_v31 = vld [vmem:[#allocation2 + $0xe0] sm:$0xff] }
 0x244   : > { %1366 = vst.msk [vmem:[#allocation2 + $0xf0] sm:$0xf] %vm1335_vm9, %v1300_v18  ;;  %v4340_v13 = vcombine.low %v3321_v31, %v3322_v30 }
 0x246   : > { %v1863_v34 = vpop.permute.xlu1 %1862  ;;  %3735 = vmatmul.mubr.bf16.gmra.mxu1 %v4340_v13 }
 0x247   : > { %1928 = vst.msk [vmem:[#allocation2 + $0xf8] sm:$0xf] %vm1896_vm10, %v1863_v34  ;;  %v1861_v36 = vpop.permute.xlu0 %1860  ;;  %4368 = vmatprep.mubr.msk.bf16.mxu1 %vm3541_vm14, %v4504_v45 }
 0x248   : > { %1927 = vst.msk [vmem:[#allocation2 + $0xf0] sm:$0xf] %vm1896_vm10, %v1861_v36 }
 0x24a   : > { %v2200_v25 = vpop.permute.xlu1 %2199 }
 0x24b   : > { %2265 = vst.msk [vmem:[#allocation2 + $0xf8] sm:$0xf] %vm2233_vm11, %v2200_v25  ;;  %v2198_v37 = vpop.permute.xlu0 %2197 }
 0x24c   : > { %2264 = vst.msk [vmem:[#allocation2 + $0xf0] sm:$0xf] %vm2233_vm11, %v2198_v37 }
 0x24e   : > { %v2394_v33 = vpop.permute.xlu1 %2393 }
 0x24f   : > { %2459 = vst.msk [vmem:[#allocation2 + $0xf8] sm:$0xf] %vm2427_vm12, %v2394_v33  ;;  %v2392_v38 = vpop.permute.xlu0 %2391 }
 0x250   : > { %2458 = vst.msk [vmem:[#allocation2 + $0xf0] sm:$0xf] %vm2427_vm12, %v2392_v38 }
 0x252   : > { %v2955_v40 = vpop.permute.xlu1 %2954 }
 0x253   : > { %3020 = vst.msk [vmem:[#allocation2 + $0xf8] sm:$0xf] %vm2988_vm13, %v2955_v40  ;;  %v2953_v41 = vpop.permute.xlu0 %2952 }
 0x254   : > { %3019 = vst.msk [vmem:[#allocation2 + $0xf0] sm:$0xf] %vm2988_vm13, %v2953_v41 }
 0x25a   : > { %v3664_v42 = vpop.f32.mrf.mxu0 }
 0x25b   : > { %v3767_v43 = vadd.f32 %v3766_v11, %v3664_v42  ;;  %v3808_v44 = vmul.f32 %v3664_v42, %v3664_v42  ;;  %v4506_v39 = vld [vmem:[#allocation2 + $0xf0] ss:$8 sps:$4 sm:$0xff]  }
 0x25c   : > { %v3666_v35 = vpop.f32.mrf.mxu0  ;;  %3743 = vmatmul.mubr.bf16.gmra.mxu1 %v4506_v39 }
 0x25d   : > { %v3839_v47 = vadd.f32 %v3838_v0, %v3808_v44 }
 0x25e   : > { %v3667_v48 = vpop.f32.mrf.mxu0  ;;  %v3696_v49 = vpop.f32.mrf.mxu1 }
 0x25f   : > { %v3768_v50 = vadd.f32 %v3767_v43, %v3667_v48  ;;  %v3809_v51 = vmul.f32 %v3667_v48, %v3667_v48  ;;  %v3816_v18 = vmul.f32 %v3696_v49, %v3696_v49 }
 0x260   : > { %v3669_v5 = vpop.f32.mrf.mxu0  ;;  %v3698_v46 = vpop.f32.mrf.mxu1 }
 0x261   : > { %v3840_v52 = vadd.f32 %v3839_v47, %v3809_v51 }
 0x262   : > { %v3699_v53 = vpop.f32.mrf.mxu1 }
 0x263   : > { %v3817_v13 = vmul.f32 %v3699_v53, %v3699_v53 }
 0x264   : > { %v3701_v54 = vpop.f32.mrf.mxu1 }
 0x28a   : > { %v3672_v55 = vpop.f32.mrf.mxu0 }
 0x28b   : > { %v3769_v56 = vadd.f32 %v3768_v50, %v3672_v55  ;;  %v3810_v57 = vmul.f32 %v3672_v55, %v3672_v55 }
 0x28c   : > { %v3674_v58 = vpop.f32.mrf.mxu0 }
 0x28d   : > { %v3841_v27 = vadd.f32 %v3840_v52, %v3810_v57 }
 0x28e   : > { %v3675_v59 = vpop.f32.mrf.mxu0  ;;  %v3704_v60 = vpop.f32.mrf.mxu1 }
 0x28f   : > { %v3770_v61 = vadd.f32 %v3769_v56, %v3675_v59  ;;  %v3811_v62 = vmul.f32 %v3675_v59, %v3675_v59  ;;  %v3818_v25 = vmul.f32 %v3704_v60, %v3704_v60 }
 0x290   : > { %v3677_v63 = vpop.f32.mrf.mxu0  ;;  %v3706_v1 = vpop.f32.mrf.mxu1 }
 0x291   : > { %v3842_v2 = vadd.f32 %v3841_v27, %v3811_v62 }
 0x292   : > { %v3707_v3 = vpop.f32.mrf.mxu1 }
 0x293   : > { %v3819_v38 = vmul.f32 %v3707_v3, %v3707_v3 }
 0x294   : > { %v3709_v4 = vpop.f32.mrf.mxu1 }
 0x2ba   : > { %v3680_v7 = vpop.f32.mrf.mxu0 }
 0x2bb   : > { %v3771_v9 = vadd.f32 %v3770_v61, %v3680_v7  ;;  %v3812_v10 = vmul.f32 %v3680_v7, %v3680_v7 }
 0x2bc   : > { %v3682_v11 = vpop.f32.mrf.mxu0 }
 0x2bd   : > { %v3843_v12 = vadd.f32 %v3842_v2, %v3812_v10 }
 0x2be   : > { %v3683_v14 = vpop.f32.mrf.mxu0  ;;  %v3712_v0 = vpop.f32.mrf.mxu1 }
 0x2bf   : > { %v3772_v15 = vadd.f32 %v3771_v9, %v3683_v14  ;;  %v3813_v16 = vmul.f32 %v3683_v14, %v3683_v14  ;;  %v3820_v42 = vmul.f32 %v3712_v0, %v3712_v0 }
 0x2c0   : > { %v3685_v8 = vpop.f32.mrf.mxu0  ;;  %v3714_v19 = vpop.f32.mrf.mxu1 }
 0x2c1   : > { %v3773_v21 = vadd.f32 %v3772_v15, %v6207_v23  ;;  %v3844_v22 = vadd.f32 %v3843_v12, %v3813_v16 }
 0x2c2   : > { %v3715_v24 = vpop.f32.mrf.mxu1 }
 0x2c3   : > { %v3774_v28 = vadd.f32 %v3773_v21, %v6211_v17  ;;  %v3845_v29 = vadd.f32 %v3844_v22, %v3814_v20  ;;  %v3821_v17 = vmul.f32 %v3715_v24, %v3715_v24 }
 0x2c4   : > { %v3717_v30 = vpop.f32.mrf.mxu1 }
 0x2c5   : > { %v3775_v31 = vadd.f32 %v3774_v28, %v3696_v49  ;;  %v3846_v32 = vadd.f32 %v3845_v29, %v3815_v26 }
 0x2c7   : > { %v3847_v34 = vadd.f32 %v3846_v32, %v3816_v18  ;;  %v3776_v36 = vadd.f32 %v3775_v31, %v3699_v53 }
 0x2c9   : > { %v3777_v37 = vadd.f32 %v3776_v36, %v3704_v60  ;;  %v3848_v33 = vadd.f32 %v3847_v34, %v3817_v13  ;;  %v3757_v34 = vld [vmem:[%s6236_s6] sm:$0x1] }
 0x2cb   : > { %v3778_v23 = vadd.f32 %v3777_v37, %v3707_v3  ;;  %v3849_v40 = vadd.f32 %v3848_v33, %v3818_v25  ;;  %v3797_v37 = vld [vmem:[%s6239_s7] sm:$0x1] }
 0x2cd   : > { %v3779_v41 = vadd.f32 %v3778_v23, %v3712_v0  ;;  %v3850_v43 = vadd.f32 %v3849_v40, %v3819_v38 }
 0x2cf   : > { %v3851_v44 = vadd.f32 %v3850_v43, %v3820_v42  ;;  %v3780_v45 = vadd.f32 %v3779_v41, %v3715_v24 }
 0x2d1   : > { %v3852_v39 = vadd.f32 %v3851_v44, %v3821_v17 }
 0x2d6   : > { %v3720_v35 = vpop.f32.mrf.mxu1 }
 0x2d7   : > { %v3822_v56 = vmul.f32 %v3720_v35, %v3720_v35  ;;  %v3781_v57 = vadd.f32 %v3780_v45, %v3720_v35 }
 0x2d8   : > { %v3722_v47 = vpop.f32.mrf.mxu1 }
 0x2d9   : > { %v3853_v27 = vadd.f32 %v3852_v39, %v3822_v56 }
 0x2da   : > { %v3723_v48 = vpop.f32.mrf.mxu1 }
 0x2db   : > { %v3823_v58 = vmul.f32 %v3723_v48, %v3723_v48  ;;  %v3782_v59 = vadd.f32 %v3781_v57, %v3723_v48 }
 0x2dc   : > { %v3725_v49 = vpop.f32.mrf.mxu1 }
 0x2dd   : > { %v3854_v61 = vadd.f32 %v3853_v27, %v3823_v58 }
 0x2ee   : > { %v3728_v50 = vpop.f32.mrf.mxu1 }
 0x2ef   : > { %v3824_v60 = vmul.f32 %v3728_v50, %v3728_v50  ;;  %v3783_v62 = vadd.f32 %v3782_v59, %v3728_v50 }
 0x2f0   : > { %v3730_v51 = vpop.f32.mrf.mxu1 }
 0x2f1   : > { %v3855_v1 = vadd.f32 %v3854_v61, %v3824_v60 }
 0x2f2   : > { %v3731_v5 = vpop.f32.mrf.mxu1 }
 0x2f3   : > { %v3825_v63 = vmul.f32 %v3731_v5, %v3731_v5  ;;  %v3784_v2 = vadd.f32 %v3783_v62, %v3731_v5 }
 0x2f4   : > { %v3733_v46 = vpop.f32.mrf.mxu1 }
 0x2f5   : > { %v3856_v4 = vadd.f32 %v3855_v1, %v3825_v63 }
 0x306   : > { %v3736_v52 = vpop.f32.mrf.mxu1 }
 0x307   : > { %v3826_v3 = vmul.f32 %v3736_v52, %v3736_v52  ;;  %v3785_v6 = vadd.f32 %v3784_v2, %v3736_v52 }
 0x308   : > { %v3738_v53 = vpop.f32.mrf.mxu1 }
 0x309   : > { %v3857_v10 = vadd.f32 %v3856_v4, %v3826_v3 }
 0x30a   : > { %v3739_v54 = vpop.f32.mrf.mxu1 }
 0x30b   : > { %v3827_v7 = vmul.f32 %v3739_v54, %v3739_v54  ;;  %v3786_v11 = vadd.f32 %v3785_v6, %v3739_v54 }
 0x30c   : > { %v3741_v55 = vpop.f32.mrf.mxu1 }
 0x30d   : > { %v3858_v0 = vadd.f32 %v3857_v10, %v3827_v7 }
 0x31c   : > { %v3744_v9 = vpop.f32.mrf.mxu1 }
 0x31d   : > { %v3828_v12 = vmul.f32 %v3744_v9, %v3744_v9  ;;  %v3787_v15 = vadd.f32 %v3786_v11, %v3744_v9 }
 0x31e   : > { %v3746_v14 = vpop.f32.mrf.mxu1 }
 0x31f   : > { %v3859_v8 = vadd.f32 %v3858_v0, %v3828_v12 }
 0x320   : > { %v3747_v16 = vpop.f32.mrf.mxu1 }
 0x321   : > { %v3788_v19 = vadd.f32 %v3787_v15, %v3747_v16  ;;  %v3829_v20 = vmul.f32 %v3747_v16, %v3747_v16 }
 0x322   : > { %v3749_v21 = vpop.f32.mrf.mxu1 }
 0x323   : > { %v3789_v22 = vrot.slane %v3788_v19, 4  ;;  %v3860_v24 = vadd.f32 %v3859_v8, %v3829_v20 }
 0x325   : > { %v3790_v26 = vadd.f32 %v3789_v22, %v3788_v19  ;;  %v3861_v28 = vrot.slane %v3860_v24, 4 }
 0x327   : > { %v3791_v29 = vrot.slane %v3790_v26, 2  ;;  %v3862_v30 = vadd.f32 %v3861_v28, %v3860_v24 }
 0x329   : > { %v3792_v18 = vadd.f32 %v3791_v29, %v3790_v26  ;;  %v3863_v31 = vrot.slane %v3862_v30, 2 }
 0x32b   : > { %v3793_v32 = vrot.slane %v3792_v18, 1  ;;  %v3864_v13 = vadd.f32 %v3863_v31, %v3862_v30 }
 0x32d   : > { %v3794_v36 = vadd.f32 %v3793_v32, %v3792_v18  ;;  %v3865_v25 = vrot.slane %v3864_v13, 1 }
 0x32f   : > { %v3866_v33 = vadd.f32 %v3865_v25, %v3864_v13  ;;  %v3795_v38 = vadd.f32 %v3794_v36, %v3757_v34 }
 0x331   : > { %3796 = vst [vmem:[%s6236_s6] sm:$0x1] %v3795_v38  ;;  %v3867_v23 = vadd.f32 %v3866_v33, %v3797_v37 }
 0x332   : > { %4520 = shalt.err (!%p4517_p5)
}
 0x333   : > { %s4521_s5 = scalar_lea.hbm %s6256_s11, 128  ;;  %s4525_s29 = scalar_lea.hbm %s6335_s2, 256 }
 0x334   : > { %p4522_p6 = scmp.ne.s32.totalorder %s6256_s11, %s4521_s5  ;;  %p4526_p10 = scmp.lt.s32.totalorder %s6256_s11, %s6335_s2 }
 0x335   : > { %p4527_p11 = scmp.lt.s32.totalorder %s4525_s29, %s4521_s5 }
 0x336   : > { %p4523_p7 = pnand %p4522_p6, %p4686_p4 }
 0x337   : > { %p4528_p12 = por %p4527_p11, %p4526_p10 }
 0x338   : > { %p4524_p9 = pneg %p4523_p7 }
 0x33a   : > { %p4529_p13 = pnand %p4528_p12, %p4524_p9 }
 0x33c   : > { %4532 = shalt.err (!%p4529_p13)
}
 0x33d   : > { %4394 = dma.vmem_to_hbm [thread:$0]  (%p4686_p4), %s6258_s9, 128, %s6256_s11, %s3870_s21   ;;  %3868 = vst [vmem:[%s6239_s7] sm:$0x1] %v3867_v23 }
 0x33e   : > { %s3875_s18 = scalar_lea.sflag [#allocation6], %s6233_s30  ;;  %s4533_s23 = scalar_lea.vmem %s6266_s10, 128 }
 0x33f   : > { %p4534_p0 = scmp.ne.s32.totalorder %s6266_s10, %s4533_s23  ;;  %s4625_s26 = smov [#allocation5]  }
 0x340   : > { %s4537_s27 = sshll.u32 %s4625_s26, 4  ;;  %s4538_s27 = int_to_ptr.vmem [resolvable:$false] %s4537_s27 }
 0x341   : > { %p4535_p1 = pnand %p4534_p0, %p4686_p4  ;;  %s4539_s28 = scalar_lea.vmem %s4538_s27, 256 }
 0x342   : > { %p4540_p3 = scmp.lt.s32.totalorder %s6266_s10, %s4538_s27  ;;  %p4541_p5 = scmp.lt.s32.totalorder %s4539_s28, %s4533_s23 }
 0x343   : > { %p4536_p2 = pneg %p4535_p1 }
 0x344   : > { %p4542_p6 = por %p4541_p5, %p4540_p3 }
 0x346   : > { %p4543_p7 = pnand %p4542_p6, %p4536_p2 }
 0x348   : > { %4546 = shalt.err (!%p4543_p7)
}
 0x349   : > { %s4547_s7 = scalar_lea.hbm %s6264_s19, 128  ;;  %s4551_s11 = scalar_lea.hbm %s6336_s3, 256 }
 0x34a   : > { %p4548_p9 = scmp.ne.s32.totalorder %s6264_s19, %s4547_s7  ;;  %p4552_p12 = scmp.lt.s32.totalorder %s6264_s19, %s6336_s3 }
 0x34b   : > { %p4553_p13 = scmp.lt.s32.totalorder %s4551_s11, %s4547_s7 }
 0x34c   : > { %p4549_p10 = pnand %p4548_p9, %p4686_p4 }
 0x34d   : > { %p4554_p0 = por %p4553_p13, %p4552_p12 }
 0x34e   : > { %p4550_p11 = pneg %p4549_p10 }
 0x350   : > { %p4555_p1 = pnand %p4554_p0, %p4550_p11 }
 0x352   : > { %4558 = shalt.err (!%p4555_p1)
}
 0x353   : > { %4395 = dma.vmem_to_hbm [thread:$0]  (%p4686_p4), %s6266_s10, 128, %s6264_s19, %s3875_s18  }
 0x354 PF: > { %p4405_p2 = scmp.ge.s32.totalorder %s4613_s17, 2  ;;  %s3913_s6 = sand.u32 1, %s4593_s12  }
 0x355   : > { %s3914_s8 = scalar_lea.sflag [#allocation4], %s3913_s6 }
 0x356   : > { %p4399_p3 = pnand %p4405_p2, %p4693_p8 }
 0x358   : > { %p4400_p5 = pneg %p4399_p3 }
 0x35a   : > { %4584 = dma.done.wait (%p4400_p5), %s3914_s8, 128  }
 0x35b   : > { %4586 = vsyncadd (%p4400_p5), %s3914_s8, 4294967168  ;;  %s3923_s29 = scalar_lea.sflag [#allocation6], %s3913_s6 }
 0x35c   : > { %4588 = dma.done.wait (%p4400_p5), %s3923_s29, 128  }
 0x35d   : > { %4590 = vsyncadd (%p4400_p5), %s3923_s29, 4294967168  ;;  %s20_s17 = sadd.s32 1, %s4613_s17   ;;  %s6343_s12 = smov %s4597_s13 }
 0x35e   : > { %p17_p6 = scmp.ge.s32.totalorder %s20_s17, 4   ;;  %s6344_s13 = smov %s4601_s14 }
 0x35f   : > { %s6345_s14 = smov %s4699_s25  ;;  %s6346_s15 = smov %s4609_s16 }
 0x360   : > { %s6347_s16 = smov %s6349_s20  ;;  %19 = sbr.rel (!%p17_p6) target bundleno = 6 (0x6), region = 86 }
 0x365   :  { %3928 = vsyncpa [#allocation4], 1 }
 0x366   :  { %3930 = vsyncpa [#allocation4 + $0x1], 1 }
 0x367   :  { %3931 = vsyncpa [#allocation6], 1 }
 0x368   :  { %3933 = vsyncpa [#allocation6 + $0x1], 1 }

</bundles_post_ra>
